<compile_context>
chip_gen: v6e
topology: v6e:2x2x1
jax: 0.10.0
libtpu: 0.0.40
codegen_flags: <defaults>
</compile_context>

<pallas_src>
import functools
import math

import jax
import jax.numpy as jnp
from jax.experimental import pallas as pl
from jax.experimental.pallas import tpu as pltpu


# ---------------------------------------------------------------------------
# Pallas kernel: residual attention block for one block of batch elements.
# ---------------------------------------------------------------------------
def _residual_block_kernel(n_head, head_dim,
                           x_ref,
                           ln1_w_ref, ln1_b_ref,
                           wqkv_ref, bqkv_ref,
                           wo_ref, bo_ref,
                           ln2_w_ref, ln2_b_ref,
                           wfc_ref, bfc_ref,
                           wproj_ref, bproj_ref,
                           out_ref):
    bb, seq, d = x_ref.shape
    rows = bb * seq
    x = x_ref[...].reshape(rows, d)                      # f32 activations

    def layernorm(v, w, b):
        # Fused statistics: E[x] and E[x^2] (no dependent (x-mu)^2 pass before
        # the second cross-lane reduction); var = E[x^2] - mu^2, guarded >= 0.
        mu = jnp.mean(v, axis=-1, keepdims=True)
        ex2 = jnp.mean(v * v, axis=-1, keepdims=True)
        var = jnp.maximum(ex2 - mu * mu, 0.0)
        return (v - mu) * jax.lax.rsqrt(var + 1e-5) * w + b

    ln1_w, ln1_b = ln1_w_ref[...], ln1_b_ref[...]        # loaded once
    ln2_w, ln2_b = ln2_w_ref[...], ln2_b_ref[...]

    # ---- attention branch: x + MHA(ln_1(x)) --------------------------------
    xn = layernorm(x, ln1_w, ln1_b)
    # Fused QKV projection (1/sqrt(head_dim) is folded into the q columns).
    qkv = jnp.dot(xn.astype(jnp.bfloat16), wqkv_ref[...],
                  preferred_element_type=jnp.float32) + bqkv_ref[...]

    bh = bb * n_head

    def split_heads(t2d):
        # (rows, d) -> (bb*n_head, seq, head_dim); one relayout for ALL heads
        # instead of n_head lane slices + reshapes.
        t = t2d.reshape(bb, seq, n_head, head_dim)
        return jnp.transpose(t, (0, 2, 1, 3)).reshape(bh, seq, head_dim)

    q = split_heads(qkv[:, :d].astype(jnp.bfloat16))
    k = split_heads(qkv[:, d:2 * d].astype(jnp.bfloat16))
    v = split_heads(qkv[:, 2 * d:].astype(jnp.bfloat16))

    # All heads in one batched einsum pair (contract last dims; no kh.T).
    s = jnp.einsum("bqd,bkd->bqk", q, k, preferred_element_type=jnp.float32)
    s = s - jnp.max(s, axis=-1, keepdims=True)
    p = jnp.exp(s)
    denom = jnp.sum(p, axis=-1, keepdims=True)
    # EUP approx reciprocal: ~2^-12 relative error vs exact softmax (documented;
    # covered by the 1e-2 tolerance of the harness check).
    p = p * pl.reciprocal(denom, approx=True)
    o = jnp.einsum("bqk,bkd->bqd", p.astype(jnp.bfloat16), v,
                   preferred_element_type=jnp.float32)

    # Merge heads back -> single (rows, d) @ (d, d) out-projection (no concat).
    o = o.astype(jnp.bfloat16).reshape(bb, n_head, seq, head_dim)
    attn = jnp.transpose(o, (0, 2, 1, 3)).reshape(rows, d)
    attn = jnp.dot(attn, wo_ref[...],
                   preferred_element_type=jnp.float32) + bo_ref[...]
    x1 = x + attn

    # ---- MLP branch: x + c_proj(QuickGELU(c_fc(ln_2(x)))) ------------------
    xn2 = layernorm(x1, ln2_w, ln2_b)
    h1 = jnp.dot(xn2.astype(jnp.bfloat16), wfc_ref[...],
                 preferred_element_type=jnp.float32) + bfc_ref[...]
    # QuickGELU in bf16 (it feeds a bf16 matmul anyway); halves vreg pressure
    # and EUP element count on the (rows, 4d) slab.  v5e upcasts internally.
    h1 = h1.astype(jnp.bfloat16)
    h1 = h1 * jax.nn.sigmoid(1.702 * h1)
    h2 = jnp.dot(h1, wproj_ref[...],
                 preferred_element_type=jnp.float32) + bproj_ref[...]

    out_ref[...] = (x1 + h2).reshape(bb, seq, d)


# ---------------------------------------------------------------------------
# Wrapper
# ---------------------------------------------------------------------------
_PARAM_ORDER = ("ln1_w", "ln1_b", "wqkv", "bqkv", "wo", "bo",
                "ln2_w", "ln2_b", "wfc", "bfc", "wproj", "bproj")

# Only errors that signal "this jax build / backend rejects Buffered(1)":
# BlockSpec kwarg rejection (TypeError), buffer_count validation (ValueError),
# unimplemented pipelining mode (NotImplementedError), Mosaic lowering failure.
_BUFFERED1_ERRORS = (TypeError, ValueError, NotImplementedError,
                     getattr(pltpu, "LoweringException", TypeError))


def _vmem_cap_bytes():
    """Physical VMEM minus 1/8 headroom for compiler/internal scratch."""
    try:
        cap = int(pltpu.get_tpu_info().vmem_capacity_bytes)
    except Exception:  # hardware query only; conservative (v7x-sized) default
        cap = 64 * 1024 * 1024
    return cap - cap // 8                       # ~56 MiB v7x, ~112 MiB v5e/v6e


def _vmem_limit_bytes(param_list, block_batch, seq, d, single_buffer_weights):
    weight_bytes = sum(int(p.size) * p.dtype.itemsize for p in param_list)
    if not single_buffer_weights:
        weight_bytes *= 2                       # default double-buffering
    rows = block_batch * seq
    slab = rows * d * 4                         # one f32 (rows, d) slab
    # x/out blocks (double-buffered, 4 slabs) + live intermediates:
    # qkv f32 (3) + q/k/v bf16 (1.5) + scores/probs + attn/residuals (~5)
    # + mlp hidden f32/bf16 (6) -> budget ~20 slabs.
    est = weight_bytes + 4 * slab + 20 * slab
    # 1.25x headroom, no large floor (never request all of v7x's 64 MiB);
    # small 8 MiB safety floor only to cover compiler-internal scratch.
    return int(min(_vmem_cap_bytes(), max(8 * 1024 * 1024, est * 5 // 4)))


def _call_block(xb, param_list, kernel, block_batch, single_buffer_weights):
    n_padded, seq, d = xb.shape
    num_blocks = n_padded // block_batch

    def const_spec(p):
        kwargs = {}
        if single_buffer_weights:
            # Weights never change across grid steps; one VMEM buffer suffices.
            kwargs["pipeline_mode"] = pl.Buffered(buffer_count=1)
        return pl.BlockSpec(p.shape, lambda b: (0, 0), **kwargs)

    in_specs = [pl.BlockSpec((block_batch, seq, d), lambda b: (b, 0, 0))]
    in_specs += [const_spec(p) for p in param_list]

    return pl.pallas_call(
        kernel,
        out_shape=jax.ShapeDtypeStruct((n_padded, seq, d), jnp.float32),
        grid=(num_blocks,),
        in_specs=in_specs,
        out_specs=pl.BlockSpec((block_batch, seq, d), lambda b: (b, 0, 0)),
        compiler_params=pltpu.CompilerParams(
            dimension_semantics=("parallel",),
            vmem_limit_bytes=_vmem_limit_bytes(
                param_list, block_batch, seq, d, single_buffer_weights)),
    )(xb, *param_list)


def residual_attention_block(x, params, n_head, block_batch=None):
    """x: (seq, batch, d_model) float32 — PyTorch MultiheadAttention layout."""
    seq, n, d = x.shape
    head_dim = d // n_head
    xb = jnp.transpose(x, (1, 0, 2))                     # (batch, seq, d)

    if block_batch is None:
        # Fill the MXU row dimension: target ~256 rows (v6e/v7x 256-wide MXU).
        block_batch = max(1, min(n, pl.cdiv(256, seq)))
        # ...but keep >=2 parallel grid steps when the batch allows, so both
        # v7x TensorCores get work (costs nothing on single-TC v5e/v6e).
        if n >= 2 and pl.cdiv(n, block_batch) < 2:
            block_batch = max(1, pl.cdiv(n, 2))
    pad = (-n) % block_batch
    if pad:
        xb = jnp.concatenate([xb, jnp.zeros((pad, seq, d), xb.dtype)], axis=0)

    param_list = [params[k] for k in _PARAM_ORDER]
    kernel = functools.partial(_residual_block_kernel, n_head, head_dim)

    try:
        # Eager pallas_call: construction AND compile errors surface here.
        out = _call_block(xb, param_list, kernel, block_batch,
                          single_buffer_weights=True)
    except _BUFFERED1_ERRORS:
        # This jax build rejected pipeline_mode=pl.Buffered(1) (single-buffered
        # constant weights); fall back to default double-buffered weight blocks.
        out = _call_block(xb, param_list, kernel, block_batch,
                          single_buffer_weights=False)

    out = out[:n]
    return jnp.transpose(out, (1, 0, 2))                 # back to (seq, batch, d)


# ---------------------------------------------------------------------------
# Deterministic parameter construction (PyTorch module shapes) + kernel prep.
# ---------------------------------------------------------------------------
def make_torch_params(key, d_model):
    """Random parameters in the PyTorch module's native layouts."""
    ks = jax.random.split(key, 12)
    d, d4 = d_model, 4 * d_model
    scale = 0.05
    return {
        # nn.MultiheadAttention: in_proj_weight (3D, D), in_proj_bias (3D,)
        "in_proj_weight": scale * jax.random.normal(ks[0], (3 * d, d), jnp.float32),
        "in_proj_bias": scale * jax.random.normal(ks[1], (3 * d,), jnp.float32),
        "out_proj_weight": scale * jax.random.normal(ks[2], (d, d), jnp.float32),
        "out_proj_bias": scale * jax.random.normal(ks[3], (d,), jnp.float32),
        # mlp (nn.Linear stores (out, in))
        "c_fc_weight": scale * jax.random.normal(ks[4], (d4, d), jnp.float32),
        "c_fc_bias": scale * jax.random.normal(ks[5], (d4,), jnp.float32),
        "c_proj_weight": scale * jax.random.normal(ks[6], (d, d4), jnp.float32),
        "c_proj_bias": scale * jax.random.normal(ks[7], (d,), jnp.float32),
        # LayerNorms
        "ln1_w": 1.0 + scale * jax.random.normal(ks[8], (d,), jnp.float32),
        "ln1_b": scale * jax.random.normal(ks[9], (d,), jnp.float32),
        "ln2_w": 1.0 + scale * jax.random.normal(ks[10], (d,), jnp.float32),
        "ln2_b": scale * jax.random.normal(ks[11], (d,), jnp.float32),
    }


def prepare_params(tp, d_model, n_head):
    """Kernel-ready params: fused/transposed, scale folded, weights in bf16."""
    d = d_model
    head_dim = d // n_head
    scale = 1.0 / math.sqrt(head_dim)
    w_in, b_in = tp["in_proj_weight"], tp["in_proj_bias"]
    # Fold the 1/sqrt(head_dim) attention scale into the q projection.
    wq = w_in[:d].T * scale
    wk = w_in[d:2 * d].T
    wv = w_in[2 * d:].T
    bq = b_in[:d] * scale
    bk = b_in[d:2 * d]
    bv = b_in[2 * d:]
    return {
        "ln1_w": tp["ln1_w"].reshape(1, d), "ln1_b": tp["ln1_b"].reshape(1, d),
        "wqkv": jnp.concatenate([wq, wk, wv], axis=1).astype(jnp.bfloat16),
        "bqkv": jnp.concatenate([bq, bk, bv]).reshape(1, 3 * d),
        "wo": tp["out_proj_weight"].T.astype(jnp.bfloat16),
        "bo": tp["out_proj_bias"].reshape(1, d),
        "ln2_w": tp["ln2_w"].reshape(1, d), "ln2_b": tp["ln2_b"].reshape(1, d),
        "wfc": tp["c_fc_weight"].T.astype(jnp.bfloat16),
        "bfc": tp["c_fc_bias"].reshape(1, 4 * d),
        "wproj": tp["c_proj_weight"].T.astype(jnp.bfloat16),
        "bproj": tp["c_proj_bias"].reshape(1, d),
    }


# ---------------------------------------------------------------------------
# Pure-JAX reference (same math; exact softmax, standard two-pass LayerNorm).
# ---------------------------------------------------------------------------
def reference_block(x, params, n_head):
    seq, n, d = x.shape
    head_dim = d // n_head

    def ln(v, w, b):
        mu = v.mean(-1, keepdims=True)
        var = ((v - mu) ** 2).mean(-1, keepdims=True)
        return (v - mu) / jnp.sqrt(var + 1e-5) * w + b

    def per_sample(xs):                                  # (seq, d) f32
        xn = ln(xs, params["ln1_w"][0], params["ln1_b"][0])
        qkv = jnp.dot(xn.astype(jnp.bfloat16), params["wqkv"],
                      preferred_element_type=jnp.float32) + params["bqkv"][0]
        q, k, v = qkv[:, :d], qkv[:, d:2 * d], qkv[:, 2 * d:]
        q = q.reshape(seq, n_head, head_dim).transpose(1, 0, 2).astype(jnp.bfloat16)
        k = k.reshape(seq, n_head, head_dim).transpose(1, 0, 2).astype(jnp.bfloat16)
        v = v.reshape(seq, n_head, head_dim).transpose(1, 0, 2).astype(jnp.bfloat16)
        s = jnp.einsum("hqd,hkd->hqk", q, k, preferred_element_type=jnp.float32)
        p = jax.nn.softmax(s, axis=-1)
        o = jnp.einsum("hqk,hkd->hqd", p.astype(jnp.bfloat16), v,
                       preferred_element_type=jnp.float32)
        o = o.transpose(1, 0, 2).reshape(seq, d).astype(jnp.bfloat16)
        x1 = xs + jnp.dot(o, params["wo"],
                          preferred_element_type=jnp.float32) + params["bo"][0]
        xn2 = ln(x1, params["ln2_w"][0], params["ln2_b"][0])
        h1 = jnp.dot(xn2.astype(jnp.bfloat16), params["wfc"],
                     preferred_element_type=jnp.float32) + params["bfc"][0]
        h1 = h1.astype(jnp.bfloat16)
        h1 = h1 * jax.nn.sigmoid(1.702 * h1)             # bf16 QuickGELU (as kernel)
        h2 = jnp.dot(h1, params["wproj"],
                     preferred_element_type=jnp.float32) + params["bproj"][0]
        return x1 + h2

    return jax.vmap(per_sample, in_axes=1, out_axes=1)(x)


if __name__ == "__main__":
    # head_dim = 128 -> every per-head slice / relayout / store is lane-dense.
    SEQ, BATCH, D_MODEL, N_HEAD = 8, 2, 256, 2

    key = jax.random.PRNGKey(0)
    kx, kp = jax.random.split(key)
    x = jax.random.normal(kx, (SEQ, BATCH, D_MODEL), jnp.float32)
    params = prepare_params(make_torch_params(kp, D_MODEL), D_MODEL, N_HEAD)

    out = jax.block_until_ready(residual_attention_block(x, params, N_HEAD))
    ref = jax.block_until_ready(reference_block(x, params, N_HEAD))

    assert out.shape == (SEQ, BATCH, D_MODEL)
    max_err = float(jnp.max(jnp.abs(out - ref)))
    # Tolerance covers the documented approx softmax reciprocal (~2^-12 rel).
    assert jnp.allclose(out, ref, atol=1e-2, rtol=1e-2), (
        f"mismatch vs reference (max abs err {max_err:.2e})")

    print("KERNEL_OK")
</pallas_src>

<mosaic_0001>
module attributes {stable_mosaic.version = 11 : i64} {
  func.func @_residual_block_kernel(%arg0: i32, %arg1: memref<1x8x256xf32, #tpu.memory_space<vmem>>, %arg2: memref<1x256xf32, #tpu.memory_space<vmem>>, %arg3: memref<1x256xf32, #tpu.memory_space<vmem>>, %arg4: memref<256x768xbf16, #tpu.memory_space<vmem>>, %arg5: memref<1x768xf32, #tpu.memory_space<vmem>>, %arg6: memref<256x256xbf16, #tpu.memory_space<vmem>>, %arg7: memref<1x256xf32, #tpu.memory_space<vmem>>, %arg8: memref<1x256xf32, #tpu.memory_space<vmem>>, %arg9: memref<1x256xf32, #tpu.memory_space<vmem>>, %arg10: memref<256x1024xbf16, #tpu.memory_space<vmem>>, %arg11: memref<1x1024xf32, #tpu.memory_space<vmem>>, %arg12: memref<1024x256xbf16, #tpu.memory_space<vmem>>, %arg13: memref<1x256xf32, #tpu.memory_space<vmem>>, %arg14: memref<1x8x256xf32, #tpu.memory_space<vmem>>) attributes {dimension_semantics = [#tpu.dimension_semantics<parallel>], iteration_bounds = array<i64: 2>, scalar_prefetch = 0 : i64, scratch_operands = 0 : i64, tpu.core_type = #tpu.core_type<tc>, window_params = [{transform_indices = @transform_0, window_bounds = array<i64: 1, 8, 256>}, {pipeline_mode = #tpu.pipeline_mode<synchronous>, transform_indices = @transform_1, window_bounds = array<i64: 1, 256>}, {pipeline_mode = #tpu.pipeline_mode<synchronous>, transform_indices = @transform_2, window_bounds = array<i64: 1, 256>}, {pipeline_mode = #tpu.pipeline_mode<synchronous>, transform_indices = @transform_3, window_bounds = array<i64: 256, 768>}, {pipeline_mode = #tpu.pipeline_mode<synchronous>, transform_indices = @transform_4, window_bounds = array<i64: 1, 768>}, {pipeline_mode = #tpu.pipeline_mode<synchronous>, transform_indices = @transform_5, window_bounds = array<i64: 256, 256>}, {pipeline_mode = #tpu.pipeline_mode<synchronous>, transform_indices = @transform_6, window_bounds = array<i64: 1, 256>}, {pipeline_mode = #tpu.pipeline_mode<synchronous>, transform_indices = @transform_7, window_bounds = array<i64: 1, 256>}, {pipeline_mode = #tpu.pipeline_mode<synchronous>, transform_indices = @transform_8, window_bounds = array<i64: 1, 256>}, {pipeline_mode = #tpu.pipeline_mode<synchronous>, transform_indices = @transform_9, window_bounds = array<i64: 256, 1024>}, {pipeline_mode = #tpu.pipeline_mode<synchronous>, transform_indices = @transform_10, window_bounds = array<i64: 1, 1024>}, {pipeline_mode = #tpu.pipeline_mode<synchronous>, transform_indices = @transform_11, window_bounds = array<i64: 1024, 256>}, {pipeline_mode = #tpu.pipeline_mode<synchronous>, transform_indices = @transform_12, window_bounds = array<i64: 1, 256>}, {transform_indices = @transform_13, window_bounds = array<i64: 1, 8, 256>}]} {
    %c0 = arith.constant 0 : index
    %c0_0 = arith.constant 0 : index
    %c0_1 = arith.constant 0 : index
    %0 = vector.load %arg1[%c0, %c0_0, %c0_1] : memref<1x8x256xf32, #tpu.memory_space<vmem>>, vector<1x8x256xf32>
    %1 = vector.shape_cast %0 : vector<1x8x256xf32> to vector<8x256xf32>
    %c0_2 = arith.constant 0 : index
    %c0_3 = arith.constant 0 : index
    %2 = vector.load %arg2[%c0_2, %c0_3] : memref<1x256xf32, #tpu.memory_space<vmem>>, vector<1x256xf32>
    %c0_4 = arith.constant 0 : index
    %c0_5 = arith.constant 0 : index
    %3 = vector.load %arg3[%c0_4, %c0_5] : memref<1x256xf32, #tpu.memory_space<vmem>>, vector<1x256xf32>
    %c0_6 = arith.constant 0 : index
    %c0_7 = arith.constant 0 : index
    %4 = vector.load %arg8[%c0_6, %c0_7] : memref<1x256xf32, #tpu.memory_space<vmem>>, vector<1x256xf32>
    %c0_8 = arith.constant 0 : index
    %c0_9 = arith.constant 0 : index
    %5 = vector.load %arg9[%c0_8, %c0_9] : memref<1x256xf32, #tpu.memory_space<vmem>>, vector<1x256xf32>
    %cst = arith.constant dense<0.000000e+00> : vector<8xf32>
    %6 = vector.multi_reduction <add>, %1, %cst [1] : vector<8x256xf32> to vector<8xf32>
    %7 = vector.shape_cast %6 : vector<8xf32> to vector<8x1xf32>
    %cst_10 = arith.constant 2.560000e+02 : f32
    %8 = vector.broadcast %cst_10 : f32 to vector<8x1xf32>
    %9 = arith.divf %7, %8 : vector<8x1xf32>
    %10 = arith.mulf %1, %1 : vector<8x256xf32>
    %cst_11 = arith.constant dense<0.000000e+00> : vector<8xf32>
    %11 = vector.multi_reduction <add>, %10, %cst_11 [1] : vector<8x256xf32> to vector<8xf32>
    %12 = vector.shape_cast %11 : vector<8xf32> to vector<8x1xf32>
    %cst_12 = arith.constant 2.560000e+02 : f32
    %13 = vector.broadcast %cst_12 : f32 to vector<8x1xf32>
    %14 = arith.divf %12, %13 : vector<8x1xf32>
    %15 = arith.mulf %9, %9 : vector<8x1xf32>
    %16 = arith.subf %14, %15 : vector<8x1xf32>
    %cst_13 = arith.constant 0.000000e+00 : f32
    %17 = vector.broadcast %cst_13 : f32 to vector<8x1xf32>
    %18 = arith.maximumf %16, %17 : vector<8x1xf32>
    %19 = vector.broadcast %9 : vector<8x1xf32> to vector<8x256xf32>
    %20 = arith.subf %1, %19 : vector<8x256xf32>
    %cst_14 = arith.constant 9.99999974E-6 : f32
    %21 = vector.broadcast %cst_14 : f32 to vector<8x1xf32>
    %22 = arith.addf %18, %21 : vector<8x1xf32>
    %23 = math.rsqrt %22 : vector<8x1xf32>
    %24 = vector.broadcast %23 : vector<8x1xf32> to vector<8x256xf32>
    %25 = arith.mulf %20, %24 : vector<8x256xf32>
    %26 = vector.broadcast %2 : vector<1x256xf32> to vector<8x256xf32>
    %27 = arith.mulf %25, %26 : vector<8x256xf32>
    %28 = vector.broadcast %3 : vector<1x256xf32> to vector<8x256xf32>
    %29 = arith.addf %27, %28 : vector<8x256xf32>
    %30 = arith.truncf %29 : vector<8x256xf32> to vector<8x256xbf16>
    %c0_15 = arith.constant 0 : index
    %c0_16 = arith.constant 0 : index
    %31 = vector.load %arg4[%c0_15, %c0_16] : memref<256x768xbf16, #tpu.memory_space<vmem>>, vector<256x768xbf16>
    %cst_17 = arith.constant dense<0.000000e+00> : vector<8x768xf32>
    %32 = tpu.matmul %30, %31, %cst_17 {dimension_numbers = #tpu.dot_dimension_numbers<[1], [0], [0], [1], [0, 0, 1, 1], [], []>} : vector<8x256xbf16>, vector<256x768xbf16>, vector<8x768xf32> -> vector<8x768xf32>
    %c0_18 = arith.constant 0 : index
    %c0_19 = arith.constant 0 : index
    %33 = vector.load %arg5[%c0_18, %c0_19] : memref<1x768xf32, #tpu.memory_space<vmem>>, vector<1x768xf32>
    %34 = vector.broadcast %33 : vector<1x768xf32> to vector<8x768xf32>
    %35 = arith.addf %32, %34 : vector<8x768xf32>
    %36 = vector.extract_strided_slice %35 {offsets = [0, 0], sizes = [8, 256], strides = [1, 1]} : vector<8x768xf32> to vector<8x256xf32>
    %37 = arith.truncf %36 : vector<8x256xf32> to vector<8x256xbf16>
    %38 = vector.shape_cast %37 : vector<8x256xbf16> to vector<1x8x2x128xbf16>
    %39 = tpu.transpose %38, [0, 2, 1, 3] : vector<1x8x2x128xbf16> -> vector<1x2x8x128xbf16>
    %40 = vector.shape_cast %39 : vector<1x2x8x128xbf16> to vector<2x8x128xbf16>
    %41 = vector.extract_strided_slice %35 {offsets = [0, 256], sizes = [8, 256], strides = [1, 1]} : vector<8x768xf32> to vector<8x256xf32>
    %42 = arith.truncf %41 : vector<8x256xf32> to vector<8x256xbf16>
    %43 = vector.shape_cast %42 : vector<8x256xbf16> to vector<1x8x2x128xbf16>
    %44 = tpu.transpose %43, [0, 2, 1, 3] : vector<1x8x2x128xbf16> -> vector<1x2x8x128xbf16>
    %45 = vector.shape_cast %44 : vector<1x2x8x128xbf16> to vector<2x8x128xbf16>
    %46 = vector.extract_strided_slice %35 {offsets = [0, 512], sizes = [8, 256], strides = [1, 1]} : vector<8x768xf32> to vector<8x256xf32>
    %47 = arith.truncf %46 : vector<8x256xf32> to vector<8x256xbf16>
    %48 = vector.shape_cast %47 : vector<8x256xbf16> to vector<1x8x2x128xbf16>
    %49 = tpu.transpose %48, [0, 2, 1, 3] : vector<1x8x2x128xbf16> -> vector<1x2x8x128xbf16>
    %50 = vector.shape_cast %49 : vector<1x2x8x128xbf16> to vector<2x8x128xbf16>
    "tpu.trace_start"() <{level = 10 : i32, message = "bqd,bkd->bqk"}> : () -> ()
    %cst_20 = arith.constant dense<0.000000e+00> : vector<2x8x8xf32>
    %51 = tpu.matmul %40, %45, %cst_20 {dimension_numbers = #tpu.dot_dimension_numbers<[2], [2], [1], [1], [0, 0, 0, 1, 1, 1], [0], [0]>} : vector<2x8x128xbf16>, vector<2x8x128xbf16>, vector<2x8x8xf32> -> vector<2x8x8xf32>
    "tpu.trace_stop"() : () -> ()
    %cst_21 = arith.constant dense<0xFF800000> : vector<2x8xf32>
    %52 = vector.multi_reduction <maximumf>, %51, %cst_21 [2] : vector<2x8x8xf32> to vector<2x8xf32>
    %53 = vector.shape_cast %52 : vector<2x8xf32> to vector<2x8x1xf32>
    %54 = vector.broadcast %53 : vector<2x8x1xf32> to vector<2x8x8xf32>
    %55 = arith.subf %51, %54 : vector<2x8x8xf32>
    %56 = math.exp %55 : vector<2x8x8xf32>
    %cst_22 = arith.constant dense<0.000000e+00> : vector<2x8xf32>
    %57 = vector.multi_reduction <add>, %56, %cst_22 [2] : vector<2x8x8xf32> to vector<2x8xf32>
    %58 = vector.shape_cast %57 : vector<2x8xf32> to vector<2x8x1xf32>
    %59 = tpu.reciprocal %58 {approx = true} : vector<2x8x1xf32> -> vector<2x8x1xf32>
    %60 = vector.broadcast %59 : vector<2x8x1xf32> to vector<2x8x8xf32>
    %61 = arith.mulf %56, %60 : vector<2x8x8xf32>
    %62 = arith.truncf %61 : vector<2x8x8xf32> to vector<2x8x8xbf16>
    "tpu.trace_start"() <{level = 10 : i32, message = "bqk,bkd->bqd"}> : () -> ()
    %cst_23 = arith.constant dense<0.000000e+00> : vector<2x8x128xf32>
    %63 = tpu.matmul %62, %50, %cst_23 {dimension_numbers = #tpu.dot_dimension_numbers<[2], [1], [1], [2], [0, 0, 0, 1, 1, 2], [0], [0]>} : vector<2x8x8xbf16>, vector<2x8x128xbf16>, vector<2x8x128xf32> -> vector<2x8x128xf32>
    "tpu.trace_stop"() : () -> ()
    %64 = arith.truncf %63 : vector<2x8x128xf32> to vector<2x8x128xbf16>
    %65 = vector.shape_cast %64 : vector<2x8x128xbf16> to vector<1x2x8x128xbf16>
    %66 = tpu.transpose %65, [0, 2, 1, 3] : vector<1x2x8x128xbf16> -> vector<1x8x2x128xbf16>
    %67 = vector.shape_cast %66 : vector<1x8x2x128xbf16> to vector<8x256xbf16>
    %c0_24 = arith.constant 0 : index
    %c0_25 = arith.constant 0 : index
    %68 = vector.load %arg6[%c0_24, %c0_25] : memref<256x256xbf16, #tpu.memory_space<vmem>>, vector<256x256xbf16>
    %cst_26 = arith.constant dense<0.000000e+00> : vector<8x256xf32>
    %69 = tpu.matmul %67, %68, %cst_26 {dimension_numbers = #tpu.dot_dimension_numbers<[1], [0], [0], [1], [0, 0, 1, 1], [], []>} : vector<8x256xbf16>, vector<256x256xbf16>, vector<8x256xf32> -> vector<8x256xf32>
    %c0_27 = arith.constant 0 : index
    %c0_28 = arith.constant 0 : index
    %70 = vector.load %arg7[%c0_27, %c0_28] : memref<1x256xf32, #tpu.memory_space<vmem>>, vector<1x256xf32>
    %71 = vector.broadcast %70 : vector<1x256xf32> to vector<8x256xf32>
    %72 = arith.addf %69, %71 : vector<8x256xf32>
    %73 = arith.addf %1, %72 : vector<8x256xf32>
    %cst_29 = arith.constant dense<0.000000e+00> : vector<8xf32>
    %74 = vector.multi_reduction <add>, %73, %cst_29 [1] : vector<8x256xf32> to vector<8xf32>
    %75 = vector.shape_cast %74 : vector<8xf32> to vector<8x1xf32>
    %cst_30 = arith.constant 2.560000e+02 : f32
    %76 = vector.broadcast %cst_30 : f32 to vector<8x1xf32>
    %77 = arith.divf %75, %76 : vector<8x1xf32>
    %78 = arith.mulf %73, %73 : vector<8x256xf32>
    %cst_31 = arith.constant dense<0.000000e+00> : vector<8xf32>
    %79 = vector.multi_reduction <add>, %78, %cst_31 [1] : vector<8x256xf32> to vector<8xf32>
    %80 = vector.shape_cast %79 : vector<8xf32> to vector<8x1xf32>
    %cst_32 = arith.constant 2.560000e+02 : f32
    %81 = vector.broadcast %cst_32 : f32 to vector<8x1xf32>
    %82 = arith.divf %80, %81 : vector<8x1xf32>
    %83 = arith.mulf %77, %77 : vector<8x1xf32>
    %84 = arith.subf %82, %83 : vector<8x1xf32>
    %cst_33 = arith.constant 0.000000e+00 : f32
    %85 = vector.broadcast %cst_33 : f32 to vector<8x1xf32>
    %86 = arith.maximumf %84, %85 : vector<8x1xf32>
    %87 = vector.broadcast %77 : vector<8x1xf32> to vector<8x256xf32>
    %88 = arith.subf %73, %87 : vector<8x256xf32>
    %cst_34 = arith.constant 9.99999974E-6 : f32
    %89 = vector.broadcast %cst_34 : f32 to vector<8x1xf32>
    %90 = arith.addf %86, %89 : vector<8x1xf32>
    %91 = math.rsqrt %90 : vector<8x1xf32>
    %92 = vector.broadcast %91 : vector<8x1xf32> to vector<8x256xf32>
    %93 = arith.mulf %88, %92 : vector<8x256xf32>
    %94 = vector.broadcast %4 : vector<1x256xf32> to vector<8x256xf32>
    %95 = arith.mulf %93, %94 : vector<8x256xf32>
    %96 = vector.broadcast %5 : vector<1x256xf32> to vector<8x256xf32>
    %97 = arith.addf %95, %96 : vector<8x256xf32>
    %98 = arith.truncf %97 : vector<8x256xf32> to vector<8x256xbf16>
    %c0_35 = arith.constant 0 : index
    %c0_36 = arith.constant 0 : index
    %99 = vector.load %arg10[%c0_35, %c0_36] : memref<256x1024xbf16, #tpu.memory_space<vmem>>, vector<256x1024xbf16>
    %cst_37 = arith.constant dense<0.000000e+00> : vector<8x1024xf32>
    %100 = tpu.matmul %98, %99, %cst_37 {dimension_numbers = #tpu.dot_dimension_numbers<[1], [0], [0], [1], [0, 0, 1, 1], [], []>} : vector<8x256xbf16>, vector<256x1024xbf16>, vector<8x1024xf32> -> vector<8x1024xf32>
    %c0_38 = arith.constant 0 : index
    %c0_39 = arith.constant 0 : index
    %101 = vector.load %arg11[%c0_38, %c0_39] : memref<1x1024xf32, #tpu.memory_space<vmem>>, vector<1x1024xf32>
    %102 = vector.broadcast %101 : vector<1x1024xf32> to vector<8x1024xf32>
    %103 = arith.addf %100, %102 : vector<8x1024xf32>
    %104 = arith.truncf %103 : vector<8x1024xf32> to vector<8x1024xbf16>
    %cst_40 = arith.constant 1.703130e+00 : bf16
    %105 = vector.broadcast %cst_40 : bf16 to vector<8x1024xbf16>
    %106 = arith.mulf %105, %104 : vector<8x1024xbf16>
    %107 = arith.negf %106 : vector<8x1024xbf16>
    %108 = math.exp %107 : vector<8x1024xbf16>
    %cst_41 = arith.constant 1.000000e+00 : bf16
    %109 = vector.broadcast %cst_41 : bf16 to vector<8x1024xbf16>
    %110 = arith.addf %109, %108 : vector<8x1024xbf16>
    %111 = arith.divf %109, %110 : vector<8x1024xbf16>
    %112 = arith.mulf %104, %111 : vector<8x1024xbf16>
    %c0_42 = arith.constant 0 : index
    %c0_43 = arith.constant 0 : index
    %113 = vector.load %arg12[%c0_42, %c0_43] : memref<1024x256xbf16, #tpu.memory_space<vmem>>, vector<1024x256xbf16>
    %cst_44 = arith.constant dense<0.000000e+00> : vector<8x256xf32>
    %114 = tpu.matmul %112, %113, %cst_44 {dimension_numbers = #tpu.dot_dimension_numbers<[1], [0], [0], [1], [0, 0, 1, 1], [], []>} : vector<8x1024xbf16>, vector<1024x256xbf16>, vector<8x256xf32> -> vector<8x256xf32>
    %c0_45 = arith.constant 0 : index
    %c0_46 = arith.constant 0 : index
    %115 = vector.load %arg13[%c0_45, %c0_46] : memref<1x256xf32, #tpu.memory_space<vmem>>, vector<1x256xf32>
    %116 = vector.broadcast %115 : vector<1x256xf32> to vector<8x256xf32>
    %117 = arith.addf %114, %116 : vector<8x256xf32>
    %118 = arith.addf %73, %117 : vector<8x256xf32>
    %119 = vector.shape_cast %118 : vector<8x256xf32> to vector<1x8x256xf32>
    %c0_47 = arith.constant 0 : index
    %c0_48 = arith.constant 0 : index
    %c0_49 = arith.constant 0 : index
    %120 = vector.load %arg14[%c0_47, %c0_48, %c0_49] : memref<1x8x256xf32, #tpu.memory_space<vmem>>, vector<1x8x256xf32>
    tpu.vector_store %arg14[%c0_47, %c0_48, %c0_49], %119 {strides = array<i32>} : memref<1x8x256xf32, #tpu.memory_space<vmem>>, vector<1x8x256xf32>,
    return
  }
  func.func @transform_0(%arg0: i32) -> (i32, i32, i32) {
    %c0_i32 = arith.constant 0 : i32
    %c0_i32_0 = arith.constant 0 : i32
    %c0_i32_1 = arith.constant 0 : i32
    return %arg0, %c0_i32, %c0_i32_0 : i32, i32, i32
  }
  func.func @transform_1(%arg0: i32) -> (i32, i32) {
    %c0_i32 = arith.constant 0 : i32
    %c0_i32_0 = arith.constant 0 : i32
    %c0_i32_1 = arith.constant 0 : i32
    return %c0_i32, %c0_i32_0 : i32, i32
  }
  func.func @transform_2(%arg0: i32) -> (i32, i32) {
    %c0_i32 = arith.constant 0 : i32
    %c0_i32_0 = arith.constant 0 : i32
    %c0_i32_1 = arith.constant 0 : i32
    return %c0_i32, %c0_i32_0 : i32, i32
  }
  func.func @transform_3(%arg0: i32) -> (i32, i32) {
    %c0_i32 = arith.constant 0 : i32
    %c0_i32_0 = arith.constant 0 : i32
    %c0_i32_1 = arith.constant 0 : i32
    return %c0_i32, %c0_i32_0 : i32, i32
  }
  func.func @transform_4(%arg0: i32) -> (i32, i32) {
    %c0_i32 = arith.constant 0 : i32
    %c0_i32_0 = arith.constant 0 : i32
    %c0_i32_1 = arith.constant 0 : i32
    return %c0_i32, %c0_i32_0 : i32, i32
  }
  func.func @transform_5(%arg0: i32) -> (i32, i32) {
    %c0_i32 = arith.constant 0 : i32
    %c0_i32_0 = arith.constant 0 : i32
    %c0_i32_1 = arith.constant 0 : i32
    return %c0_i32, %c0_i32_0 : i32, i32
  }
  func.func @transform_6(%arg0: i32) -> (i32, i32) {
    %c0_i32 = arith.constant 0 : i32
    %c0_i32_0 = arith.constant 0 : i32
    %c0_i32_1 = arith.constant 0 : i32
    return %c0_i32, %c0_i32_0 : i32, i32
  }
  func.func @transform_7(%arg0: i32) -> (i32, i32) {
    %c0_i32 = arith.constant 0 : i32
    %c0_i32_0 = arith.constant 0 : i32
    %c0_i32_1 = arith.constant 0 : i32
    return %c0_i32, %c0_i32_0 : i32, i32
  }
  func.func @transform_8(%arg0: i32) -> (i32, i32) {
    %c0_i32 = arith.constant 0 : i32
    %c0_i32_0 = arith.constant 0 : i32
    %c0_i32_1 = arith.constant 0 : i32
    return %c0_i32, %c0_i32_0 : i32, i32
  }
  func.func @transform_9(%arg0: i32) -> (i32, i32) {
    %c0_i32 = arith.constant 0 : i32
    %c0_i32_0 = arith.constant 0 : i32
    %c0_i32_1 = arith.constant 0 : i32
    return %c0_i32, %c0_i32_0 : i32, i32
  }
  func.func @transform_10(%arg0: i32) -> (i32, i32) {
    %c0_i32 = arith.constant 0 : i32
    %c0_i32_0 = arith.constant 0 : i32
    %c0_i32_1 = arith.constant 0 : i32
    return %c0_i32, %c0_i32_0 : i32, i32
  }
  func.func @transform_11(%arg0: i32) -> (i32, i32) {
    %c0_i32 = arith.constant 0 : i32
    %c0_i32_0 = arith.constant 0 : i32
    %c0_i32_1 = arith.constant 0 : i32
    return %c0_i32, %c0_i32_0 : i32, i32
  }
  func.func @transform_12(%arg0: i32) -> (i32, i32) {
    %c0_i32 = arith.constant 0 : i32
    %c0_i32_0 = arith.constant 0 : i32
    %c0_i32_1 = arith.constant 0 : i32
    return %c0_i32, %c0_i32_0 : i32, i32
  }
  func.func @transform_13(%arg0: i32) -> (i32, i32, i32) {
    %c0_i32 = arith.constant 0 : i32
    %c0_i32_0 = arith.constant 0 : i32
    %c0_i32_1 = arith.constant 0 : i32
    return %arg0, %c0_i32, %c0_i32_0 : i32, i32, i32
  }
}

</mosaic_0001>

<bundles_post_ra>
// kernel: tpu_custom_call.1
= control target key start
LH: loop header
LB: loop body
LE: loop exit
PB: predicated region body
PF: predicated region fallthrough
CT: control target
= control target key end

     0   :  { %s6478_s0 = inlined_call_operand.hbm [shape: f32[2,8,256], index: 0, kind: input, shape index: {}]   ;;  %s6479_s1 = inlined_call_operand.hbm [shape: f32[1,256], index: 1, kind: input, shape index: {}]   ;;  %s6480_s2 = inlined_call_operand.hbm [shape: f32[1,256], index: 2, kind: input, shape index: {}]   ;;  %s6481_s3 = inlined_call_operand.hbm [shape: bf16[256,768], index: 3, kind: input, shape index: {}]   ;;  %s6482_s4 = inlined_call_operand.vmem [shape: f32[1,768], index: 4, kind: input, shape index: {}]   ;;  %s6483_s5 = inlined_call_operand.hbm [shape: bf16[256,256], index: 5, kind: input, shape index: {}]   ;;  %s6484_s6 = inlined_call_operand.vmem [shape: f32[1,256], index: 6, kind: input, shape index: {}]   ;;  %s6485_s7 = inlined_call_operand.hbm [shape: f32[1,256], index: 7, kind: input, shape index: {}]   ;;  %s6486_s8 = inlined_call_operand.hbm [shape: f32[1,256], index: 8, kind: input, shape index: {}]   ;;  %s6487_s9 = inlined_call_operand.hbm [shape: bf16[256,1024], index: 9, kind: input, shape index: {}]   ;;  %s6488_s10 = inlined_call_operand.vmem [shape: f32[1,1024], index: 10, kind: input, shape index: {}]   ;;  %s6489_s11 = inlined_call_operand.hbm [shape: bf16[1024,256], index: 11, kind: input, shape index: {}]   ;;  %s6490_s12 = inlined_call_operand.vmem [shape: f32[1,256], index: 12, kind: input, shape index: {}]   ;;  %s6491_s13 = inlined_call_operand.hbm [shape: f32[2,8,256], index: 13, kind: output, shape index: {}]  }
   0x1   :  { %6496 = sst [smem:[#allocation24_spill]] %s6479_s1 }
   0x2   :  { %6497 = sst [smem:[#allocation25_spill]] %s6480_s2 }
   0x3   :  { %6498 = sst [smem:[#allocation26_spill]] %s6481_s3 }
   0x4   :  { %6499 = sst [smem:[#allocation27_spill]] %s6483_s5 }
   0x5   :  { %6500 = sst [smem:[#allocation28_spill]] %s6485_s7 }
   0x6   :  { %6501 = sst [smem:[#allocation29_spill]] %s6486_s8 }
   0x7   :  { %6502 = sst [smem:[#allocation30_spill]] %s6487_s9 }
   0x8   :  { %6503 = sst [smem:[#allocation31_spill]] %s6489_s11 }
   0x9   :  { %18 = vsyncpa [#allocation3], 0 }
   0xa   :  { %20 = vsyncpa [#allocation3 + $0x1], 0 }
   0xb   :  { %21 = vsyncpa [#allocation6], 0 }
   0xc   :  { %22 = vsyncpa [#allocation9], 0 }
   0xd   :  { %23 = vsyncpa [#allocation12], 0 }
   0xe   :  { %24 = vsyncpa [#allocation15], 0 }
   0xf   :  { %25 = vsyncpa [#allocation4], 0 }
  0x10   :  { %27 = vsyncpa [#allocation4 + $0x1], 0  ;;  %s5993_s25 = smov 0   ;;  %s5995_s26 = smov 0  }
  0x11   :  { %s5997_s27 = smov 0   ;;  %s5999_s28 = smov 0  }
  0x12 LB: > { %s5902_s29 = smov [#allocation5]   ;;  %s6014_s14 = sadd.s32 4294967295, %s5900_s28   ;;  %s5900_s28 = sphi %s5999_s28, %s6537_s28   ;;  %s5896_s27 = sphi %s5997_s27, %s6536_s27   ;;  %s5892_s26 = sphi %s5995_s26, %s6535_s26   ;;  %s5888_s25 = sphi %s5993_s25, %s6534_s25  }
  0x13   : > { %s355_s30 = sshll.u32 %s5902_s29, 4  ;;  %p4559_p0 = scmp.ge.s32.totalorder %s5900_s28, 1  ;;  %s356_s30 = int_to_ptr.vmem [resolvable:$true] %s355_s30 }
  0x14   : > { %p6492_p1 = scmp.eq.s32.totalorder %s6014_s14, 0  ;;  %p342_p2 = scmp.lt.s32.totalorder %s5900_s28, 3 }
  0x15   : > { %s5903_s16 = smov [#allocation8]   ;;  %s5904_s19 = smov [#allocation11]  }
  0x16   : > { %p6019_p3 = pnand %p4559_p0, %p342_p2  ;;  %s376_s17 = sshll.u32 %s5903_s16, 4  ;;  %s6026_s17 = int_to_ptr.vmem [resolvable:$true] %s376_s17 }
  0x17   : > { %s409_s20 = sshll.u32 %s5904_s19, 4  ;;  %s5595_s22 = scalar_lea.vmem %s356_s30, 32  ;;  %s6034_s20 = int_to_ptr.vmem [resolvable:$true] %s409_s20 }
  0x18   : > { %s6504_s15 = scalar_select %p6019_p3, 1, 0 }
  0x19   : > { %p5052_p5 = pneg %p6019_p3  ;;  %p5596_p8 = scmp.ne.s32.totalorder %s356_s30, %s5595_s22 }
  0x1a   : > { %p5603_p11 = scmp.lt.s32.totalorder %s356_s30, %s356_s30  ;;  %p5604_p12 = scmp.lt.s32.totalorder %s5595_s22, %s5595_s22 }
  0x1b   : > { %p6030_p6 = pnand %p5052_p5, %p6492_p1 }
  0x1c   : > { %p5605_p13 = por %p5604_p12, %p5603_p11 }
  0x1d   : > { %p6038_p7 = pneg %p6030_p6 }
  0x1f   : > { %p5598_p9 = pnand %p5596_p8, %p6038_p7 }
  0x21   : > { %p5599_p10 = pneg %p5598_p9 }
  0x23   : > { %p5606_p0 = pnand %p5605_p13, %p5599_p10 }
  0x25   : > { %5609 = shalt.err (!%p5606_p0)
}
  0x26   : > { %s6507_s1 = sld [smem:[#allocation24_spill]]  ;;  %s5621_s29 = scalar_lea.vmem %s6026_s17, 12288 }
  0x27   : > { %p5622_p2 = scmp.ne.s32.totalorder %s6026_s17, %s5621_s29  ;;  %p5629_p9 = scmp.lt.s32.totalorder %s6026_s17, %s6026_s17 }
  0x28   : > { %p5630_p11 = scmp.lt.s32.totalorder %s5621_s29, %s5621_s29 }
  0x29   : > { %p5624_p5 = pnand %p5622_p2, %p6038_p7 }
  0x2a   : > { %p5631_p10 = por %p5630_p11, %p5629_p9 }
  0x2b   : > { %p5625_p8 = pneg %p5624_p5 }
  0x2c   : > { %5055 = dma.hbm_to_vmem [thread:$0]  (!%p6030_p6), %s6507_s1, 32, %s356_s30, [#allocation6]  }
  0x2d   : > { %p5632_p12 = pnand %p5631_p10, %p5625_p8 }
  0x2f   : > { %5635 = shalt.err (!%p5632_p12)
}
  0x30   : > { %s5905_s16 = smov 384   ;;  %s5906_s19 = smov 24  }
  0x31   : > { %s6508_s3 = sld [smem:[#allocation26_spill]]  ;;  %s5647_s23 = scalar_lea.vmem %s6034_s20, 32 }
  0x32   : > { %p5648_p13 = scmp.ne.s32.totalorder %s6034_s20, %s5647_s23  ;;  %p5655_p5 = scmp.lt.s32.totalorder %s6034_s20, %s6034_s20 }
  0x33   : > { %p5656_p8 = scmp.lt.s32.totalorder %s5647_s23, %s5647_s23 }
  0x34   : > { %p5650_p0 = pnand %p5648_p13, %p6038_p7 }
  0x35   : > { %p5657_p9 = por %p5656_p8, %p5655_p5 }
  0x36   : > { %p5651_p2 = pneg %p5650_p0 }
  0x37   : > { %5061 = dma.hbm_to_vmem [thread:$0]  (!%p6030_p6), %s6508_s3, 12288, %s6026_s17, [#allocation9], %s5905_s16, %s5905_s16, %s5906_s19  }
  0x38   : > { %p5658_p11 = pnand %p5657_p9, %p5651_p2 }
  0x3a   : > { %5661 = shalt.err (!%p5658_p11)
}
  0x3b   : > { %s6509_s7 = sld [smem:[#allocation28_spill]]  ;;  %s5907_s17 = smov [#allocation14]  }
  0x3c   : > { %s430_s16 = sshll.u32 %s5907_s17, 4  ;;  %s431_s16 = int_to_ptr.vmem [resolvable:$true] %s430_s16 }
  0x3d   : > { %s5673_s19 = scalar_lea.vmem %s431_s16, 16384  ;;  %p5681_p0 = scmp.lt.s32.totalorder %s431_s16, %s431_s16 }
  0x3e   : > { %p5674_p10 = scmp.ne.s32.totalorder %s431_s16, %s5673_s19  ;;  %p5682_p5 = scmp.lt.s32.totalorder %s5673_s19, %s5673_s19 }
  0x40   : > { %p5676_p12 = pnand %p5674_p10, %p6038_p7  ;;  %p5683_p2 = por %p5682_p5, %p5681_p0 }
  0x41   : > { %5067 = dma.hbm_to_vmem [thread:$0]  (!%p6030_p6), %s6509_s7, 32, %s6034_s20, [#allocation12]  }
  0x42   : > { %p5677_p13 = pneg %p5676_p12 }
  0x44   : > { %p5684_p8 = pnand %p5683_p2, %p5677_p13 }
  0x46   : > { %5687 = shalt.err (!%p5684_p8)
}
  0x47   : > { %s5908_s30 = smov 512   ;;  %s5909_s22 = smov 32  }
  0x48   : > { %s6510_s9 = sld [smem:[#allocation30_spill]]  ;;  %s5910_s24 = smov [#allocation7]  }
  0x49   : > { %s366_s29 = sshll.u32 %s5910_s24, 4  ;;  %s5911_s17 = smov [#allocation10]   ;;  %s367_s29 = int_to_ptr.vmem [resolvable:$true] %s366_s29 }
  0x4a   : > { %s392_s1 = sshll.u32 %s5911_s17, 4  ;;  %s5699_s3 = scalar_lea.vmem %s367_s29, 32  ;;  %s393_s1 = int_to_ptr.vmem [resolvable:$true] %s392_s1 }
  0x4b   : > { %p5700_p9 = scmp.ne.s32.totalorder %s367_s29, %s5699_s3  ;;  %p5707_p12 = scmp.lt.s32.totalorder %s367_s29, %s367_s29 }
  0x4c   : > { %p5708_p13 = scmp.lt.s32.totalorder %s5699_s3, %s5699_s3 }
  0x4d   : > { %p5702_p11 = pnand %p5700_p9, %p6038_p7 }
  0x4e   : > { %5073 = dma.hbm_to_vmem [thread:$0]  (!%p6030_p6), %s6510_s9, 16384, %s431_s16, [#allocation15], %s5908_s30, %s5908_s30, %s5909_s22  }
  0x4f   : > { %p5703_p10 = pneg %p5702_p11  ;;  %p5709_p0 = por %p5708_p13, %p5707_p12 }
  0x51   : > { %p5710_p5 = pnand %p5709_p0, %p5703_p10 }
  0x53   : > { %5713 = shalt.err (!%p5710_p5)
}
  0x54   : > { %s6511_s2 = sld [smem:[#allocation25_spill]]  ;;  %s5725_s30 = scalar_lea.vmem %s393_s1, 4096 }
  0x55   : > { %p5726_p2 = scmp.ne.s32.totalorder %s393_s1, %s5725_s30  ;;  %p5733_p1 = scmp.lt.s32.totalorder %s393_s1, %s393_s1 }
  0x56   : > { %p5734_p9 = scmp.lt.s32.totalorder %s5725_s30, %s5725_s30 }
  0x57   : > { %p5728_p8 = pnand %p5726_p2, %p6038_p7 }
  0x58   : > { %p5735_p11 = por %p5734_p9, %p5733_p1 }
  0x59   : > { %p5729_p4 = pneg %p5728_p8 }
  0x5a   : > { %5058 = dma.hbm_to_vmem [thread:$0]  (!%p6030_p6), %s6511_s2, 32, %s367_s29, [#allocation6]  }
  0x5b   : > { %p5736_p3 = pnand %p5735_p11, %p5729_p4 }
  0x5d   : > { %5739 = shalt.err (!%p5736_p3)
}
  0x5e   : > { %s5912_s3 = smov 128   ;;  %s5913_s22 = smov 8  }
  0x5f   : > { %s6512_s5 = sld [smem:[#allocation27_spill]]  ;;  %s5914_s24 = smov [#allocation13]  }
  0x60   : > { %s420_s29 = sshll.u32 %s5914_s24, 4  ;;  %s5915_s17 = smov [#allocation16]   ;;  %s421_s29 = int_to_ptr.vmem [resolvable:$true] %s420_s29 }
  0x61   : > { %s446_s19 = sshll.u32 %s5915_s17, 4  ;;  %s5751_s16 = scalar_lea.vmem %s421_s29, 32  ;;  %s447_s19 = int_to_ptr.vmem [resolvable:$true] %s446_s19 }
  0x62   : > { %p5752_p1 = scmp.ne.s32.totalorder %s421_s29, %s5751_s16  ;;  %p5759_p10 = scmp.lt.s32.totalorder %s421_s29, %s421_s29 }
  0x63   : > { %p5760_p12 = scmp.lt.s32.totalorder %s5751_s16, %s5751_s16 }
  0x64   : > { %p5754_p3 = pnand %p5752_p1, %p6038_p7 }
  0x65   : > { %5064 = dma.hbm_to_vmem [thread:$0]  (!%p6030_p6), %s6512_s5, 4096, %s393_s1, [#allocation9], %s5912_s3, %s5912_s3, %s5913_s22  }
  0x66   : > { %p5755_p4 = pneg %p5754_p3  ;;  %p5761_p13 = por %p5760_p12, %p5759_p10 }
  0x68   : > { %p5762_p0 = pnand %p5761_p13, %p5755_p4 }
  0x6a   : > { %5765 = shalt.err (!%p5762_p0)
}
  0x6b   : > { %s6513_s8 = sld [smem:[#allocation29_spill]]  ;;  %s5777_s23 = scalar_lea.vmem %s447_s19, 16384 }
  0x6c   : > { %p5778_p5 = scmp.ne.s32.totalorder %s447_s19, %s5777_s23  ;;  %p5785_p9 = scmp.lt.s32.totalorder %s447_s19, %s447_s19 }
  0x6d   : > { %p5786_p11 = scmp.lt.s32.totalorder %s5777_s23, %s5777_s23 }
  0x6e   : > { %p5780_p2 = pnand %p5778_p5, %p6038_p7 }
  0x6f   : > { %p5787_p1 = por %p5786_p11, %p5785_p9 }
  0x70   : > { %p5781_p8 = pneg %p5780_p2 }
  0x71   : > { %5070 = dma.hbm_to_vmem [thread:$0]  (!%p6030_p6), %s6513_s8, 32, %s421_s29, [#allocation12]  }
  0x72   : > { %p5788_p3 = pnand %p5787_p1, %p5781_p8 }
  0x74   : > { %5791 = shalt.err (!%p5788_p3)
}
  0x75   : > { %s6514_s11 = sld [smem:[#allocation31_spill]]  ;;  %s4558_s18 = sadd.s32 4294967294, %s5900_s28  }
  0x76   : > { %s6116_s21 = sadd.s32 1, %s5900_s28   ;;  %s40_s17 = sadd.s32 1, %s5896_s27 }
  0x77   : > { %s37_s29 = ssub.s32 %s5900_s28, %s6116_s21  ;;  %p47_p4 = scmp.ne.s32.totalorder %s5896_s27, %s5892_s26 }
  0x78   : > { %p38_p7 = scmp.eq.s32.totalorder %s37_s29, 0  ;;  %p48_p10 = scmp.eq.s32.totalorder %s5900_s28, 0 }
  0x79   : > { %p53_p12 = scmp.ne.s32.totalorder %s5892_s26, %s5888_s25  ;;  %p6516_p0 = scmp.eq.s32.totalorder %s6014_s14, 0 }
  0x7a   : > { %s6127_s16 = scalar_select %p38_p7, %s5896_s27, %s40_s17  }
  0x7b   : > { %5076 = dma.hbm_to_vmem [thread:$0]  (!%p6030_p6), %s6514_s11, 16384, %s447_s19, [#allocation15], %s5912_s3, %s5912_s3, %s5913_s22  }
  0x7c   : > { %p6129_p13 = por %p48_p10, %p47_p4  ;;  %p6135_p6 = por %p6516_p0, %p53_p12 }
  0x7d   : > { %p329_p5 = scmp.eq.s32.totalorder %s6014_s14, 1  ;;  %p335_p2 = scmp.eq.s32.totalorder %s4558_s18, 1 }
  0x7e   : > { %s6517_s3 = scalar_select %p6135_p6, 1, 0 }
  0x7f   : > { %p5093_p8 = scmp.lt.s32.totalorder %s5900_s28, 2  ;;  %s463_s22 = sand.u32 1, %s5896_s27  }
  0x80   : > { %p6142_p9 = por %p329_p5, %p47_p4  ;;  %p6146_p11 = por %p335_p2, %p53_p12 }
  0x81   : > { %s4569_s23 = sshll.u32 %s463_s22, 4  ;;  %s4982_s20 = sshll.u32 %s5900_s28, 8 }
  0x82   : > { %s6518_s19 = scalar_select %p6142_p9, 1, 0 }
  0x83   : > { %s6519_s1 = scalar_select %p6146_p11, 1, 0 }
  0x84   : > { %s6154_s17 = scalar_lea.hbm %s6478_s0, %s4982_s20  ;;  %s467_s18 = scalar_lea.vmem [#allocation2], %s4569_s23 }
  0x85   : > { %s475_s2 = sshll.u32 %s467_s18, 4  ;;  %p6158_p1 = pnand %p5093_p8, %p6129_p13  ;;  %s476_s2 = int_to_ptr.vmem [resolvable:$true] %s475_s2 }
  0x86   : > { %s464_s7 = scalar_lea.sflag [#allocation3], %s463_s22  ;;  %s5792_s8 = scalar_lea.hbm %s6154_s17, 256 }
  0x87   : > { %p5793_p3 = scmp.ne.s32.totalorder %s6154_s17, %s5792_s8  ;;  %p5794_p7 = pneg %p6158_p1 }
  0x88   : > { %s5797_s29 = scalar_lea.hbm %s6478_s0, 512  ;;  %p5798_p12 = scmp.lt.s32.totalorder %s6154_s17, %s6478_s0 }
  0x89   : > { %p5795_p4 = pnand %p5794_p7, %p5793_p3  ;;  %p5799_p13 = scmp.lt.s32.totalorder %s5797_s29, %s5792_s8 }
  0x8b   : > { %p5796_p10 = pneg %p5795_p4  ;;  %p5800_p0 = por %p5799_p13, %p5798_p12 }
  0x8d   : > { %p5801_p5 = pnand %p5800_p0, %p5796_p10 }
  0x8f   : > { %5804 = shalt.err (!%p5801_p5)
}
  0x90   : > { %s5805_s30 = scalar_lea.vmem %s476_s2, 256  ;;  %s5916_s22 = smov [#allocation2]  }
  0x91   : > { %p5806_p2 = scmp.ne.s32.totalorder %s476_s2, %s5805_s30  ;;  %s5810_s9 = sshll.u32 %s5916_s22, 4  ;;  %s5811_s9 = int_to_ptr.vmem [resolvable:$false] %s5810_s9 }
  0x92   : > { %s5812_s11 = scalar_lea.vmem %s5811_s9, 512  ;;  %p5813_p3 = scmp.lt.s32.totalorder %s476_s2, %s5811_s9 }
  0x93   : > { %p5808_p8 = pnand %p5806_p2, %p5794_p7  ;;  %p5814_p4 = scmp.lt.s32.totalorder %s5812_s11, %s5805_s30 }
  0x95   : > { %p5809_p11 = pneg %p5808_p8  ;;  %p5815_p9 = por %p5814_p4, %p5813_p3 }
  0x97   : > { %p5816_p6 = pnand %p5815_p9, %p5809_p11 }
  0x99   : > { %5819 = shalt.err (!%p5816_p6)
}
  0x9a   : > { %5080 = dma.hbm_to_vmem [thread:$0]  (!%p6158_p1), %s6154_s17, 256, %s476_s2, %s464_s7  }
  0x9b   : > { %p6521_p10 = scmp.ne.s32.totalorder %s6504_s15, 0 }
  0x9c   : > { %s6179_s8 = sand.u32 (!%p6521_p10), 1, %s5892_s26   ;;  %p6522_p6 = scmp.ne.s32.totalorder (!%p6521_p10), %s6517_s3, 0 }
  0x9d   : > { %484 = sbr.rel (%p6521_p10) target bundleno = 2207 (0x89f), region = 72  ;;  %s4573_s20 = sshll.u32 (!%p6521_p10), %s6179_s8, 4 }
  0x9e   : > { %s487_s9 = scalar_lea.sflag (!%p6521_p10), [#allocation3], %s6179_s8  ;;  %s6185_s11 = scalar_lea.vmem (!%p6521_p10), [#allocation2], %s4573_s20 }
  0xa2   : > { %5863 = dma.done.wait (%p6522_p6), %s487_s9, 256  }
  0xa3   : > { %5865 = vsyncadd (%p6522_p6), %s487_s9, 4294967040  ;;  %p6523_p9 = scmp.eq.s32.totalorder %s6014_s14, 0 }
  0xa5   : > { %5867 = dma.done.wait (%p6523_p9), [#allocation6], 64   ;;  %p6524_p11 = pmov %p6523_p9 }
  0xa6   : > { %p6525_p1 = pmov %p6523_p9 }
  0xa7   : > { %5869 = vsyncadd (%p6524_p11), [#allocation6], 4294967232 }
  0xa8   : > { %5871 = dma.done.wait (%p6525_p1), [#allocation9], 16384   ;;  %p6526_p7 = pmov %p6525_p1 }
  0xa9   : > { %p6527_p12 = pmov %p6525_p1 }
  0xaa   : > { %5873 = vsyncadd (%p6526_p7), [#allocation9], 4294950912 }
  0xab   : > { %5875 = dma.done.wait (%p6527_p12), [#allocation12], 64   ;;  %p6528_p13 = pmov %p6525_p1 }
  0xac   : > { %p6529_p0 = pmov %p6525_p1 }
  0xad   : > { %5877 = vsyncadd (%p6528_p13), [#allocation12], 4294967232 }
  0xae   : > { %5879 = dma.done.wait (%p6529_p0), [#allocation15], 32768   ;;  %p6530_p5 = pmov %p6529_p0 }
  0xaf   : > { %v6208_v0 = vld [vmem:[%s6185_s11] sm:$0xff]  ;;  %v6211_v1 = vld [vmem:[%s6185_s11 + $0x8] sm:$0xff]  ;;  %vm5918_vm0 = vmmov 0   ;;  %vm1873_vm1 = vcmask 1043456   ;;  %vm1845_vm2 = vcmask 64512   ;;  %s4983_s23 = sshll.u32 %s6014_s14, 8 }
  0xb0   : > { %5881 = vsyncadd (%p6530_p5), [#allocation15], 4294934528  ;;  %v574_v2 = vadd.f32 %v6211_v1, %v6208_v0  ;;  %v579_v3 = vmul.f32 %v6208_v0, %v6208_v0  ;;  %v580_v4 = vmul.f32 %v6211_v1, %v6211_v1  ;;  %v5154_v5 = vld [vmem:[#allocation8 + $0x154] ss:$24 sps:$4 sm:$0xff]   ;;  %v5156_v6 = vld [vmem:[#allocation8 + $0x150] ss:$24 sps:$4 sm:$0xff]  }
  0xb1   : > { %v5157_v7 = vld [vmem:[#allocation8 + $0x15c] ss:$24 sps:$4 sm:$0xff]   ;;  %1230 = vmatprep.subr.bf16.mxu0 %v5154_v5  ;;  %v5159_v9 = vld [vmem:[#allocation8 + $0x158] ss:$24 sps:$4 sm:$0xff]   ;;  %v5163_v12 = vld [vmem:[#allocation8 + $0x12c] ss:$24 sps:$4 sm:$0xff]  }
  0xb2   : > { %575 = vadd.xlane.f32.xlu0 %v574_v2  ;;  %v581_v8 = vadd.f32 %v580_v4, %v579_v3  ;;  %1231 = vmatpush1.bf16.msra.mxu0 %v5156_v6  ;;  %v5160_v10 = vld [vmem:[#allocation8 + $0x124] ss:$24 sps:$4 sm:$0xff]   ;;  %v5162_v11 = vld [vmem:[#allocation8 + $0x120] ss:$24 sps:$4 sm:$0xff]   ;;  %v5166_v14 = vld [vmem:[#allocation8 + $0xf4] ss:$24 sps:$4 sm:$0xff]  }
  0xb3   : > { %1271 = vmatprep.subr.bf16.mxu1 %v5157_v7  ;;  %v5165_v13 = vld [vmem:[#allocation8 + $0x128] ss:$24 sps:$4 sm:$0xff]   ;;  %1232 = vmatprep.subr.bf16.mxu0 %v5160_v10  ;;  %v5169_v16 = vld [vmem:[#allocation8 + $0xfc] ss:$24 sps:$4 sm:$0xff]   ;;  %v5171_v17 = vld [vmem:[#allocation8 + $0xf8] ss:$24 sps:$4 sm:$0xff]  }
  0xb4   : > { %1272 = vmatpush1.bf16.msra.mxu1 %v5159_v9  ;;  %v5168_v15 = vld [vmem:[#allocation8 + $0xf0] ss:$24 sps:$4 sm:$0xff]   ;;  %v5172_v18 = vld [vmem:[#allocation8 + $0xc4] ss:$24 sps:$4 sm:$0xff]   ;;  %v5174_v20 = vld [vmem:[#allocation8 + $0xc0] ss:$24 sps:$4 sm:$0xff]  }
  0xb5   : > { %1273 = vmatprep.subr.bf16.mxu1 %v5163_v12  ;;  %v5175_v19 = vld [vmem:[#allocation8 + $0xcc] ss:$24 sps:$4 sm:$0xff]   ;;  %v5177_v21 = vld [vmem:[#allocation8 + $0xc8] ss:$24 sps:$4 sm:$0xff]   ;;  %v5181_v23 = vld [vmem:[#allocation8 + $0x9c] ss:$24 sps:$4 sm:$0xff]  }
  0xb6   : > { %582 = vadd.xlane.f32.xlu0 %v581_v8  ;;  %1233 = vmatpush1.bf16.msra.mxu0 %v5162_v11  ;;  %v5178_v22 = vld [vmem:[#allocation8 + $0x94] ss:$24 sps:$4 sm:$0xff]   ;;  %v5180_v24 = vld [vmem:[#allocation8 + $0x90] ss:$24 sps:$4 sm:$0xff]   ;;  %v5184_v26 = vld [vmem:[#allocation8 + $0x64] ss:$24 sps:$4 sm:$0xff]  }
  0xb7   : > { %1234 = vmatprep.subr.bf16.mxu0 %v5166_v14  ;;  %v5183_v25 = vld [vmem:[#allocation8 + $0x98] ss:$24 sps:$4 sm:$0xff]   ;;  %v5187_v27 = vld [vmem:[#allocation8 + $0x6c] ss:$24 sps:$4 sm:$0xff]   ;;  %v5189_v29 = vld [vmem:[#allocation8 + $0x68] ss:$24 sps:$4 sm:$0xff]  }
  0xb8   : > { %1274 = vmatpush1.bf16.msra.mxu1 %v5165_v13  ;;  %v5186_v28 = vld [vmem:[#allocation8 + $0x60] ss:$24 sps:$4 sm:$0xff]   ;;  %v5190_v30 = vld [vmem:[#allocation8 + $0x34] ss:$24 sps:$4 sm:$0xff]   ;;  %v5192_v32 = vld [vmem:[#allocation8 + $0x30] ss:$24 sps:$4 sm:$0xff]  }
  0xb9   : > { %1275 = vmatprep.subr.bf16.mxu1 %v5169_v16  ;;  %v5193_v31 = vld [vmem:[#allocation8 + $0x3c] ss:$24 sps:$4 sm:$0xff]   ;;  %v5195_v33 = vld [vmem:[#allocation8 + $0x38] ss:$24 sps:$4 sm:$0xff]   ;;  %v5199_v35 = vld [vmem:[#allocation8 + $0xc] ss:$24 sps:$4 sm:$0xff]  }
  0xba   : > { %1235 = vmatpush1.bf16.msra.mxu0 %v5168_v15  ;;  %v5196_v34 = vld [vmem:[#allocation8 + $0x4] ss:$24 sps:$4 sm:$0xff]   ;;  %v5198_v36 = vld [vmem:[#allocation8] ss:$24 sps:$4 sm:$0xff]   ;;  %v5202_v38 = vld [vmem:[#allocation8 + $0x2d4] ss:$24 sps:$4 sm:$0xff]  }
  0xbb   : > { %1236 = vmatprep.subr.bf16.mxu0 %v5172_v18  ;;  %v5201_v37 = vld [vmem:[#allocation8 + $0x8] ss:$24 sps:$4 sm:$0xff]   ;;  %v5205_v39 = vld [vmem:[#allocation8 + $0x2dc] ss:$24 sps:$4 sm:$0xff]   ;;  %v5207_v41 = vld [vmem:[#allocation8 + $0x2d8] ss:$24 sps:$4 sm:$0xff]  }
  0xbc   : > { %1276 = vmatpush1.bf16.msra.mxu1 %v5171_v17  ;;  %v5204_v40 = vld [vmem:[#allocation8 + $0x2d0] ss:$24 sps:$4 sm:$0xff]   ;;  %v5208_v42 = vld [vmem:[#allocation8 + $0x2a4] ss:$24 sps:$4 sm:$0xff]   ;;  %v5210_v44 = vld [vmem:[#allocation8 + $0x2a0] ss:$24 sps:$4 sm:$0xff]   ;;  %v595_v17 = vlaneseq }
  0xbd   : > { %1277 = vmatprep.subr.bf16.mxu1 %v5175_v19  ;;  %v5211_v43 = vld [vmem:[#allocation8 + $0x2ac] ss:$24 sps:$4 sm:$0xff]   ;;  %v5213_v45 = vld [vmem:[#allocation8 + $0x2a8] ss:$24 sps:$4 sm:$0xff]   ;;  %v5217_v47 = vld [vmem:[#allocation8 + $0x27c] ss:$24 sps:$4 sm:$0xff]  }
  0xbe   : > { %1237 = vmatpush1.bf16.msra.mxu0 %v5174_v20  ;;  %v5214_v46 = vld [vmem:[#allocation8 + $0x274] ss:$24 sps:$4 sm:$0xff]   ;;  %v5216_v48 = vld [vmem:[#allocation8 + $0x270] ss:$24 sps:$4 sm:$0xff]   ;;  %v5220_v50 = vld [vmem:[#allocation8 + $0x244] ss:$24 sps:$4 sm:$0xff]  }
  0xbf   : > { %1238 = vmatprep.subr.bf16.mxu0 %v5178_v22  ;;  %v5219_v49 = vld [vmem:[#allocation8 + $0x278] ss:$24 sps:$4 sm:$0xff]   ;;  %v5223_v51 = vld [vmem:[#allocation8 + $0x24c] ss:$24 sps:$4 sm:$0xff]   ;;  %v5225_v53 = vld [vmem:[#allocation8 + $0x248] ss:$24 sps:$4 sm:$0xff]  }
  0xc0   : > { %1278 = vmatpush1.bf16.msra.mxu1 %v5177_v21  ;;  %v5222_v52 = vld [vmem:[#allocation8 + $0x240] ss:$24 sps:$4 sm:$0xff]   ;;  %v5226_v54 = vld [vmem:[#allocation8 + $0x214] ss:$24 sps:$4 sm:$0xff]   ;;  %v5228_v55 = vld [vmem:[#allocation8 + $0x210] ss:$24 sps:$4 sm:$0xff]  }
  0xc1   : > { %1279 = vmatprep.subr.bf16.mxu1 %v5181_v23  ;;  %v5229_v56 = vld [vmem:[#allocation8 + $0x21c] ss:$24 sps:$4 sm:$0xff]   ;;  %v5231_v57 = vld [vmem:[#allocation8 + $0x218] ss:$24 sps:$4 sm:$0xff]   ;;  %v5235_v59 = vld [vmem:[#allocation8 + $0x1ec] ss:$24 sps:$4 sm:$0xff]  }
  0xc2   : > { %1239 = vmatpush1.bf16.msra.mxu0 %v5180_v24  ;;  %v5232_v58 = vld [vmem:[#allocation8 + $0x1e4] ss:$24 sps:$4 sm:$0xff]   ;;  %v5234_v60 = vld [vmem:[#allocation8 + $0x1e0] ss:$24 sps:$4 sm:$0xff]   ;;  %v5238_v62 = vld [vmem:[#allocation8 + $0x1b4] ss:$24 sps:$4 sm:$0xff]  }
  0xc3   : > { %1240 = vmatprep.subr.bf16.mxu0 %v5184_v26  ;;  %v5237_v61 = vld [vmem:[#allocation8 + $0x1e8] ss:$24 sps:$4 sm:$0xff]   ;;  %v5241_v63 = vld [vmem:[#allocation8 + $0x1bc] ss:$24 sps:$4 sm:$0xff]   ;;  %v5243_v3 = vld [vmem:[#allocation8 + $0x1b8] ss:$24 sps:$4 sm:$0xff]  }
  0xc4   : > { %1280 = vmatpush1.bf16.msra.mxu1 %v5183_v25  ;;  %v5240_v2 = vld [vmem:[#allocation8 + $0x1b0] ss:$24 sps:$4 sm:$0xff]   ;;  %v5244_v4 = vld [vmem:[#allocation8 + $0x184] ss:$24 sps:$4 sm:$0xff]   ;;  %v5246_v6 = vld [vmem:[#allocation8 + $0x180] ss:$24 sps:$4 sm:$0xff]  }
  0xc5   : > { %1281 = vmatprep.subr.bf16.mxu1 %v5187_v27  ;;  %v5247_v5 = vld [vmem:[#allocation8 + $0x18c] ss:$24 sps:$4 sm:$0xff]   ;;  %v5249_v7 = vld [vmem:[#allocation8 + $0x188] ss:$24 sps:$4 sm:$0xff]   ;;  %v6219_v18 = vshrl.u32 %v595_v17, 7  ;;  %s564_s18 = scalar_lea.vmem [#allocation17], %s4573_s20 }
  0xc6   : > { %1241 = vmatpush1.bf16.msra.mxu0 %v5186_v28  ;;  %v5252_v8 = vld [vmem:[#allocation8 + $0x164] ss:$24 sps:$4 sm:$0xff]   ;;  %s4412_s30 = sshll.u32 %s564_s18, 4  ;;  %s4398_s14 = scalar_lea.sflag [#allocation4], %s6179_s8  ;;  %s4413_s30 = int_to_ptr.vmem [resolvable:$true] %s4412_s30 }
  0xc7   : > { %1242 = vmatprep.subr.bf16.mxu0 %v5190_v30  ;;  %v6222_v19 = vsub.s32 1, %v6219_v18  ;;  %v6225_v20 = vsub.s32 0, %v6219_v18  ;;  %v570_v21 = vld [vmem:[#allocation5] sm:$0x3]  ;;  %v571_v22 = vld [vmem:[#allocation7] sm:$0x3] }
  0xc8   : > { %1282 = vmatpush1.bf16.msra.mxu1 %v5189_v29  ;;  %s5820_s2 = scalar_lea.vmem %s4413_s30, 256  ;;  %p6531_p8 = scmp.ne.s32.totalorder %s6518_s19, 0 }
  0xc9   : > { %1283 = vmatprep.subr.bf16.mxu1 %v5193_v31  ;;  %v602_v25 = vrot.slane %v570_v21, %v6222_v19  ;;  %v598_v26 = vrot.slane %v570_v21, %v6225_v20  ;;  %v615_v29 = vrot.slane %v571_v22, %v6222_v19  ;;  %v611_v31 = vrot.slane %v571_v22, %v6225_v20  ;;  %p5821_p2 = scmp.ne.s32.totalorder %s4413_s30, %s5820_s2  ;;  %s5922_s20 = smov [#allocation17]  }
  0xca   : > { %1243 = vmatpush1.bf16.msra.mxu0 %v5192_v32  ;;  %s5824_s5 = sshll.u32 %s5922_s20, 4  ;;  %s5825_s5 = int_to_ptr.vmem [resolvable:$false] %s5824_s5 }
  0xcb   : > { %1244 = vmatprep.subr.bf16.mxu0 %v5196_v34  ;;  %p5822_p3 = pnand %p5821_p2, %p6531_p8  ;;  %s5826_s7 = scalar_lea.vmem %s5825_s5, 512 }
  0xcc   : > { %1284 = vmatpush1.bf16.msra.mxu1 %v5195_v33  ;;  %p5827_p10 = scmp.lt.s32.totalorder %s4413_s30, %s5825_s5  ;;  %p5828_p6 = scmp.lt.s32.totalorder %s5826_s7, %s5820_s2 }
  0xcd   : > { %1285 = vmatprep.subr.bf16.mxu1 %v5199_v35  ;;  %p5823_p4 = pneg %p5822_p3 }
  0xce   : > { %1245 = vmatpush1.bf16.msra.mxu0 %v5198_v36  ;;  %p5829_p9 = por %p5828_p6, %p5827_p10 }
  0xcf   : > { %1246 = vmatprep.subr.bf16.mxu0 %v5202_v38  ;;  %v5253_v38 = vld [vmem:[#allocation8 + $0x130] ss:$24 sps:$4 sm:$0xff]  }
  0xd0   : > { %1286 = vmatpush1.bf16.msra.mxu1 %v5201_v37  ;;  %v5250_v37 = vld [vmem:[#allocation8 + $0x160] ss:$24 sps:$4 sm:$0xff]   ;;  %p5830_p11 = pnand %p5829_p9, %p5823_p4 }
  0xd1   : > { %1287 = vmatprep.subr.bf16.mxu1 %v5205_v39  ;;  %v5258_v39 = vld [vmem:[#allocation8 + $0x104] ss:$24 sps:$4 sm:$0xff]  }
  0xd2   : > { %1247 = vmatpush2.bf16.msra.mxu0 %v5204_v40  ;;  %v5256_v40 = vld [vmem:[#allocation8 + $0x100] ss:$24 sps:$4 sm:$0xff]  }
  0xd3   : > { %1248 = vmatprep.subr.bf16.mxu0 %v5208_v42  ;;  %v5259_v42 = vld [vmem:[#allocation8 + $0xd0] ss:$24 sps:$4 sm:$0xff]  }
  0xd4   : > { %1288 = vmatpush2.bf16.msra.mxu1 %v5207_v41  ;;  %v5261_v41 = vld [vmem:[#allocation8 + $0xd4] ss:$24 sps:$4 sm:$0xff]  }
  0xd5   : > { %1289 = vmatprep.subr.bf16.mxu1 %v5211_v43  ;;  %v5264_v43 = vld [vmem:[#allocation8 + $0xa4] ss:$24 sps:$4 sm:$0xff]  }
  0xd6   : > { %1249 = vmatpush2.bf16.msra.mxu0 %v5210_v44  ;;  %v5262_v44 = vld [vmem:[#allocation8 + $0xa0] ss:$24 sps:$4 sm:$0xff]  }
  0xd7   : > { %1250 = vmatprep.subr.bf16.mxu0 %v5214_v46  ;;  %v5265_v46 = vld [vmem:[#allocation8 + $0x70] ss:$24 sps:$4 sm:$0xff]  }
  0xd8   : > { %1290 = vmatpush2.bf16.msra.mxu1 %v5213_v45  ;;  %v5267_v45 = vld [vmem:[#allocation8 + $0x74] ss:$24 sps:$4 sm:$0xff]  }
  0xd9   : > { %1291 = vmatprep.subr.bf16.mxu1 %v5217_v47  ;;  %v5270_v47 = vld [vmem:[#allocation8 + $0x44] ss:$24 sps:$4 sm:$0xff]  }
  0xda   : > { %1251 = vmatpush2.bf16.msra.mxu0 %v5216_v48  ;;  %v5268_v48 = vld [vmem:[#allocation8 + $0x40] ss:$24 sps:$4 sm:$0xff]  }
  0xdb   : > { %1252 = vmatprep.subr.bf16.mxu0 %v5220_v50  ;;  %v5271_v50 = vld [vmem:[#allocation8 + $0x10] ss:$24 sps:$4 sm:$0xff]  }
  0xdc   : > { %1292 = vmatpush2.bf16.msra.mxu1 %v5219_v49  ;;  %v5273_v49 = vld [vmem:[#allocation8 + $0x14] ss:$24 sps:$4 sm:$0xff]  }
  0xdd   : > { %1293 = vmatprep.subr.bf16.mxu1 %v5223_v51  ;;  %v5276_v51 = vld [vmem:[#allocation8 + $0x2e4] ss:$24 sps:$4 sm:$0xff]  }
  0xde   : > { %1253 = vmatpush2.bf16.msra.mxu0 %v5222_v52  ;;  %v5274_v52 = vld [vmem:[#allocation8 + $0x2e0] ss:$24 sps:$4 sm:$0xff]  }
  0xdf   : > { %1254 = vmatprep.subr.bf16.mxu0 %v5226_v54  ;;  %v5277_v54 = vld [vmem:[#allocation8 + $0x2b0] ss:$24 sps:$4 sm:$0xff]  }
  0xe0   : > { %1294 = vmatpush2.bf16.msra.mxu1 %v5225_v53  ;;  %v5279_v53 = vld [vmem:[#allocation8 + $0x2b4] ss:$24 sps:$4 sm:$0xff]  }
  0xe1   : > { %1295 = vmatprep.subr.bf16.mxu1 %v5229_v56  ;;  %v5280_v56 = vld [vmem:[#allocation8 + $0x280] ss:$24 sps:$4 sm:$0xff]  }
  0xe2   : > { %1255 = vmatpush2.bf16.msra.mxu0 %v5228_v55  ;;  %v5282_v55 = vld [vmem:[#allocation8 + $0x284] ss:$24 sps:$4 sm:$0xff]  }
  0xe3   : > { %1256 = vmatprep.subr.bf16.mxu0 %v5232_v58  ;;  %v5283_v58 = vld [vmem:[#allocation8 + $0x250] ss:$24 sps:$4 sm:$0xff]  }
  0xe4   : > { %1296 = vmatpush2.bf16.msra.mxu1 %v5231_v57  ;;  %v5285_v57 = vld [vmem:[#allocation8 + $0x254] ss:$24 sps:$4 sm:$0xff]  }
  0xe5   : > { %1297 = vmatprep.subr.bf16.mxu1 %v5235_v59  ;;  %v5288_v59 = vld [vmem:[#allocation8 + $0x224] ss:$24 sps:$4 sm:$0xff]  }
  0xe6   : > { %1257 = vmatpush2.bf16.msra.mxu0 %v5234_v60  ;;  %v5286_v60 = vld [vmem:[#allocation8 + $0x220] ss:$24 sps:$4 sm:$0xff]  }
  0xe7   : > { %1258 = vmatprep.subr.bf16.mxu0 %v5238_v62  ;;  %v5289_v62 = vld [vmem:[#allocation8 + $0x1f0] ss:$24 sps:$4 sm:$0xff]  }
  0xe8   : > { %1298 = vmatpush2.bf16.msra.mxu1 %v5237_v61  ;;  %v5291_v61 = vld [vmem:[#allocation8 + $0x1f4] ss:$24 sps:$4 sm:$0xff]  }
  0xe9   : > { %1299 = vmatprep.subr.bf16.mxu1 %v5241_v63  ;;  %v5294_v63 = vld [vmem:[#allocation8 + $0x1c4] ss:$24 sps:$4 sm:$0xff]  }
  0xea   : > { %1259 = vmatpush2.bf16.msra.mxu0 %v5240_v2  ;;  %v5292_v2 = vld [vmem:[#allocation8 + $0x1c0] ss:$24 sps:$4 sm:$0xff]  }
  0xeb   : > { %1260 = vmatprep.subr.bf16.mxu0 %v5244_v4  ;;  %v5295_v4 = vld [vmem:[#allocation8 + $0x190] ss:$24 sps:$4 sm:$0xff]  }
  0xec   : > { %1300 = vmatpush2.bf16.msra.mxu1 %v5243_v3  ;;  %v5297_v3 = vld [vmem:[#allocation8 + $0x194] ss:$24 sps:$4 sm:$0xff]  }
  0xed   : > { %1301 = vmatprep.subr.bf16.mxu1 %v5247_v5  ;;  %v5917_v5 = vmov 0.0  }
  0xee   : > { %1261 = vmatpush2.bf16.msra.mxu0 %v5246_v6  ;;  %v5919_v6 = vmov 1983009808  }
  0xef   : > { %1312 = vmatprep.subr.bf16.mxu0 %v5252_v8  ;;  %v730_v8 = vsub.s32 2, %v6219_v18 }
  0xf0   : > { %1302 = vmatpush2.bf16.msra.mxu1 %v5249_v7  ;;  %v1355_v7 = vunpack.c.l.s4 %v5919_v6 }
  0xf1   : > { %5004 = vmatprep.subr.bf16.mxu1 %v5917_v5 }
 0x13b   : > { %v576_v9 = vpop.xlane.xlu0 %575 }
 0x13c   : > { %v578_v10 = vmul.f32 0.00390625, %v576_v9  ;;  %v6248_v9 = vld [vmem:[%s6482_s4] sm:$0x3f] }
 0x13e   : > { %v585_v12 = vmul.f32 %v578_v10, %v578_v10  ;;  %v588_v23 = vsub.f32 %v6208_v0, %v578_v10  ;;  %v589_v24 = vsub.f32 %v6211_v1, %v578_v10  ;;  %v5255_v1 = vld [vmem:[#allocation8 + $0x134] ss:$24 sps:$4 sm:$0xff]   ;;  %v734_v10 = vsub.s32 3, %v6219_v18 }
 0x13f   : > { %v583_v11 = vpop.xlane.xlu0 %582 }
 0x140   : > { %v584_v13 = vmul.f32 0.00390625, %v583_v11  ;;  %v5920_v11 = vmov 1934713408   ;;  %v735_v17 = vrot.slane %v6248_v9, %v734_v10 }
 0x142   : > { %v586_v14 = vsub.f32 %v584_v13, %v585_v12  ;;  %v1363_v12 = vunpack.c.l.s4 %v5920_v11  ;;  %v1356_v13 = vunpack.c.0.s8 %v1355_v7 }
 0x144   : > { %v587_v15 = vmax.f32 %v586_v14, 0.0  ;;  %v723_v14 = vrot.slane %v6248_v9, %v6225_v20  ;;  %v1364_v21 = vunpack.c.0.s8 %v1363_v12 }
 0x146   : > { %v590_v16 = vadd.f32 1e-05, %v587_v15  ;;  %v731_v15 = vrot.slane %v6248_v9, %v730_v8 }
 0x148   : > { %5538 = vrsqrt.f32 %v590_v16  ;;  %v727_v16 = vrot.slane %v6248_v9, %v6222_v19 }
 0x155   : > { %v5539_v27 = vpop.eup %5538 }
 0x156   : > { %v593_v28 = vmul.f32 %v5539_v27, %v589_v24  ;;  %v592_v30 = vmul.f32 %v5539_v27, %v588_v23  ;;  %v6262_v24 = vsub.s32 %v1356_v13, %v6219_v18 }
 0x158   : > { %v606_v32 = vmul.f32 %v602_v25, %v593_v28  ;;  %v605_v33 = vmul.f32 %v598_v26, %v592_v30 }
 0x15a   : > { %v619_v34 = vadd.f32 %v615_v29, %v606_v32  ;;  %v618_v35 = vadd.f32 %v611_v31, %v605_v33  ;;  %v6265_v33 = vsub.s32 %v1364_v21, %v6219_v18 }
 0x15c   : > { %v621_v36 = vpack.c.bf16 %v619_v34, %v619_v34  ;;  %v6233_v0 = vpack.c.bf16 %v618_v35, %v618_v35 }
 0x15e   : > { %1262 = vmatprep.mubr.bf16.mxu0 %v621_v36  ;;  %1303 = vmatprep.mubr.bf16.mxu1 %v621_v36 }
 0x15f   : > { %1263 = vmatmul.mubr.bf16.vlgmr.msra.gmra.mxu0 %v6233_v0  ;;  %1304 = vmatmul.mubr.bf16.vlgmr.msra.gmra.mxu1 %v6233_v0 }
 0x160   : > { %1313 = vmatpush1.bf16.msra.mxu0 %v5250_v37  ;;  %1344 = vmatprep.mubr.bf16.mxu0 %v621_v36 }
 0x161   : > { %1314 = vmatprep.subr.bf16.mxu0 %v5255_v1  ;;  %5006 = vmatprep.mubr.msk.bf16.mxu1 %vm5918_vm0, %v5917_v5 }
 0x164   : > { %1315 = vmatpush1.bf16.msra.mxu0 %v5253_v38 }
 0x165   : > { %1316 = vmatprep.subr.bf16.mxu0 %v5258_v39  ;;  %v5921_v39 = vmov 0  }
 0x168   : > { %1317 = vmatpush1.bf16.msra.mxu0 %v5256_v40 }
 0x169   : > { %1318 = vmatprep.subr.bf16.mxu0 %v5261_v41 }
 0x16c   : > { %1319 = vmatpush1.bf16.msra.mxu0 %v5259_v42 }
 0x16d   : > { %1320 = vmatprep.subr.bf16.mxu0 %v5264_v43 }
 0x170   : > { %1321 = vmatpush1.bf16.msra.mxu0 %v5262_v44 }
 0x171   : > { %1322 = vmatprep.subr.bf16.mxu0 %v5267_v45 }
 0x174   : > { %1323 = vmatpush1.bf16.msra.mxu0 %v5265_v46 }
 0x175   : > { %1324 = vmatprep.subr.bf16.mxu0 %v5270_v47 }
 0x178   : > { %1325 = vmatpush1.bf16.msra.mxu0 %v5268_v48 }
 0x179   : > { %1326 = vmatprep.subr.bf16.mxu0 %v5273_v49 }
 0x17c   : > { %1327 = vmatpush1.bf16.msra.mxu0 %v5271_v50 }
 0x17d   : > { %1328 = vmatprep.subr.bf16.mxu0 %v5276_v51 }
 0x180   : > { %1329 = vmatpush2.bf16.msra.mxu0 %v5274_v52 }
 0x181   : > { %1330 = vmatprep.subr.bf16.mxu0 %v5279_v53 }
 0x184   : > { %1331 = vmatpush2.bf16.msra.mxu0 %v5277_v54 }
 0x185   : > { %1332 = vmatprep.subr.bf16.mxu0 %v5282_v55 }
 0x188   : > { %1333 = vmatpush2.bf16.msra.mxu0 %v5280_v56 }
 0x189   : > { %1334 = vmatprep.subr.bf16.mxu0 %v5285_v57 }
 0x18c   : > { %1335 = vmatpush2.bf16.msra.mxu0 %v5283_v58 }
 0x18d   : > { %1336 = vmatprep.subr.bf16.mxu0 %v5288_v59 }
 0x190   : > { %1337 = vmatpush2.bf16.msra.mxu0 %v5286_v60 }
 0x191   : > { %1338 = vmatprep.subr.bf16.mxu0 %v5291_v61 }
 0x194   : > { %1339 = vmatpush2.bf16.msra.mxu0 %v5289_v62 }
 0x195   : > { %1340 = vmatprep.subr.bf16.mxu0 %v5294_v63 }
 0x198   : > { %1341 = vmatpush2.bf16.msra.mxu0 %v5292_v2 }
 0x199   : > { %1342 = vmatprep.subr.bf16.mxu0 %v5297_v3 }
 0x19c   : > { %1343 = vmatpush2.bf16.msra.mxu0 %v5295_v4 }
 0x19d   : > { %4992 = vmatprep.subr.bf16.mxu0 %v5917_v5 }
 0x19f   : > { %1345 = vmatmul.mubr.bf16.vlgmr.msra.gmra.mxu0 %v6233_v0 }
 0x1a0   : > { %4994 = vmatprep.mubr.msk.bf16.mxu0 %vm5918_vm0, %v5917_v5 }
 0x21f   : > { %v1264_v22 = vpop.f32.mrf.mxu0  ;;  %v1305_v23 = vpop.f32.mrf.mxu1 }
 0x220   : > { %v1265_v25 = vadd.f32 %v1264_v22, %v723_v14  ;;  %v1306_v26 = vadd.f32 %v1305_v23, %v731_v15 }
 0x221   : > { %v1266_v27 = vpop.f32.mrf.mxu0  ;;  %v1307_v28 = vpop.f32.mrf.mxu1 }
 0x222   : > { %v1353_v29 = vpack.c.bf16 %v1265_v25, %v1265_v25  ;;  %v1491_v30 = vpack.c.bf16 %v1306_v26, %v1306_v26  ;;  %v1267_v31 = vadd.f32 %v1266_v27, %v727_v16  ;;  %v1308_v32 = vadd.f32 %v1307_v28, %v735_v17 }
 0x223   : > { %v1268_v34 = vpop.f32.mrf.mxu0  ;;  %v1309_v35 = vpop.f32.mrf.mxu1 }
 0x224   : > { %v1360_v36 = vrot.slane %v1353_v29, %v6262_v24  ;;  %v1498_v37 = vrot.slane %v1491_v30, %v6262_v24  ;;  %v1378_v0 = vpack.c.bf16 %v1267_v31, %v1267_v31  ;;  %v1516_v42 = vpack.c.bf16 %v1308_v32, %v1308_v32 }
 0x225   : > { %v1269_v1 = vpop.f32.mrf.mxu0  ;;  %v1310_v38 = vpop.f32.mrf.mxu1 }
 0x226   : > { %v1361_v40 = vcombine.high %v1360_v36, %v5921_v39  ;;  %v1499_v41 = vcombine.high %v1498_v37, %v5921_v39  ;;  %v6272_v43 = vrot.slane %v1360_v36, %v6265_v33  ;;  %v1385_v44 = vrot.slane %v1378_v0, %v6262_v24 }
 0x227   : > { %v1506_v45 = vrot.slane %v1498_v37, %v6265_v33  ;;  %v1523_v50 = vrot.slane %v1516_v42, %v6262_v24 }
 0x228   : > { %v1375_v46 = vrot.slane %v1361_v40, %v6265_v33  ;;  %v1513_v47 = vrot.slane %v1499_v41, %v6265_v33  ;;  %v1386_v48 = vcombine.high %v1385_v44, %v5921_v39  ;;  %v1393_v49 = vrot.slane %v1385_v44, %v6265_v33 }
 0x229   : > { %v1376_v51 = vcombine.high %v6272_v43, %v5921_v39  ;;  %v1514_v54 = vcombine.high %v1506_v45, %v5921_v39  ;;  %v1407_v58 = vshrl.u32 %v6272_v43, 16  ;;  %v1524_v60 = vcombine.high %v1523_v50, %v5921_v39 }
 0x22a   : > { %v1400_v52 = vrot.slane %v1386_v48, %v6265_v33  ;;  %v1401_v53 = vcombine.high %v1393_v49, %v5921_v39  ;;  %v1377_v55 = vcombine.high %v1375_v46, %v5921_v39  ;;  %v1515_v56 = vcombine.high %v1513_v47, %v5921_v39 }
 0x22b   : > { %v1531_v61 = vrot.slane %v1523_v50, %v6265_v33  ;;  %v1415_v62 = vshrl.u32 %v1376_v51, 16  ;;  %v1423_v63 = vshrl.u32 %v1375_v46, 16  ;;  %v1545_v2 = vshrl.u32 %v1506_v45, 16 }
 0x22c   : > { %v1402_v57 = vcombine.high %v1400_v52, %v5921_v39  ;;  %v1416_v59 = vshrl.u32 %v1401_v53, 16  ;;  %v1553_v4 = vshrl.u32 %v1514_v54, 16  ;;  %v1561_v6 = vshrl.u32 %v1513_v47, 16 }
 0x22d   : > { %v1538_v7 = vrot.slane %v1524_v60, %v6265_v33  ;;  %v1539_v11 = vcombine.high %v1531_v61, %v5921_v39  ;;  %v1431_v12 = vshrl.u32 %v1377_v55, 16  ;;  %v1569_v13 = vshrl.u32 %v1515_v56, 16 }
 0x22e   : > { %v1432_v3 = vshrl.u32 %v1402_v57, 16  ;;  %v1424_v14 = vshrl.u32 %v1400_v52, 16  ;;  %v1546_v15 = vshrl.u32 %v1531_v61, 16  ;;  %v1408_v16 = vshrl.u32 %v1393_v49, 16 }
 0x22f   : > { %v1417_v17 = vpack.i.b16 %v1416_v59, %v1415_v62  ;;  %v1540_v21 = vcombine.high %v1538_v7, %v5921_v39  ;;  %v1554_v22 = vshrl.u32 %v1539_v11, 16  ;;  %v1543_v25 = vpack.i.b16 %v1531_v61, %v1506_v45 }
 0x230   : > { %v1433_v23 = vpack.i.b16 %v1432_v3, %v1431_v12  ;;  %v1559_v26 = vpack.i.b16 %v1538_v7, %v1513_v47  ;;  %v1562_v27 = vshrl.u32 %v1538_v7, 16  ;;  %v1429_v28 = vpack.i.b16 %v1402_v57, %v1377_v55 }
 0x231   : > { %v1551_v29 = vpack.i.b16 %v1539_v11, %v1514_v54  ;;  %v1567_v30 = vpack.i.b16 %v1540_v21, %v1515_v56  ;;  %v1570_v31 = vshrl.u32 %v1540_v21, 16  ;;  %v1425_v32 = vpack.i.b16 %v1424_v14, %v1423_v63 }
 0x232   : > { %v1547_v34 = vpack.i.b16 %v1546_v15, %v1545_v2  ;;  %v1563_v35 = vpack.i.b16 %v1562_v27, %v1561_v6  ;;  %v1573_v36 = vcombine.low %v1543_v25, %v1559_v26  ;;  %v1413_v37 = vpack.i.b16 %v1401_v53, %v1376_v51 }
 0x233   : > { %v1555_v0 = vpack.i.b16 %v1554_v22, %v1553_v4  ;;  %v1571_v1 = vpack.i.b16 %v1570_v31, %v1569_v13  ;;  %v1581_v38 = vcombine.low %v1551_v29, %v1567_v30  ;;  %v1409_v40 = vpack.i.b16 %v1408_v16, %v1407_v58 }
 0x234   : > { %v1421_v41 = vpack.i.b16 %v1400_v52, %v1375_v46  ;;  %v1597_v42 = vcombine.low %v1547_v34, %v1563_v35  ;;  %v1467_v44 = vcombine.low %v1417_v17, %v1433_v23  ;;  %v1580_v45 = vrot.slane %v1573_v36, %v6262_v24 }
 0x235   : > { %v1588_v47 = vrot.slane %v1581_v38, %v6262_v24  ;;  %v1605_v48 = vcombine.low %v1555_v0, %v1571_v1  ;;  %v1405_v50 = vpack.i.b16 %v1393_v49, %v6272_v43  ;;  %v1443_v54 = vcombine.low %v1413_v37, %v1429_v28 }
 0x236   : > { %v1459_v55 = vcombine.low %v1409_v40, %v1425_v32  ;;  %v1604_v57 = vrot.slane %v1597_v42, %v6262_v24  ;;  %v1474_v58 = vrot.slane %v1467_v44, %v6262_v24  ;;  %v738_v15 = vsub.s32 4, %v6219_v18 }
 0x237   : > { %v1589_v56 = vcombine.low %v1580_v45, %v1588_v47  ;;  %v1612_v51 = vrot.slane %v1605_v48, %v6262_v24  ;;  %v1435_v53 = vcombine.low %v1405_v50, %v1421_v41  ;;  %v1450_v52 = vrot.slane %v1443_v54, %v6262_v24 }
 0x238   : > { %v1466_v59 = vrot.slane %v1459_v55, %v6262_v24  ;;  %v742_v16 = vsub.s32 5, %v6219_v18  ;;  %v739_v17 = vrot.slane %v6248_v9, %v738_v15 }
 0x239   : > { %v1613_v46 = vcombine.low %v1604_v57, %v1612_v51  ;;  %v1596_v60 = vrot.slane %v1589_v56, %v6265_v33  ;;  %v1442_v43 = vrot.slane %v1435_v53, %v6262_v24 }
 0x23a   : > { %v1475_v49 = vcombine.low %v1466_v59, %v1474_v58  ;;  %v743_v21 = vrot.slane %v6248_v9, %v742_v16 }
 0x23b   : > { %v1620_v61 = vrot.slane %v1613_v46, %v6265_v33  ;;  %v1451_v63 = vcombine.low %v1442_v43, %v1450_v52  ;;  %v1625_v6 = vshrl.u32 %v1596_v60, 16 }
 0x23c   : > { %v1482_v2 = vrot.slane %v1475_v49, %v6265_v33 }
 0x23d   : > { %v1623_v62 = vpack.i.b16 %v1620_v61, %v1596_v60  ;;  %v1626_v3 = vshrl.u32 %v1620_v61, 16  ;;  %v1458_v4 = vrot.slane %v1451_v63, %v6265_v33 }
 0x23e   : > { %v1488_v12 = vshrl.u32 %v1482_v2, 16 }
 0x23f   : > { %4993 = vmatpush3.bf16.xpose.msra.mxu0 %v1623_v62  ;;  %v1485_v7 = vpack.i.b16 %v1482_v2, %v1458_v4  ;;  %v1627_v11 = vpack.i.b16 %v1626_v3, %v1625_v6  ;;  %v1487_v13 = vshrl.u32 %v1458_v4, 16 }
 0x240   : > { %4998 = vmatprep.subr.bf16.mxu0 %v5917_v5 }
 0x241   : > { %v1489_v14 = vpack.i.b16 %v1488_v12, %v1487_v13 }
 0x246   : > { %4995 = vmatmul.mubr.bf16.vlgmr.msra.gmra.mxu0 %v1485_v7 }
 0x247   : > { %4999 = vmatpush3.bf16.xpose.msra.mxu0 %v1627_v11  ;;  %5000 = vmatprep.mubr.msk.bf16.mxu0 %vm5918_vm0, %v5917_v5 }
 0x24e   : > { %5001 = vmatmul.mubr.bf16.vlgmr.msra.gmra.mxu0 %v1489_v14 }
 0x25f   : > { %v1346_v22 = vpop.f32.mrf.mxu0 }
 0x260   : > { %v1347_v23 = vadd.f32 %v1346_v22, %v739_v17 }
 0x261   : > { %v1348_v25 = vpop.f32.mrf.mxu0 }
 0x262   : > { %v1629_v26 = vpack.c.bf16 %v1347_v23, %v1347_v23  ;;  %v1349_v27 = vadd.f32 %v1348_v25, %v743_v21 }
 0x263   : > { %v1350_v28 = vpop.f32.mrf.mxu0 }
 0x264   : > { %v1636_v29 = vrot.slane %v1629_v26, %v6262_v24  ;;  %v1654_v30 = vpack.c.bf16 %v1349_v27, %v1349_v27 }
 0x265   : > { %v1351_v31 = vpop.f32.mrf.mxu0 }
 0x266   : > { %v1637_v32 = vcombine.high %v1636_v29, %v5921_v39  ;;  %v1644_v34 = vrot.slane %v1636_v29, %v6265_v33  ;;  %v1661_v35 = vrot.slane %v1654_v30, %v6262_v24 }
 0x268   : > { %v1651_v36 = vrot.slane %v1637_v32, %v6265_v33  ;;  %v1652_v9 = vcombine.high %v1644_v34, %v5921_v39  ;;  %v1662_v37 = vcombine.high %v1661_v35, %v5921_v39  ;;  %v1669_v0 = vrot.slane %v1661_v35, %v6265_v33 }
 0x269   : > { %v1683_v38 = vshrl.u32 %v1644_v34, 16 }
 0x26a   : > { %v1653_v1 = vcombine.high %v1651_v36, %v5921_v39  ;;  %v1676_v40 = vrot.slane %v1662_v37, %v6265_v33  ;;  %v1691_v41 = vshrl.u32 %v1652_v9, 16  ;;  %v1699_v42 = vshrl.u32 %v1651_v36, 16 }
 0x26b   : > { %v1677_v44 = vcombine.high %v1669_v0, %v5921_v39  ;;  %v1684_v45 = vshrl.u32 %v1669_v0, 16  ;;  %v1681_v48 = vpack.i.b16 %v1669_v0, %v1644_v34 }
 0x26c   : > { %v1678_v47 = vcombine.high %v1676_v40, %v5921_v39  ;;  %v1697_v50 = vpack.i.b16 %v1676_v40, %v1651_v36  ;;  %v1700_v54 = vshrl.u32 %v1676_v40, 16  ;;  %v1707_v55 = vshrl.u32 %v1653_v1, 16 }
 0x26d   : > { %v1685_v56 = vpack.i.b16 %v1684_v45, %v1683_v38  ;;  %v1689_v57 = vpack.i.b16 %v1677_v44, %v1652_v9  ;;  %v1692_v51 = vshrl.u32 %v1677_v44, 16 }
 0x26e   : > { %v1701_v53 = vpack.i.b16 %v1700_v54, %v1699_v42  ;;  %v1705_v58 = vpack.i.b16 %v1678_v47, %v1653_v1  ;;  %v1708_v46 = vshrl.u32 %v1678_v47, 16  ;;  %v1711_v52 = vcombine.low %v1681_v48, %v1697_v50  ;;  %v5300_v54 = vld [vmem:[#allocation10 + $0x74] ss:$8 sps:$4 sm:$0xff]  }
 0x26f   : > { %v1693_v59 = vpack.i.b16 %v1692_v51, %v1691_v41 }
 0x270   : > { %v1709_v60 = vpack.i.b16 %v1708_v46, %v1707_v55  ;;  %v1719_v61 = vcombine.low %v1689_v57, %v1705_v58  ;;  %v1735_v43 = vcombine.low %v1685_v56, %v1701_v53  ;;  %v1718_v49 = vrot.slane %v1711_v52, %v6262_v24  ;;  %v5298_v57 = vld [vmem:[#allocation10 + $0x70] ss:$8 sps:$4 sm:$0xff]   ;;  %v5303_v53 = vld [vmem:[#allocation10 + $0x64] ss:$8 sps:$4 sm:$0xff]   ;;  %v5301_v58 = vld [vmem:[#allocation10 + $0x60] ss:$8 sps:$4 sm:$0xff]  }
 0x271   : > { %v5306_v46 = vld [vmem:[#allocation10 + $0x54] ss:$8 sps:$4 sm:$0xff]   ;;  %v5304_v52 = vld [vmem:[#allocation10 + $0x50] ss:$8 sps:$4 sm:$0xff]  }
 0x272   : > { %v1726_v62 = vrot.slane %v1719_v61, %v6262_v24  ;;  %v1743_v63 = vcombine.low %v1693_v59, %v1709_v60  ;;  %v1742_v3 = vrot.slane %v1735_v43, %v6262_v24  ;;  %v5309_v59 = vld [vmem:[#allocation10 + $0x44] ss:$8 sps:$4 sm:$0xff]   ;;  %v5307_v60 = vld [vmem:[#allocation10 + $0x40] ss:$8 sps:$4 sm:$0xff]   ;;  %v5310_v61 = vld [vmem:[#allocation10 + $0x30] ss:$8 sps:$4 sm:$0xff]  }
 0x273   : > { %v5315_v43 = vld [vmem:[#allocation10 + $0x24] ss:$8 sps:$4 sm:$0xff]  }
 0x274   : > { %v1727_v2 = vcombine.low %v1718_v49, %v1726_v62  ;;  %v1750_v4 = vrot.slane %v1743_v63, %v6262_v24  ;;  %v5313_v49 = vld [vmem:[#allocation10 + $0x20] ss:$8 sps:$4 sm:$0xff]   ;;  %v5318_v62 = vld [vmem:[#allocation10 + $0x14] ss:$8 sps:$4 sm:$0xff]   ;;  %v5316_v63 = vld [vmem:[#allocation10 + $0x10] ss:$8 sps:$4 sm:$0xff]  }
 0x276   : > { %v1734_v6 = vrot.slane %v1727_v2, %v6265_v33  ;;  %v1751_v7 = vcombine.low %v1742_v3, %v1750_v4  ;;  %v5321_v2 = vld [vmem:[#allocation10 + $0x4] ss:$8 sps:$4 sm:$0xff]   ;;  %v5319_v3 = vld [vmem:[#allocation10] ss:$8 sps:$4 sm:$0xff]   ;;  %v5324_v4 = vld [vmem:[#allocation10 + $0xf4] ss:$8 sps:$4 sm:$0xff]  }
 0x278   : > { %v1758_v11 = vrot.slane %v1751_v7, %v6265_v33  ;;  %v1762_v13 = vshrl.u32 %v1734_v6, 16  ;;  %v5327_v7 = vld [vmem:[#allocation10 + $0xe4] ss:$8 sps:$4 sm:$0xff]  }
 0x27a   : > { %v1761_v12 = vpack.i.b16 %v1758_v11, %v1734_v6  ;;  %v1763_v14 = vshrl.u32 %v1758_v11, 16  ;;  %v5322_v6 = vld [vmem:[#allocation10 + $0xf0] ss:$8 sps:$4 sm:$0xff]   ;;  %v5325_v11 = vld [vmem:[#allocation10 + $0xe0] ss:$8 sps:$4 sm:$0xff]  }
 0x27c   : > { %v1875_v17 = vsel %vm1873_vm1, %v1761_v12, 0  ;;  %v1764_v21 = vpack.i.b16 %v1763_v14, %v1762_v13  ;;  %v5330_v12 = vld [vmem:[#allocation10 + $0xd4] ss:$8 sps:$4 sm:$0xff]   ;;  %v5328_v13 = vld [vmem:[#allocation10 + $0xd0] ss:$8 sps:$4 sm:$0xff]  }
 0x27d   : > { %5005 = vmatpush3.bf16.msra.mxu1 %v1875_v17  ;;  %v5333_v14 = vld [vmem:[#allocation10 + $0xc4] ss:$8 sps:$4 sm:$0xff]   ;;  %v5331_v17 = vld [vmem:[#allocation10 + $0xc0] ss:$8 sps:$4 sm:$0xff]  }
 0x27e   : > { %5010 = vmatprep.subr.bf16.mxu1 %v5917_v5  ;;  %v1921_v22 = vsel %vm1873_vm1, %v1764_v21, 0  ;;  %v5336_v21 = vld [vmem:[#allocation10 + $0xb4] ss:$8 sps:$4 sm:$0xff]  }
 0x306   : > { %v1799_v23 = vpop.f32.mrf.mxu0 }
 0x307   : > { %v1846_v25 = vsel %vm1845_vm2, %v1799_v23, -inf }
 0x308   : > { %1847 = vmax.xlane.f32.xlu1 %v1846_v25  ;;  %v4996_v26 = vpop.f32.mrf.mxu0  ;;  %v5339_v25 = vld [vmem:[#allocation10 + $0xa4] ss:$8 sps:$4 sm:$0xff]  }
 0x309   : > { %v5342_v26 = vld [vmem:[#allocation10 + $0x94] ss:$8 sps:$4 sm:$0xff]  }
 0x30a   : > { %v1802_v27 = vpop.f32.mrf.mxu0 }
 0x30b   : > { %v5340_v27 = vld [vmem:[#allocation10 + $0x90] ss:$8 sps:$4 sm:$0xff]  }
 0x30c   : > { %v4997_v28 = vpop.f32.mrf.mxu0 }
 0x30d   : > { %v5345_v28 = vld [vmem:[#allocation10 + $0x84] ss:$8 sps:$4 sm:$0xff]  }
 0x30e   : > { %v1839_v29 = vpop.f32.mrf.mxu0 }
 0x30f   : > { %v1849_v30 = vsel %vm1845_vm2, %v1839_v29, -inf }
 0x310   : > { %1850 = vmax.xlane.f32.xlu1 %v1849_v30  ;;  %v5002_v31 = vpop.f32.mrf.mxu0 }
 0x312   : > { %v1842_v32 = vpop.f32.mrf.mxu0 }
 0x314   : > { %v5003_v34 = vpop.f32.mrf.mxu0 }
 0x391   : > { %v1848_v35 = vpop.xlane.xlu1 %1847 }
 0x392   : > { %v1852_v36 = vsub.f32 %v1799_v23, %v1848_v35  ;;  %v5337_v23 = vld [vmem:[#allocation10 + $0xa0] ss:$8 sps:$4 sm:$0xff]  }
 0x394   : > { %v1854_v9 = vmul.f32 1.442695, %v1852_v36 }
 0x396   : > { %5540 = vpow2.f32 %v1854_v9 }
 0x399   : > { %v1851_v37 = vpop.xlane.xlu1 %1850 }
 0x39a   : > { %v1853_v0 = vsub.f32 %v1839_v29, %v1851_v37  ;;  %v5343_v29 = vld [vmem:[#allocation10 + $0x80] ss:$8 sps:$4 sm:$0xff]  }
 0x39c   : > { %v1856_v1 = vmul.f32 1.442695, %v1853_v0 }
 0x39e   : > { %5542 = vpow2.f32 %v1856_v1 }
 0x3a3   : > { %v5541_v38 = vpop.eup %5540 }
 0x3a4   : > { %v1858_v40 = vsel %vm1845_vm2, %v5541_v38, 0.0 }
 0x3a5   : > { %1859 = vadd.xlane.f32.xlu0 %v1858_v40 }
 0x3ab   : > { %v5543_v41 = vpop.eup %5542 }
 0x3ac   : > { %v1861_v42 = vsel %vm1845_vm2, %v5543_v41, 0.0 }
 0x3ad   : > { %1862 = vadd.xlane.f32.xlu1 %v1861_v42 }
 0x42e   : > { %v1860_v44 = vpop.xlane.xlu0 %1859 }
 0x42f   : > { %5544 = vrcp.f32 %v1860_v44 }
 0x436   : > { %v1863_v45 = vpop.xlane.xlu1 %1862 }
 0x437   : > { %5546 = vrcp.f32 %v1863_v45 }
 0x43c   : > { %v5545_v47 = vpop.eup %5544 }
 0x43d   : > { %v1866_v48 = vmul.f32 %v5545_v47, %v5541_v38 }
 0x43f   : > { %v1868_v50 = vpack.c.bf16 %v1866_v48, %v1866_v48 }
 0x441   : > { %5007 = vmatmul.mubr.msk.bf16.vlgmr.msra.gmra.mxu1 %vm1845_vm2, %v1868_v50 }
 0x442   : > { %5011 = vmatpush3.bf16.msra.mxu1 %v1921_v22  ;;  %5012 = vmatprep.mubr.msk.bf16.mxu1 %vm5918_vm0, %v5917_v5  ;;  %v5312_v5 = vld [vmem:[#allocation10 + $0x34] ss:$8 sps:$4 sm:$0xff]   ;;  %v5334_v22 = vld [vmem:[#allocation10 + $0xb0] ss:$8 sps:$4 sm:$0xff]  }
 0x443   : > { %2305 = vmatprep.subr.bf16.mxu1 %v5300_v54 }
 0x444   : > { %v5547_v55 = vpop.eup %5546 }
 0x445   : > { %v1867_v56 = vmul.f32 %v5547_v55, %v5543_v41 }
 0x447   : > { %v1869_v51 = vpack.c.bf16 %v1867_v56, %v1867_v56 }
 0x449   : > { %5013 = vmatmul.mubr.msk.bf16.vlgmr.msra.gmra.mxu1 %vm1845_vm2, %v1869_v51 }
 0x44a   : > { %2306 = vmatpush1.bf16.msra.mxu1 %v5298_v57 }
 0x44b   : > { %2307 = vmatprep.subr.bf16.mxu1 %v5303_v53 }
 0x44e   : > { %2308 = vmatpush1.bf16.msra.mxu1 %v5301_v58 }
 0x44f   : > { %2309 = vmatprep.subr.bf16.mxu1 %v5306_v46 }
 0x452   : > { %2310 = vmatpush1.bf16.msra.mxu1 %v5304_v52 }
 0x453   : > { %2311 = vmatprep.subr.bf16.mxu1 %v5309_v59 }
 0x456   : > { %2312 = vmatpush1.bf16.msra.mxu1 %v5307_v60 }
 0x457   : > { %2313 = vmatprep.subr.bf16.mxu1 %v5312_v5 }
 0x45a   : > { %2314 = vmatpush1.bf16.msra.mxu1 %v5310_v61 }
 0x45b   : > { %2315 = vmatprep.subr.bf16.mxu1 %v5315_v43 }
 0x45e   : > { %2316 = vmatpush1.bf16.msra.mxu1 %v5313_v49 }
 0x45f   : > { %2317 = vmatprep.subr.bf16.mxu1 %v5318_v62 }
 0x462   : > { %2318 = vmatpush1.bf16.msra.mxu1 %v5316_v63 }
 0x463   : > { %2319 = vmatprep.subr.bf16.mxu1 %v5321_v2 }
 0x466   : > { %2320 = vmatpush1.bf16.msra.mxu1 %v5319_v3 }
 0x467   : > { %2321 = vmatprep.subr.bf16.mxu1 %v5324_v4 }
 0x46a   : > { %2322 = vmatpush2.bf16.msra.mxu1 %v5322_v6 }
 0x46b   : > { %2323 = vmatprep.subr.bf16.mxu1 %v5327_v7 }
 0x46e   : > { %2324 = vmatpush2.bf16.msra.mxu1 %v5325_v11 }
 0x46f   : > { %2325 = vmatprep.subr.bf16.mxu1 %v5330_v12 }
 0x472   : > { %2326 = vmatpush2.bf16.msra.mxu1 %v5328_v13 }
 0x473   : > { %2327 = vmatprep.subr.bf16.mxu1 %v5333_v14 }
 0x476   : > { %2328 = vmatpush2.bf16.msra.mxu1 %v5331_v17 }
 0x477   : > { %2329 = vmatprep.subr.bf16.mxu1 %v5336_v21 }
 0x47a   : > { %2330 = vmatpush2.bf16.msra.mxu1 %v5334_v22 }
 0x47b   : > { %2331 = vmatprep.subr.bf16.mxu1 %v5339_v25 }
 0x47e   : > { %2332 = vmatpush2.bf16.msra.mxu1 %v5337_v23 }
 0x47f   : > { %2333 = vmatprep.subr.bf16.mxu1 %v5342_v26 }
 0x482   : > { %2334 = vmatpush2.bf16.msra.mxu1 %v5340_v27 }
 0x483   : > { %2335 = vmatprep.subr.bf16.mxu1 %v5345_v28 }
 0x486   : > { %2336 = vmatpush2.bf16.msra.mxu1 %v5343_v29  ;;  %v2451_v29 = vld [vmem:[#allocation14 + $0x1c0] sm:$0xff] }
 0x501   : > { %v1911_v30 = vpop.f32.mrf.mxu1 }
 0x502   : > { %v1963_v31 = vpack.c.bf16 %v1911_v30, %v1911_v30  ;;  %v2455_v30 = vld [vmem:[#allocation14 + $0x1e0] sm:$0xff] }
 0x503   : > { %v5008_v32 = vpop.f32.mrf.mxu1 }
 0x504   : > { %v1970_v34 = vrot.slane %v1963_v31, %v6262_v24  ;;  %v2452_v31 = vld [vmem:[#allocation14 + $0x1c8] sm:$0xff]  ;;  %v4769_v32 = vcombine.low %v2451_v29, %v2455_v30 }
 0x505   : > { %v1914_v35 = vpop.f32.mrf.mxu1 }
 0x506   : > { %v1971_v9 = vcombine.high %v1970_v34, %v5921_v39  ;;  %v1978_v0 = vrot.slane %v1970_v34, %v6265_v33  ;;  %v4770_v34 = vcombine.high %v2451_v29, %v2455_v30  ;;  %v2456_v35 = vld [vmem:[#allocation14 + $0x1e8] sm:$0xff] }
 0x507   : > { %v5009_v36 = vpop.f32.mrf.mxu1  ;;  %v2400_v29 = vld [vmem:[#allocation14 + $0x28] sm:$0xff] }
 0x508   : > { %v1985_v40 = vrot.slane %v1971_v9, %v6265_v33  ;;  %v1986_v44 = vcombine.high %v1978_v0, %v5921_v39  ;;  %v2017_v57 = vshrl.u32 %v1978_v0, 16  ;;  %v2443_v36 = vld [vmem:[#allocation14 + $0x180] sm:$0xff]  ;;  %3205 = vmatprep.subr.bf16.mxu0 %v4770_v34 }
 0x509   : > { %v1957_v37 = vpop.f32.mrf.mxu1  ;;  %v2447_v9 = vld [vmem:[#allocation14 + $0x1a0] sm:$0xff]  ;;  %3206 = vmatpush1.bf16.msra.mxu0 %v4769_v32 }
 0x50a   : > { %v1988_v1 = vpack.c.bf16 %v1957_v37, %v1957_v37  ;;  %v1987_v50 = vcombine.high %v1985_v40, %v5921_v39  ;;  %v2025_v51 = vshrl.u32 %v1986_v44, 16  ;;  %v2033_v46 = vshrl.u32 %v1985_v40, 16 }
 0x50b   : > { %v5014_v38 = vpop.f32.mrf.mxu1  ;;  %v4772_v37 = vcombine.high %v2452_v31, %v2456_v35 }
 0x50c   : > { %v1995_v41 = vrot.slane %v1988_v1, %v6262_v24  ;;  %v2041_v5 = vshrl.u32 %v1987_v50, 16  ;;  %v2444_v1 = vld [vmem:[#allocation14 + $0x188] sm:$0xff] }
 0x50d   : > { %v1960_v42 = vpop.f32.mrf.mxu1  ;;  %v2448_v38 = vld [vmem:[#allocation14 + $0x1a8] sm:$0xff]  ;;  %3246 = vmatprep.subr.bf16.mxu1 %v4772_v37 }
 0x50e   : > { %v1996_v45 = vcombine.high %v1995_v41, %v5921_v39  ;;  %v2003_v47 = vrot.slane %v1995_v41, %v6265_v33  ;;  %v2439_v41 = vld [vmem:[#allocation14 + $0x160] sm:$0xff]  ;;  %v2436_v42 = vld [vmem:[#allocation14 + $0x148] sm:$0xff] }
 0x50f   : > { %v5015_v48 = vpop.f32.mrf.mxu1 }
 0x510   : > { %v2010_v54 = vrot.slane %v1996_v45, %v6265_v33  ;;  %v2011_v55 = vcombine.high %v2003_v47, %v5921_v39  ;;  %v2018_v56 = vshrl.u32 %v2003_v47, 16  ;;  %v2015_v52 = vpack.i.b16 %v2003_v47, %v1978_v0 }
 0x511   : > { %v4762_v0 = vcombine.high %v2443_v36, %v2447_v9  ;;  %v4761_v45 = vcombine.low %v2443_v36, %v2447_v9  ;;  %v4763_v47 = vcombine.low %v2444_v1, %v2448_v38  ;;  %v2133_v9 = vld [vmem:[%s6484_s6] sm:$0x3] }
 0x512   : > { %v2012_v53 = vcombine.high %v2010_v54, %v5921_v39  ;;  %v2026_v58 = vshrl.u32 %v2011_v55, 16  ;;  %v2031_v59 = vpack.i.b16 %v2010_v54, %v1985_v40  ;;  %v2034_v60 = vshrl.u32 %v2010_v54, 16  ;;  %v2427_v54 = vld [vmem:[#allocation14 + $0x100] sm:$0xff] }
 0x513   : > { %v2023_v61 = vpack.i.b16 %v2011_v55, %v1986_v44  ;;  %v2019_v62 = vpack.i.b16 %v2018_v56, %v2017_v57  ;;  %v4764_v40 = vcombine.high %v2444_v1, %v2448_v38  ;;  %v2440_v44 = vld [vmem:[#allocation14 + $0x168] sm:$0xff]  ;;  %3207 = vmatprep.subr.bf16.mxu0 %v4762_v0  ;;  %v2431_v55 = vld [vmem:[#allocation14 + $0x120] sm:$0xff]  ;;  %v2142_v37 = vrot.slane %v2133_v9, %v6222_v19 }
 0x514   : > { %v2039_v43 = vpack.i.b16 %v2012_v53, %v1987_v50  ;;  %v2042_v49 = vshrl.u32 %v2012_v53, 16  ;;  %v2035_v63 = vpack.i.b16 %v2034_v60, %v2033_v46  ;;  %v2045_v2 = vcombine.low %v2015_v52, %v2031_v59  ;;  %v2428_v56 = vld [vmem:[#allocation14 + $0x108] sm:$0xff]  ;;  %3208 = vmatpush1.bf16.msra.mxu0 %v4761_v45  ;;  %v2419_v52 = vld [vmem:[#allocation14 + $0xc0] sm:$0xff] }
 0x515   : > { %v2027_v3 = vpack.i.b16 %v2026_v58, %v2025_v51  ;;  %v4756_v50 = vcombine.high %v2436_v42, %v2440_v44  ;;  %v2432_v57 = vld [vmem:[#allocation14 + $0x128] sm:$0xff]  ;;  %v4755_v53 = vcombine.low %v2436_v42, %v2440_v44  ;;  %v4746_v58 = vcombine.high %v2427_v54, %v2431_v55  ;;  %v2423_v59 = vld [vmem:[#allocation14 + $0xe0] sm:$0xff] }
 0x516   : > { %v2043_v4 = vpack.i.b16 %v2042_v49, %v2041_v5  ;;  %v2053_v6 = vcombine.low %v2023_v61, %v2039_v43  ;;  %v2069_v7 = vcombine.low %v2019_v62, %v2035_v63  ;;  %v2052_v11 = vrot.slane %v2045_v2, %v6262_v24  ;;  %v2420_v60 = vld [vmem:[#allocation14 + $0xc8] sm:$0xff]  ;;  %v2411_v63 = vld [vmem:[#allocation14 + $0x80] sm:$0xff] }
 0x517   : > { %v4748_v46 = vcombine.high %v2428_v56, %v2432_v57  ;;  %v2424_v5 = vld [vmem:[#allocation14 + $0xe8] sm:$0xff]  ;;  %v4745_v61 = vcombine.low %v2427_v54, %v2431_v55  ;;  %v4747_v43 = vcombine.low %v2428_v56, %v2432_v57  ;;  %v4738_v49 = vcombine.high %v2419_v52, %v2423_v59  ;;  %v2415_v2 = vld [vmem:[#allocation14 + $0xa0] sm:$0xff] }
 0x518   : > { %v2060_v39 = vrot.slane %v2053_v6, %v6262_v24  ;;  %v2077_v12 = vcombine.low %v2027_v3, %v2043_v4  ;;  %v2076_v14 = vrot.slane %v2069_v7, %v6262_v24  ;;  %v4740_v62 = vcombine.high %v2420_v60, %v2424_v5  ;;  %v2412_v3 = vld [vmem:[#allocation14 + $0x88] sm:$0xff]  ;;  %v5583_v44 = vld [vmem:[%s6185_s11 + $0x8] sm:$0xff] }
 0x519   : > { %v2416_v4 = vld [vmem:[#allocation14 + $0xa8] sm:$0xff]  ;;  %v4737_v6 = vcombine.low %v2419_v52, %v2423_v59  ;;  %v4739_v7 = vcombine.low %v2420_v60, %v2424_v5  ;;  %v2515_v56 = vld [vmem:[#allocation14 + $0x3c0] sm:$0xff] }
 0x51a   : > { %v2061_v13 = vcombine.low %v2052_v11, %v2060_v39  ;;  %v2084_v17 = vrot.slane %v2077_v12, %v6262_v24  ;;  %v4771_v24 = vcombine.low %v2452_v31, %v2456_v35  ;;  %v4730_v11 = vcombine.high %v2411_v63, %v2415_v2  ;;  %v2403_v12 = vld [vmem:[#allocation14 + $0x40] sm:$0xff] }
 0x51b   : > { %v4732_v39 = vcombine.high %v2412_v3, %v2416_v4  ;;  %v2519_v57 = vld [vmem:[#allocation14 + $0x3e0] sm:$0xff] }
 0x51c   : > { %v2068_v21 = vrot.slane %v2061_v13, %v6265_v33  ;;  %v2085_v22 = vcombine.low %v2076_v14, %v2084_v17  ;;  %v2407_v13 = vld [vmem:[#allocation14 + $0x60] sm:$0xff]  ;;  %v2404_v14 = vld [vmem:[#allocation14 + $0x48] sm:$0xff] }
 0x51d   : > { %v2408_v17 = vld [vmem:[#allocation14 + $0x68] sm:$0xff]  ;;  %v4721_v30 = vcombine.low %v2403_v12, %v2407_v13  ;;  %v2507_v60 = vld [vmem:[#allocation14 + $0x380] sm:$0xff] }
 0x51e   : > { %v2092_v23 = vrot.slane %v2085_v22, %v6265_v33  ;;  %v2097_v25 = vshrl.u32 %v2068_v21, 16  ;;  %v2435_v33 = vld [vmem:[#allocation14 + $0x140] sm:$0xff]  ;;  %v4731_v22 = vcombine.low %v2412_v3, %v2416_v4  ;;  %v4723_v31 = vcombine.low %v2404_v14, %v2408_v17 }
 0x51f   : > { %v4754_v48 = vcombine.high %v2435_v33, %v2439_v41  ;;  %v4753_v51 = vcombine.low %v2435_v33, %v2439_v41  ;;  %v5582_v33 = vld [vmem:[%s6185_s11] sm:$0xff]  ;;  %v2511_v5 = vld [vmem:[#allocation14 + $0x3a0] sm:$0xff]  ;;  %s4410_s11 = scalar_lea.hbm %s6491_s13, %s4983_s23 }
 0x520   : > { %v2098_v26 = vshrl.u32 %v2092_v23, 16  ;;  %v2095_v28 = vpack.i.b16 %v2092_v23, %v2068_v21  ;;  %v4729_v21 = vcombine.low %v2411_v63, %v2415_v2  ;;  %v4722_v23 = vcombine.high %v2403_v12, %v2407_v13  ;;  %v2499_v3 = vld [vmem:[#allocation14 + $0x340] sm:$0xff] }
 0x521   : > { %3209 = vmatprep.subr.bf16.mxu0 %v4754_v48  ;;  %v2503_v4 = vld [vmem:[#allocation14 + $0x360] sm:$0xff] }
 0x522   : > { %v2099_v27 = vpack.i.b16 %v2098_v26, %v2097_v25  ;;  %3210 = vmatpush1.bf16.msra.mxu0 %v4753_v51  ;;  %v4724_v25 = vcombine.high %v2404_v14, %v2408_v17  ;;  %v2395_v26 = vld [vmem:[#allocation14] sm:$0xff]  ;;  %v2516_v51 = vld [vmem:[#allocation14 + $0x3c8] sm:$0xff] }
 0x523   : > { %3211 = vmatprep.subr.bf16.mxu0 %v4746_v58  ;;  %v2520_v58 = vld [vmem:[#allocation14 + $0x3e8] sm:$0xff]  ;;  %v2491_v14 = vld [vmem:[#allocation14 + $0x300] sm:$0xff] }
 0x524   : > { %2337 = vmatprep.mubr.bf16.mxu1 %v2099_v27  ;;  %v2399_v27 = vld [vmem:[#allocation14 + $0x20] sm:$0xff]  ;;  %v4835_v52 = vcombine.low %v2516_v51, %v2520_v58  ;;  %v4836_v59 = vcombine.high %v2516_v51, %v2520_v58  ;;  %v2464_v51 = vld [vmem:[#allocation14 + $0x228] sm:$0xff] }
 0x525   : > { %2338 = vmatmul.mubr.bf16.vlgmr.msra.gmra.mxu1 %v2095_v28  ;;  %v2396_v28 = vld [vmem:[#allocation14 + $0x8] sm:$0xff]  ;;  %v4714_v32 = vcombine.high %v2395_v26, %v2399_v27  ;;  %v4713_v35 = vcombine.low %v2395_v26, %v2399_v27  ;;  %v2495_v17 = vld [vmem:[#allocation14 + $0x320] sm:$0xff] }
 0x526   : > { %3247 = vmatpush1.bf16.msra.mxu1 %v4771_v24  ;;  %3212 = vmatpush1.bf16.msra.mxu0 %v4745_v61  ;;  %v4716_v34 = vcombine.high %v2396_v28, %v2400_v29  ;;  %v4715_v36 = vcombine.low %v2396_v28, %v2400_v29  ;;  %v2138_v24 = vrot.slane %v2133_v9, %v6225_v20  ;;  %v2508_v61 = vld [vmem:[#allocation14 + $0x388] sm:$0xff]  ;;  %v2483_v26 = vld [vmem:[#allocation14 + $0x2c0] sm:$0xff] }
 0x527   : > { %3248 = vmatprep.subr.bf16.mxu1 %v4764_v40  ;;  %3213 = vmatprep.subr.bf16.mxu0 %v4738_v49  ;;  %v2512_v49 = vld [vmem:[#allocation14 + $0x3a8] sm:$0xff]  ;;  %v2487_v27 = vld [vmem:[#allocation14 + $0x2e0] sm:$0xff] }
 0x528   : > { %v4827_v63 = vcombine.low %v2508_v61, %v2512_v49  ;;  %v4828_v2 = vcombine.high %v2508_v61, %v2512_v49  ;;  %v2476_v9 = vld [vmem:[#allocation14 + $0x288] sm:$0xff]  ;;  %v2457_v61 = vld [vmem:[#allocation14 + $0x1f0] sm:$0xff] }
 0x52a   : > { %3249 = vmatpush1.bf16.msra.mxu1 %v4763_v47  ;;  %3214 = vmatpush1.bf16.msra.mxu0 %v4737_v6  ;;  %v2500_v6 = vld [vmem:[#allocation14 + $0x348] sm:$0xff] }
 0x52b   : > { %3250 = vmatprep.subr.bf16.mxu1 %v4756_v50  ;;  %3215 = vmatprep.subr.bf16.mxu0 %v4730_v11  ;;  %v2504_v11 = vld [vmem:[#allocation14 + $0x368] sm:$0xff] }
 0x52c   : > { %v4819_v12 = vcombine.low %v2500_v6, %v2504_v11  ;;  %v4820_v13 = vcombine.high %v2500_v6, %v2504_v11 }
 0x52e   : > { %3251 = vmatpush1.bf16.msra.mxu1 %v4755_v53  ;;  %3216 = vmatpush1.bf16.msra.mxu0 %v4729_v21  ;;  %v4834_v53 = vcombine.high %v2515_v56, %v2519_v57  ;;  %v2492_v21 = vld [vmem:[#allocation14 + $0x308] sm:$0xff] }
 0x52f   : > { %3252 = vmatprep.subr.bf16.mxu1 %v4748_v46  ;;  %3217 = vmatprep.subr.bf16.mxu0 %v4722_v23  ;;  %v4833_v46 = vcombine.low %v2515_v56, %v2519_v57  ;;  %v4810_v23 = vcombine.high %v2491_v14, %v2495_v17  ;;  %v2463_v56 = vld [vmem:[#allocation14 + $0x220] sm:$0xff]  ;;  %v2460_v57 = vld [vmem:[#allocation14 + $0x208] sm:$0xff] }
 0x532   : > { %3253 = vmatpush1.bf16.msra.mxu1 %v4747_v43  ;;  %3218 = vmatpush1.bf16.msra.mxu0 %v4721_v30  ;;  %v4826_v43 = vcombine.high %v2507_v60, %v2511_v5  ;;  %v4802_v30 = vcombine.high %v2483_v26, %v2487_v27 }
 0x533   : > { %3254 = vmatprep.subr.bf16.mxu1 %v4740_v62  ;;  %3219 = vmatprep.subr.bf16.mxu0 %v4714_v32  ;;  %v4825_v62 = vcombine.low %v2507_v60, %v2511_v5  ;;  %v2488_v32 = vld [vmem:[#allocation14 + $0x2e8] sm:$0xff]  ;;  %v4779_v60 = vcombine.low %v2460_v57, %v2464_v51  ;;  %v2453_v5 = vld [vmem:[#allocation14 + $0x1d0] sm:$0xff] }
 0x534   : > { %v4774_v49 = vcombine.high %v2453_v5, %v2457_v61 }
 0x536   : > { %3255 = vmatpush1.bf16.msra.mxu1 %v4739_v7  ;;  %3220 = vmatpush1.bf16.msra.mxu0 %v4713_v35  ;;  %v4818_v7 = vcombine.high %v2499_v3, %v2503_v4 }
 0x537   : > { %3256 = vmatprep.subr.bf16.mxu1 %v4732_v39  ;;  %3221 = vmatprep.subr.bf16.mxu0 %v4834_v53  ;;  %v4817_v39 = vcombine.low %v2499_v3, %v2503_v4 }
 0x53a   : > { %3257 = vmatpush1.bf16.msra.mxu1 %v4731_v22  ;;  %3222 = vmatpush2.bf16.msra.mxu0 %v4833_v46  ;;  %v4809_v22 = vcombine.low %v2491_v14, %v2495_v17  ;;  %v572_v17 = vld [vmem:[#allocation11] sm:$0x3] }
 0x53b   : > { %3258 = vmatprep.subr.bf16.mxu1 %v4724_v25  ;;  %3223 = vmatprep.subr.bf16.mxu0 %v4826_v43  ;;  %v2496_v25 = vld [vmem:[#allocation14 + $0x328] sm:$0xff]  ;;  %v2454_v43 = vld [vmem:[#allocation14 + $0x1d8] sm:$0xff] }
 0x53c   : > { %v4811_v28 = vcombine.low %v2492_v21, %v2496_v25  ;;  %v4812_v29 = vcombine.high %v2492_v21, %v2496_v25  ;;  %v573_v21 = vld [vmem:[#allocation13] sm:$0x3]  ;;  %v2375_v25 = vrot.slane %v572_v17, %v6222_v19 }
 0x53e   : > { %3259 = vmatpush1.bf16.msra.mxu1 %v4723_v31  ;;  %3224 = vmatpush2.bf16.msra.mxu0 %v4825_v62  ;;  %v2484_v31 = vld [vmem:[#allocation14 + $0x2c8] sm:$0xff]  ;;  %v2458_v62 = vld [vmem:[#allocation14 + $0x1f8] sm:$0xff] }
 0x53f   : > { %3260 = vmatprep.subr.bf16.mxu1 %v4716_v34  ;;  %3225 = vmatprep.subr.bf16.mxu0 %v4818_v7  ;;  %v2475_v34 = vld [vmem:[#allocation14 + $0x280] sm:$0xff]  ;;  %v4804_v35 = vcombine.high %v2484_v31, %v2488_v32  ;;  %v4776_v3 = vcombine.high %v2454_v43, %v2458_v62 }
 0x542   : > { %3261 = vmatpush1.bf16.msra.mxu1 %v4715_v36  ;;  %3226 = vmatpush2.bf16.msra.mxu0 %v4817_v39  ;;  %v2479_v36 = vld [vmem:[#allocation14 + $0x2a0] sm:$0xff] }
 0x543   : > { %3262 = vmatprep.subr.bf16.mxu1 %v4836_v59  ;;  %3227 = vmatprep.subr.bf16.mxu0 %v4810_v23 }
 0x546   : > { %3263 = vmatpush2.bf16.msra.mxu1 %v4835_v52  ;;  %3228 = vmatpush2.bf16.msra.mxu0 %v4809_v22  ;;  %v4780_v52 = vcombine.high %v2460_v57, %v2464_v51  ;;  %v2429_v57 = vld [vmem:[#allocation14 + $0x110] sm:$0xff] }
 0x547   : > { %3264 = vmatprep.subr.bf16.mxu1 %v4828_v2  ;;  %3229 = vmatprep.subr.bf16.mxu0 %v4802_v30  ;;  %v4775_v2 = vcombine.low %v2454_v43, %v2458_v62  ;;  %v2433_v51 = vld [vmem:[#allocation14 + $0x130] sm:$0xff]  ;;  %v2422_v43 = vld [vmem:[#allocation14 + $0xd8] sm:$0xff] }
 0x548   : > { %v4749_v62 = vcombine.low %v2429_v57, %v2433_v51 }
 0x54a   : > { %3265 = vmatpush2.bf16.msra.mxu1 %v4827_v63  ;;  %v4773_v63 = vcombine.low %v2453_v5, %v2457_v61  ;;  %v2421_v5 = vld [vmem:[#allocation14 + $0xd0] sm:$0xff] }
 0x54b   : > { %3266 = vmatprep.subr.bf16.mxu1 %v4820_v13  ;;  %v2425_v61 = vld [vmem:[#allocation14 + $0xf0] sm:$0xff] }
 0x54e   : > { %3267 = vmatpush2.bf16.msra.mxu1 %v4819_v12 }
 0x54f   : > { %3268 = vmatprep.subr.bf16.mxu1 %v4812_v29  ;;  %v2388_v29 = vrot.slane %v573_v21, %v6222_v19 }
 0x552   : > { %3269 = vmatpush2.bf16.msra.mxu1 %v4811_v28 }
 0x553   : > { %3270 = vmatprep.subr.bf16.mxu1 %v4804_v35 }
 0x5e5   : > { %v2339_v0 = vpop.f32.mrf.mxu1 }
 0x5e6   : > { %v2340_v1 = vadd.f32 %v2339_v0, %v2138_v24  ;;  %v2480_v24 = vld [vmem:[#allocation14 + $0x2a8] sm:$0xff]  ;;  %v4803_v0 = vcombine.low %v2484_v31, %v2488_v32  ;;  %v2384_v31 = vrot.slane %v573_v21, %v6225_v20  ;;  %v2409_v21 = vld [vmem:[#allocation14 + $0x70] sm:$0xff] }
 0x5e7   : > { %v2341_v38 = vpop.f32.mrf.mxu1 }
 0x5e8   : > { %v6370_v40 = vadd.f32 %v5582_v33, %v2340_v1  ;;  %v2342_v41 = vadd.f32 %v2341_v38, %v2142_v37  ;;  %v4801_v37 = vcombine.low %v2483_v26, %v2487_v27  ;;  %v4794_v1 = vcombine.high %v2475_v34, %v2479_v36  ;;  %v2467_v33 = vld [vmem:[#allocation14 + $0x240] sm:$0xff]  ;;  %3271 = vmatpush2.bf16.msra.mxu1 %v4803_v0  ;;  %v2450_v0 = vld [vmem:[#allocation14 + $0x1b8] sm:$0xff] }
 0x5e9   : > { %v2343_v42 = vpop.f32.mrf.mxu1  ;;  %v4796_v38 = vcombine.high %v2476_v9, %v2480_v24  ;;  %v2371_v26 = vrot.slane %v572_v17, %v6225_v20  ;;  %v2405_v17 = vld [vmem:[#allocation14 + $0x50] sm:$0xff] }
 0x5ea   : > { %v6373_v45 = vadd.f32 %v5583_v44, %v2342_v41  ;;  %v2352_v50 = vmul.f32 %v6370_v40, %v6370_v40  ;;  %v2471_v41 = vld [vmem:[#allocation14 + $0x260] sm:$0xff]  ;;  %v2468_v42 = vld [vmem:[#allocation14 + $0x248] sm:$0xff]  ;;  %3230 = vmatpush2.bf16.msra.mxu0 %v4801_v37  ;;  %v2446_v37 = vld [vmem:[#allocation14 + $0x198] sm:$0xff] }
 0x5eb   : > { %v2344_v47 = vpop.f32.mrf.mxu1  ;;  %v2472_v44 = vld [vmem:[#allocation14 + $0x268] sm:$0xff]  ;;  %3231 = vmatprep.subr.bf16.mxu0 %v4794_v1  ;;  %3272 = vmatprep.subr.bf16.mxu1 %v4796_v38  ;;  %v4785_v53 = vcombine.low %v2467_v33, %v2471_v41 }
 0x5ec   : > { %v2348_v48 = vadd.f32 %v6373_v45, %v6370_v40  ;;  %v2353_v54 = vmul.f32 %v6373_v45, %v6373_v45  ;;  %v4793_v47 = vcombine.low %v2475_v34, %v2479_v36  ;;  %v4787_v58 = vcombine.low %v2468_v42, %v2472_v44 }
 0x5ee   : > { %2349 = vadd.xlane.f32.xlu0 %v2348_v48  ;;  %v2354_v55 = vadd.f32 %v2353_v54, %v2352_v50  ;;  %v4795_v48 = vcombine.low %v2476_v9, %v2480_v24  ;;  %v4786_v50 = vcombine.high %v2467_v33, %v2471_v41  ;;  %v4788_v54 = vcombine.high %v2468_v42, %v2472_v44  ;;  %v2445_v9 = vld [vmem:[#allocation14 + $0x190] sm:$0xff] }
 0x5ef   : > { %3232 = vmatpush2.bf16.msra.mxu0 %v4793_v47  ;;  %v2449_v24 = vld [vmem:[#allocation14 + $0x1b0] sm:$0xff]  ;;  %v4768_v42 = vcombine.high %v2446_v37, %v2450_v0  ;;  %v2438_v47 = vld [vmem:[#allocation14 + $0x158] sm:$0xff] }
 0x5f0   : > { %2355 = vadd.xlane.f32.xlu1 %v2354_v55  ;;  %v2459_v55 = vld [vmem:[#allocation14 + $0x200] sm:$0xff]  ;;  %3273 = vmatpush2.bf16.msra.mxu1 %v4795_v48  ;;  %v2437_v33 = vld [vmem:[#allocation14 + $0x150] sm:$0xff]  ;;  %v4766_v41 = vcombine.high %v2445_v9, %v2449_v24  ;;  %v2442_v48 = vld [vmem:[#allocation14 + $0x178] sm:$0xff] }
 0x5f1   : > { %3233 = vmatprep.subr.bf16.mxu0 %v4786_v50  ;;  %v4778_v46 = vcombine.high %v2459_v55, %v2463_v56  ;;  %3274 = vmatprep.subr.bf16.mxu1 %v4788_v54  ;;  %v4777_v59 = vcombine.low %v2459_v55, %v2463_v56  ;;  %v2441_v44 = vld [vmem:[#allocation14 + $0x170] sm:$0xff]  ;;  %v4765_v50 = vcombine.low %v2445_v9, %v2449_v24 }
 0x5f2   : > { %v4767_v54 = vcombine.low %v2446_v37, %v2450_v0  ;;  %v4758_v55 = vcombine.high %v2437_v33, %v2441_v44  ;;  %v4760_v56 = vcombine.high %v2438_v47, %v2442_v48  ;;  %v2517_v24 = vld [vmem:[#allocation14 + $0x3d0] sm:$0xff]  ;;  %v2518_v0 = vld [vmem:[#allocation14 + $0x3d8] sm:$0xff] }
 0x5f3   : > { %3234 = vmatpush2.bf16.msra.mxu0 %v4785_v53  ;;  %v2430_v53 = vld [vmem:[#allocation14 + $0x118] sm:$0xff]  ;;  %v2521_v37 = vld [vmem:[#allocation14 + $0x3f0] sm:$0xff] }
 0x5f4   : > { %3275 = vmatpush2.bf16.msra.mxu1 %v4787_v58  ;;  %3235 = vmatprep.subr.bf16.mxu0 %v4778_v46  ;;  %v2434_v58 = vld [vmem:[#allocation14 + $0x138] sm:$0xff]  ;;  %v4757_v46 = vcombine.low %v2437_v33, %v2441_v44 }
 0x5f5   : > { %3276 = vmatprep.subr.bf16.mxu1 %v4780_v52  ;;  %v4759_v52 = vcombine.low %v2438_v47, %v2442_v48  ;;  %v2509_v47 = vld [vmem:[#allocation14 + $0x390] sm:$0xff] }
 0x5f6   : > { %v2513_v48 = vld [vmem:[#allocation14 + $0x3b0] sm:$0xff] }
 0x5f7   : > { %3236 = vmatpush2.bf16.msra.mxu0 %v4777_v59  ;;  %v4750_v59 = vcombine.high %v2429_v57, %v2433_v51  ;;  %v4830_v57 = vcombine.high %v2509_v47, %v2513_v48 }
 0x5f8   : > { %3277 = vmatpush2.bf16.msra.mxu1 %v4779_v60  ;;  %3287 = vmatprep.subr.bf16.mxu0 %v4774_v49  ;;  %v4752_v60 = vcombine.high %v2430_v53, %v2434_v58  ;;  %v2426_v49 = vld [vmem:[#allocation14 + $0xf8] sm:$0xff] }
 0x5f9   : > { %3328 = vmatprep.subr.bf16.mxu1 %v4776_v3  ;;  %v4744_v3 = vcombine.high %v2422_v43, %v2426_v49 }
 0x677   : > { %v2350_v4 = vpop.xlane.xlu0 %2349 }
 0x678   : > { %v2351_v6 = vmul.f32 0.00390625, %v2350_v4  ;;  %v2413_v4 = vld [vmem:[#allocation14 + $0x90] sm:$0xff] }
 0x679   : > { %v2356_v7 = vpop.xlane.xlu1 %2355 }
 0x67a   : > { %v2357_v11 = vmul.f32 0.00390625, %v2356_v7  ;;  %v2358_v39 = vmul.f32 %v2351_v6, %v2351_v6  ;;  %v2361_v22 = vsub.f32 %v6370_v40, %v2351_v6  ;;  %v2362_v23 = vsub.f32 %v6373_v45, %v2351_v6  ;;  %v2417_v6 = vld [vmem:[#allocation14 + $0xb0] sm:$0xff]  ;;  %v2414_v7 = vld [vmem:[#allocation14 + $0x98] sm:$0xff] }
 0x67c   : > { %v2359_v12 = vsub.f32 %v2357_v11, %v2358_v39  ;;  %v2418_v11 = vld [vmem:[#allocation14 + $0xb8] sm:$0xff]  ;;  %v4741_v39 = vcombine.low %v2421_v5, %v2425_v61 }
 0x67e   : > { %v2360_v13 = vmax.f32 %v2359_v12, 0.0  ;;  %v4743_v12 = vcombine.low %v2422_v43, %v2426_v49  ;;  %v2493_v43 = vld [vmem:[#allocation14 + $0x310] sm:$0xff] }
 0x67f   : > { %v2497_v49 = vld [vmem:[#allocation14 + $0x330] sm:$0xff] }
 0x680   : > { %v2363_v14 = vadd.f32 1e-05, %v2360_v13  ;;  %v4734_v13 = vcombine.high %v2413_v4, %v2417_v6 }
 0x682   : > { %5548 = vrsqrt.f32 %v2363_v14  ;;  %v4736_v14 = vcombine.high %v2414_v7, %v2418_v11 }
 0x68f   : > { %v5549_v27 = vpop.eup %5548 }
 0x690   : > { %v2366_v28 = vmul.f32 %v5549_v27, %v2362_v23  ;;  %v2365_v30 = vmul.f32 %v5549_v27, %v2361_v22  ;;  %v2406_v22 = vld [vmem:[#allocation14 + $0x58] sm:$0xff]  ;;  %v4726_v27 = vcombine.high %v2405_v17, %v2409_v21 }
 0x691   : > { %v2410_v23 = vld [vmem:[#allocation14 + $0x78] sm:$0xff] }
 0x692   : > { %v2379_v32 = vmul.f32 %v2375_v25, %v2366_v28  ;;  %v2378_v34 = vmul.f32 %v2371_v26, %v2365_v30  ;;  %v4733_v25 = vcombine.low %v2413_v4, %v2417_v6  ;;  %v4735_v26 = vcombine.low %v2414_v7, %v2418_v11  ;;  %v2401_v30 = vld [vmem:[#allocation14 + $0x30] sm:$0xff] }
 0x693   : > { %v4728_v28 = vcombine.high %v2406_v22, %v2410_v23  ;;  %v4814_v4 = vcombine.high %v2493_v43, %v2497_v49  ;;  %v2485_v7 = vld [vmem:[#allocation14 + $0x2d0] sm:$0xff] }
 0x694   : > { %v2392_v35 = vadd.f32 %v2388_v29, %v2379_v32  ;;  %v2391_v36 = vadd.f32 %v2384_v31, %v2378_v34  ;;  %v2397_v29 = vld [vmem:[#allocation14 + $0x10] sm:$0xff]  ;;  %v2398_v31 = vld [vmem:[#allocation14 + $0x18] sm:$0xff]  ;;  %v4725_v34 = vcombine.low %v2405_v17, %v2409_v21 }
 0x695   : > { %v2402_v32 = vld [vmem:[#allocation14 + $0x38] sm:$0xff]  ;;  %v4717_v33 = vcombine.low %v2397_v29, %v2401_v30  ;;  %v2489_v11 = vld [vmem:[#allocation14 + $0x2f0] sm:$0xff] }
 0x696   : > { %v2394_v1 = vpack.c.bf16 %v2392_v35, %v2392_v35  ;;  %v6387_v38 = vpack.c.bf16 %v2391_v36, %v2391_v36  ;;  %v4727_v35 = vcombine.low %v2406_v22, %v2410_v23  ;;  %v4718_v36 = vcombine.high %v2397_v29, %v2401_v30  ;;  %v2477_v22 = vld [vmem:[#allocation14 + $0x290] sm:$0xff] }
 0x697   : > { %v4720_v9 = vcombine.high %v2398_v31, %v2402_v32  ;;  %v4806_v17 = vcombine.high %v2485_v7, %v2489_v11  ;;  %v2481_v23 = vld [vmem:[#allocation14 + $0x2b0] sm:$0xff] }
 0x698   : > { %3237 = vmatprep.mubr.bf16.mxu0 %v2394_v1  ;;  %3278 = vmatprep.mubr.bf16.mxu1 %v2394_v1  ;;  %v4798_v29 = vcombine.high %v2477_v22, %v2481_v23 }
 0x699   : > { %3238 = vmatmul.mubr.bf16.vlgmr.msra.gmra.mxu0 %v6387_v38  ;;  %3279 = vmatmul.mubr.bf16.vlgmr.msra.gmra.mxu1 %v6387_v38 }
 0x69a   : > { %3288 = vmatpush1.bf16.msra.mxu0 %v4773_v63  ;;  %3329 = vmatpush1.bf16.msra.mxu1 %v4775_v2  ;;  %v4751_v63 = vcombine.low %v2430_v53, %v2434_v58  ;;  %v4742_v2 = vcombine.high %v2421_v5, %v2425_v61  ;;  %v2501_v53 = vld [vmem:[#allocation14 + $0x350] sm:$0xff] }
 0x69b   : > { %3319 = vmatprep.mubr.bf16.mxu0 %v2394_v1  ;;  %3360 = vmatprep.mubr.bf16.mxu1 %v2394_v1  ;;  %v2522_v1 = vld [vmem:[#allocation14 + $0x3f8] sm:$0xff]  ;;  %v2505_v58 = vld [vmem:[#allocation14 + $0x370] sm:$0xff] }
 0x69c   : > { %3289 = vmatprep.subr.bf16.mxu0 %v4766_v41  ;;  %3330 = vmatprep.subr.bf16.mxu1 %v4768_v42  ;;  %v4719_v41 = vcombine.low %v2398_v31, %v2402_v32  ;;  %v4838_v42 = vcombine.high %v2517_v24, %v2521_v37  ;;  %v4840_v44 = vcombine.high %v2518_v0, %v2522_v1  ;;  %v2469_v31 = vld [vmem:[#allocation14 + $0x250] sm:$0xff] }
 0x69d   : > { %v4822_v5 = vcombine.high %v2501_v53, %v2505_v58  ;;  %v2473_v32 = vld [vmem:[#allocation14 + $0x270] sm:$0xff] }
 0x69e   : > { %3290 = vmatpush1.bf16.msra.mxu0 %v4765_v50  ;;  %3331 = vmatpush1.bf16.msra.mxu1 %v4767_v54  ;;  %v2510_v50 = vld [vmem:[#allocation14 + $0x398] sm:$0xff] }
 0x69f   : > { %3291 = vmatprep.subr.bf16.mxu0 %v4758_v55  ;;  %3332 = vmatprep.subr.bf16.mxu1 %v4760_v56  ;;  %v2514_v54 = vld [vmem:[#allocation14 + $0x3b8] sm:$0xff]  ;;  %v4837_v55 = vcombine.low %v2517_v24, %v2521_v37  ;;  %v4839_v56 = vcombine.low %v2518_v0, %v2522_v1  ;;  %v4790_v24 = vcombine.high %v2469_v31, %v2473_v32  ;;  %v2461_v0 = vld [vmem:[#allocation14 + $0x210] sm:$0xff] }
 0x6a0   : > { %v4832_v51 = vcombine.high %v2510_v50, %v2514_v54  ;;  %v2465_v1 = vld [vmem:[#allocation14 + $0x230] sm:$0xff] }
 0x6a2   : > { %3292 = vmatpush1.bf16.msra.mxu0 %v4757_v46  ;;  %3333 = vmatpush1.bf16.msra.mxu1 %v4759_v52  ;;  %v2502_v46 = vld [vmem:[#allocation14 + $0x358] sm:$0xff] }
 0x6a3   : > { %3293 = vmatprep.subr.bf16.mxu0 %v4750_v59  ;;  %3334 = vmatprep.subr.bf16.mxu1 %v4752_v60  ;;  %v2506_v52 = vld [vmem:[#allocation14 + $0x378] sm:$0xff]  ;;  %v4829_v59 = vcombine.low %v2509_v47, %v2513_v48  ;;  %v4831_v60 = vcombine.low %v2510_v50, %v2514_v54  ;;  %v4782_v47 = vcombine.high %v2461_v0, %v2465_v1 }
 0x6a4   : > { %v4824_v61 = vcombine.high %v2502_v46, %v2506_v52  ;;  %v4781_v50 = vcombine.low %v2461_v0, %v2465_v1  ;;  %v5417_v0 = vld [vmem:[#allocation16 + $0x1c4] ss:$8 sps:$4 sm:$0xff]   ;;  %v5412_v1 = vld [vmem:[#allocation16 + $0xc0] ss:$8 sps:$4 sm:$0xff]  }
 0x6a6   : > { %3294 = vmatpush1.bf16.msra.mxu0 %v4749_v62  ;;  %3335 = vmatpush1.bf16.msra.mxu1 %v4751_v63  ;;  %v2494_v62 = vld [vmem:[#allocation14 + $0x318] sm:$0xff] }
 0x6a7   : > { %3295 = vmatprep.subr.bf16.mxu0 %v4742_v2  ;;  %3336 = vmatprep.subr.bf16.mxu1 %v4744_v3  ;;  %v2498_v63 = vld [vmem:[#allocation14 + $0x338] sm:$0xff]  ;;  %v4821_v2 = vcombine.low %v2501_v53, %v2505_v58  ;;  %v4823_v3 = vcombine.low %v2502_v46, %v2506_v52  ;;  %v5354_v53 = vld [vmem:[#allocation16 + $0x64] ss:$8 sps:$4 sm:$0xff]   ;;  %v5352_v46 = vld [vmem:[#allocation16 + $0x60] ss:$8 sps:$4 sm:$0xff]  }
 0x6a8   : > { %v4816_v6 = vcombine.high %v2494_v62, %v2498_v63  ;;  %v5357_v58 = vld [vmem:[#allocation16 + $0x164] ss:$8 sps:$4 sm:$0xff]   ;;  %v5355_v52 = vld [vmem:[#allocation16 + $0x160] ss:$8 sps:$4 sm:$0xff]  }
 0x6aa   : > { %3296 = vmatpush1.bf16.msra.mxu0 %v4741_v39  ;;  %3337 = vmatpush1.bf16.msra.mxu1 %v4743_v12  ;;  %v2486_v39 = vld [vmem:[#allocation14 + $0x2d8] sm:$0xff] }
 0x6ab   : > { %3297 = vmatprep.subr.bf16.mxu0 %v4734_v13  ;;  %3338 = vmatprep.subr.bf16.mxu1 %v4736_v14  ;;  %v2490_v12 = vld [vmem:[#allocation14 + $0x2f8] sm:$0xff]  ;;  %v4813_v13 = vcombine.low %v2493_v43, %v2497_v49  ;;  %v4815_v14 = vcombine.low %v2494_v62, %v2498_v63  ;;  %v5366_v43 = vld [vmem:[#allocation16 + $0x44] ss:$8 sps:$4 sm:$0xff]   ;;  %v5364_v62 = vld [vmem:[#allocation16 + $0x40] ss:$8 sps:$4 sm:$0xff]  }
 0x6ac   : > { %v4808_v21 = vcombine.high %v2486_v39, %v2490_v12  ;;  %v5369_v49 = vld [vmem:[#allocation16 + $0x144] ss:$8 sps:$4 sm:$0xff]   ;;  %v5372_v63 = vld [vmem:[#allocation16 + $0x34] ss:$8 sps:$4 sm:$0xff]  }
 0x6ae   : > { %3298 = vmatpush1.bf16.msra.mxu0 %v4733_v25  ;;  %3339 = vmatpush1.bf16.msra.mxu1 %v4735_v26  ;;  %v2478_v25 = vld [vmem:[#allocation14 + $0x298] sm:$0xff] }
 0x6af   : > { %3299 = vmatprep.subr.bf16.mxu0 %v4726_v27  ;;  %3340 = vmatprep.subr.bf16.mxu1 %v4728_v28  ;;  %v2482_v26 = vld [vmem:[#allocation14 + $0x2b8] sm:$0xff]  ;;  %v4805_v27 = vcombine.low %v2485_v7, %v2489_v11  ;;  %v4807_v28 = vcombine.low %v2486_v39, %v2490_v12  ;;  %v5381_v7 = vld [vmem:[#allocation16 + $0x124] ss:$8 sps:$4 sm:$0xff]   ;;  %v5376_v11 = vld [vmem:[#allocation16 + $0x20] ss:$8 sps:$4 sm:$0xff]  }
 0x6b0   : > { %v4800_v30 = vcombine.high %v2478_v25, %v2482_v26  ;;  %v5379_v39 = vld [vmem:[#allocation16 + $0x120] ss:$8 sps:$4 sm:$0xff]   ;;  %v5384_v12 = vld [vmem:[#allocation16 + $0x14] ss:$8 sps:$4 sm:$0xff]  }
 0x6b2   : > { %3300 = vmatpush1.bf16.msra.mxu0 %v4725_v34  ;;  %3341 = vmatpush1.bf16.msra.mxu1 %v4727_v35  ;;  %v2470_v34 = vld [vmem:[#allocation14 + $0x258] sm:$0xff] }
 0x6b3   : > { %3301 = vmatprep.subr.bf16.mxu0 %v4718_v36  ;;  %3342 = vmatprep.subr.bf16.mxu1 %v4720_v9  ;;  %v2474_v35 = vld [vmem:[#allocation14 + $0x278] sm:$0xff]  ;;  %v4797_v36 = vcombine.low %v2477_v22, %v2481_v23  ;;  %v4799_v9 = vcombine.low %v2478_v25, %v2482_v26  ;;  %v5393_v22 = vld [vmem:[#allocation16 + $0x104] ss:$8 sps:$4 sm:$0xff]   ;;  %v5388_v23 = vld [vmem:[#allocation16] ss:$8 sps:$4 sm:$0xff]  }
 0x6b4   : > { %v4792_v37 = vcombine.high %v2470_v34, %v2474_v35  ;;  %v5391_v25 = vld [vmem:[#allocation16 + $0x100] ss:$8 sps:$4 sm:$0xff]   ;;  %v5396_v26 = vld [vmem:[#allocation16 + $0xf4] ss:$8 sps:$4 sm:$0xff]  }
 0x6b6   : > { %3302 = vmatpush1.bf16.msra.mxu0 %v4717_v33  ;;  %3343 = vmatpush1.bf16.msra.mxu1 %v4719_v41  ;;  %v2462_v33 = vld [vmem:[#allocation14 + $0x218] sm:$0xff] }
 0x6b7   : > { %3303 = vmatprep.subr.bf16.mxu0 %v4838_v42  ;;  %3344 = vmatprep.subr.bf16.mxu1 %v4840_v44  ;;  %v2466_v41 = vld [vmem:[#allocation14 + $0x238] sm:$0xff]  ;;  %v4789_v42 = vcombine.low %v2469_v31, %v2473_v32  ;;  %v4791_v44 = vcombine.low %v2470_v34, %v2474_v35  ;;  %v5405_v31 = vld [vmem:[#allocation16 + $0x1e4] ss:$8 sps:$4 sm:$0xff]   ;;  %v5400_v32 = vld [vmem:[#allocation16 + $0xe0] ss:$8 sps:$4 sm:$0xff]  }
 0x6b8   : > { %v4784_v48 = vcombine.high %v2462_v33, %v2466_v41  ;;  %v4783_v54 = vcombine.low %v2462_v33, %v2466_v41  ;;  %v5403_v34 = vld [vmem:[#allocation16 + $0x1e0] ss:$8 sps:$4 sm:$0xff]   ;;  %v5408_v35 = vld [vmem:[#allocation16 + $0xd4] ss:$8 sps:$4 sm:$0xff]  }
 0x6b9   : > { %v5415_v33 = vld [vmem:[#allocation16 + $0x1c0] ss:$8 sps:$4 sm:$0xff]   ;;  %v5420_v41 = vld [vmem:[#allocation16 + $0xb4] ss:$8 sps:$4 sm:$0xff]  }
 0x6ba   : > { %3304 = vmatpush2.bf16.msra.mxu0 %v4837_v55  ;;  %3345 = vmatpush2.bf16.msra.mxu1 %v4839_v56  ;;  %v5348_v55 = vld [vmem:[#allocation16 + $0x74] ss:$8 sps:$4 sm:$0xff]  }
 0x6bb   : > { %3305 = vmatprep.subr.bf16.mxu0 %v4830_v57  ;;  %3346 = vmatprep.subr.bf16.mxu1 %v4832_v51  ;;  %v5351_v56 = vld [vmem:[#allocation16 + $0x174] ss:$8 sps:$4 sm:$0xff]   ;;  %v5346_v57 = vld [vmem:[#allocation16 + $0x70] ss:$8 sps:$4 sm:$0xff]  }
 0x6bc   : > { %v5349_v51 = vld [vmem:[#allocation16 + $0x170] ss:$8 sps:$4 sm:$0xff]  }
 0x6be   : > { %3306 = vmatpush2.bf16.msra.mxu0 %v4829_v59  ;;  %3347 = vmatpush2.bf16.msra.mxu1 %v4831_v60  ;;  %v5360_v59 = vld [vmem:[#allocation16 + $0x54] ss:$8 sps:$4 sm:$0xff]  }
 0x6bf   : > { %3307 = vmatprep.subr.bf16.mxu0 %v4822_v5  ;;  %3348 = vmatprep.subr.bf16.mxu1 %v4824_v61  ;;  %v5363_v60 = vld [vmem:[#allocation16 + $0x154] ss:$8 sps:$4 sm:$0xff]   ;;  %v5358_v5 = vld [vmem:[#allocation16 + $0x50] ss:$8 sps:$4 sm:$0xff]  }
 0x6c0   : > { %v5361_v61 = vld [vmem:[#allocation16 + $0x150] ss:$8 sps:$4 sm:$0xff]  }
 0x6c2   : > { %3308 = vmatpush2.bf16.msra.mxu0 %v4821_v2  ;;  %3349 = vmatpush2.bf16.msra.mxu1 %v4823_v3  ;;  %v5375_v2 = vld [vmem:[#allocation16 + $0x134] ss:$8 sps:$4 sm:$0xff]   ;;  %v5370_v3 = vld [vmem:[#allocation16 + $0x30] ss:$8 sps:$4 sm:$0xff]  }
 0x6c3   : > { %3309 = vmatprep.subr.bf16.mxu0 %v4814_v4  ;;  %3350 = vmatprep.subr.bf16.mxu1 %v4816_v6  ;;  %v5373_v4 = vld [vmem:[#allocation16 + $0x130] ss:$8 sps:$4 sm:$0xff]   ;;  %v5378_v6 = vld [vmem:[#allocation16 + $0x24] ss:$8 sps:$4 sm:$0xff]  }
 0x6c6   : > { %3310 = vmatpush2.bf16.msra.mxu0 %v4813_v13  ;;  %3351 = vmatpush2.bf16.msra.mxu1 %v4815_v14  ;;  %v5387_v13 = vld [vmem:[#allocation16 + $0x114] ss:$8 sps:$4 sm:$0xff]   ;;  %v5382_v14 = vld [vmem:[#allocation16 + $0x10] ss:$8 sps:$4 sm:$0xff]  }
 0x6c7   : > { %3311 = vmatprep.subr.bf16.mxu0 %v4806_v17  ;;  %3352 = vmatprep.subr.bf16.mxu1 %v4808_v21  ;;  %v5385_v17 = vld [vmem:[#allocation16 + $0x110] ss:$8 sps:$4 sm:$0xff]   ;;  %v5390_v21 = vld [vmem:[#allocation16 + $0x4] ss:$8 sps:$4 sm:$0xff]  }
 0x6ca   : > { %3312 = vmatpush2.bf16.msra.mxu0 %v4805_v27  ;;  %3353 = vmatpush2.bf16.msra.mxu1 %v4807_v28  ;;  %v5399_v27 = vld [vmem:[#allocation16 + $0x1f4] ss:$8 sps:$4 sm:$0xff]   ;;  %v5394_v28 = vld [vmem:[#allocation16 + $0xf0] ss:$8 sps:$4 sm:$0xff]  }
 0x6cb   : > { %3313 = vmatprep.subr.bf16.mxu0 %v4798_v29  ;;  %3354 = vmatprep.subr.bf16.mxu1 %v4800_v30  ;;  %v5397_v29 = vld [vmem:[#allocation16 + $0x1f0] ss:$8 sps:$4 sm:$0xff]   ;;  %v5402_v30 = vld [vmem:[#allocation16 + $0xe4] ss:$8 sps:$4 sm:$0xff]  }
 0x6ce   : > { %3314 = vmatpush2.bf16.msra.mxu0 %v4797_v36  ;;  %3355 = vmatpush2.bf16.msra.mxu1 %v4799_v9  ;;  %v5411_v36 = vld [vmem:[#allocation16 + $0x1d4] ss:$8 sps:$4 sm:$0xff]   ;;  %v5406_v9 = vld [vmem:[#allocation16 + $0xd0] ss:$8 sps:$4 sm:$0xff]  }
 0x6cf   : > { %3315 = vmatprep.subr.bf16.mxu0 %v4790_v24  ;;  %3356 = vmatprep.subr.bf16.mxu1 %v4792_v37  ;;  %v5409_v24 = vld [vmem:[#allocation16 + $0x1d0] ss:$8 sps:$4 sm:$0xff]   ;;  %v5414_v37 = vld [vmem:[#allocation16 + $0xc4] ss:$8 sps:$4 sm:$0xff]  }
 0x6d2   : > { %3316 = vmatpush2.bf16.msra.mxu0 %v4789_v42  ;;  %3357 = vmatpush2.bf16.msra.mxu1 %v4791_v44  ;;  %v5423_v42 = vld [vmem:[#allocation16 + $0x1b4] ss:$8 sps:$4 sm:$0xff]   ;;  %v5418_v44 = vld [vmem:[#allocation16 + $0xb0] ss:$8 sps:$4 sm:$0xff]  }
 0x6d3   : > { %3317 = vmatprep.subr.bf16.mxu0 %v4782_v47  ;;  %3358 = vmatprep.subr.bf16.mxu1 %v4784_v48  ;;  %v5421_v47 = vld [vmem:[#allocation16 + $0x1b0] ss:$8 sps:$4 sm:$0xff]   ;;  %v5426_v48 = vld [vmem:[#allocation16 + $0xa4] ss:$8 sps:$4 sm:$0xff]  }
 0x6d6   : > { %3318 = vmatpush2.bf16.msra.mxu0 %v4781_v50  ;;  %3359 = vmatpush2.bf16.msra.mxu1 %v4783_v54  ;;  %v5429_v50 = vld [vmem:[#allocation16 + $0x1a4] ss:$8 sps:$4 sm:$0xff]   ;;  %v5424_v54 = vld [vmem:[#allocation16 + $0xa0] ss:$8 sps:$4 sm:$0xff]  }
 0x6d7   : > { %4229 = vmatprep.subr.bf16.mxu0 %v5348_v55  ;;  %4270 = vmatprep.subr.bf16.mxu1 %v5351_v56  ;;  %v5427_v55 = vld [vmem:[#allocation16 + $0x1a0] ss:$8 sps:$4 sm:$0xff]   ;;  %v5432_v56 = vld [vmem:[#allocation16 + $0x94] ss:$8 sps:$4 sm:$0xff]  }
 0x6d9   : > { %3320 = vmatmul.mubr.bf16.vlgmr.msra.gmra.mxu0 %v6387_v38  ;;  %3361 = vmatmul.mubr.bf16.vlgmr.msra.gmra.mxu1 %v6387_v38  ;;  %v5367_v38 = vld [vmem:[#allocation16 + $0x140] ss:$8 sps:$4 sm:$0xff]  }
 0x6da   : > { %4230 = vmatpush1.bf16.msra.mxu0 %v5346_v57  ;;  %4271 = vmatpush1.bf16.msra.mxu1 %v5349_v51  ;;  %v5435_v57 = vld [vmem:[#allocation16 + $0x194] ss:$8 sps:$4 sm:$0xff]   ;;  %v5430_v51 = vld [vmem:[#allocation16 + $0x90] ss:$8 sps:$4 sm:$0xff]  }
 0x6db   : > { %4231 = vmatprep.subr.bf16.mxu0 %v5354_v53  ;;  %4272 = vmatprep.subr.bf16.mxu1 %v5357_v58  ;;  %v5433_v53 = vld [vmem:[#allocation16 + $0x190] ss:$8 sps:$4 sm:$0xff]   ;;  %v5438_v58 = vld [vmem:[#allocation16 + $0x84] ss:$8 sps:$4 sm:$0xff]  }
 0x6de   : > { %4232 = vmatpush1.bf16.msra.mxu0 %v5352_v46  ;;  %4273 = vmatpush1.bf16.msra.mxu1 %v5355_v52  ;;  %v5441_v46 = vld [vmem:[#allocation16 + $0x184] ss:$8 sps:$4 sm:$0xff]   ;;  %v5436_v52 = vld [vmem:[#allocation16 + $0x80] ss:$8 sps:$4 sm:$0xff]  }
 0x6df   : > { %4233 = vmatprep.subr.bf16.mxu0 %v5360_v59  ;;  %4274 = vmatprep.subr.bf16.mxu1 %v5363_v60  ;;  %v5439_v59 = vld [vmem:[#allocation16 + $0x180] ss:$8 sps:$4 sm:$0xff]   ;;  %v5444_v60 = vld [vmem:[#allocation16 + $0x274] ss:$8 sps:$4 sm:$0xff]  }
 0x6e2   : > { %4234 = vmatpush1.bf16.msra.mxu0 %v5358_v5  ;;  %4275 = vmatpush1.bf16.msra.mxu1 %v5361_v61  ;;  %v5447_v5 = vld [vmem:[#allocation16 + $0x374] ss:$8 sps:$4 sm:$0xff]  }
 0x6e3   : > { %4235 = vmatprep.subr.bf16.mxu0 %v5366_v43  ;;  %4276 = vmatprep.subr.bf16.mxu1 %v5369_v49  ;;  %v6396_v61 = vld [vmem:[%s6488_s10] sm:$0xff] }
 0x6e4   : > { %v2528_v43 = vrot.slane %v6396_v61, %v6225_v20  ;;  %v2536_v49 = vrot.slane %v6396_v61, %v730_v8 }
 0x6e6   : > { %4236 = vmatpush1.bf16.msra.mxu0 %v5364_v62  ;;  %4277 = vmatpush1.bf16.msra.mxu1 %v5367_v38  ;;  %v2532_v62 = vrot.slane %v6396_v61, %v6222_v19  ;;  %v2540_v38 = vrot.slane %v6396_v61, %v734_v10 }
 0x6e7   : > { %4237 = vmatprep.subr.bf16.mxu0 %v5372_v63  ;;  %4278 = vmatprep.subr.bf16.mxu1 %v5375_v2 }
 0x6ea   : > { %4238 = vmatpush1.bf16.msra.mxu0 %v5370_v3  ;;  %4279 = vmatpush1.bf16.msra.mxu1 %v5373_v4 }
 0x6eb   : > { %4239 = vmatprep.subr.bf16.mxu0 %v5378_v6  ;;  %4280 = vmatprep.subr.bf16.mxu1 %v5381_v7 }
 0x6ee   : > { %4240 = vmatpush1.bf16.msra.mxu0 %v5376_v11  ;;  %4281 = vmatpush1.bf16.msra.mxu1 %v5379_v39 }
 0x6ef   : > { %4241 = vmatprep.subr.bf16.mxu0 %v5384_v12  ;;  %4282 = vmatprep.subr.bf16.mxu1 %v5387_v13 }
 0x6f2   : > { %4242 = vmatpush1.bf16.msra.mxu0 %v5382_v14  ;;  %4283 = vmatpush1.bf16.msra.mxu1 %v5385_v17 }
 0x6f3   : > { %4243 = vmatprep.subr.bf16.mxu0 %v5390_v21  ;;  %4284 = vmatprep.subr.bf16.mxu1 %v5393_v22 }
 0x6f6   : > { %4244 = vmatpush1.bf16.msra.mxu0 %v5388_v23  ;;  %4285 = vmatpush1.bf16.msra.mxu1 %v5391_v25 }
 0x6f7   : > { %4245 = vmatprep.subr.bf16.mxu0 %v5396_v26  ;;  %4286 = vmatprep.subr.bf16.mxu1 %v5399_v27 }
 0x6fa   : > { %4246 = vmatpush2.bf16.msra.mxu0 %v5394_v28  ;;  %4287 = vmatpush2.bf16.msra.mxu1 %v5397_v29 }
 0x6fb   : > { %4247 = vmatprep.subr.bf16.mxu0 %v5402_v30  ;;  %4288 = vmatprep.subr.bf16.mxu1 %v5405_v31 }
 0x6fe   : > { %4248 = vmatpush2.bf16.msra.mxu0 %v5400_v32  ;;  %4289 = vmatpush2.bf16.msra.mxu1 %v5403_v34 }
 0x6ff   : > { %4249 = vmatprep.subr.bf16.mxu0 %v5408_v35  ;;  %4290 = vmatprep.subr.bf16.mxu1 %v5411_v36 }
 0x702   : > { %4250 = vmatpush2.bf16.msra.mxu0 %v5406_v9  ;;  %4291 = vmatpush2.bf16.msra.mxu1 %v5409_v24 }
 0x703   : > { %4251 = vmatprep.subr.bf16.mxu0 %v5414_v37  ;;  %4292 = vmatprep.subr.bf16.mxu1 %v5417_v0 }
 0x706   : > { %4252 = vmatpush2.bf16.msra.mxu0 %v5412_v1  ;;  %4293 = vmatpush2.bf16.msra.mxu1 %v5415_v33 }
 0x707   : > { %4253 = vmatprep.subr.bf16.mxu0 %v5420_v41  ;;  %4294 = vmatprep.subr.bf16.mxu1 %v5423_v42 }
 0x70a   : > { %4254 = vmatpush2.bf16.msra.mxu0 %v5418_v44  ;;  %4295 = vmatpush2.bf16.msra.mxu1 %v5421_v47 }
 0x70b   : > { %4255 = vmatprep.subr.bf16.mxu0 %v5426_v48  ;;  %4296 = vmatprep.subr.bf16.mxu1 %v5429_v50 }
 0x70e   : > { %4256 = vmatpush2.bf16.msra.mxu0 %v5424_v54  ;;  %4297 = vmatpush2.bf16.msra.mxu1 %v5427_v55  ;;  %v5442_v55 = vld [vmem:[#allocation16 + $0x270] ss:$8 sps:$4 sm:$0xff]  }
 0x70f   : > { %4257 = vmatprep.subr.bf16.mxu0 %v5432_v56  ;;  %4298 = vmatprep.subr.bf16.mxu1 %v5435_v57 }
 0x712   : > { %4258 = vmatpush2.bf16.msra.mxu0 %v5430_v51  ;;  %4299 = vmatpush2.bf16.msra.mxu1 %v5433_v53  ;;  %v5445_v51 = vld [vmem:[#allocation16 + $0x370] ss:$8 sps:$4 sm:$0xff]   ;;  %v5450_v53 = vld [vmem:[#allocation16 + $0x264] ss:$8 sps:$4 sm:$0xff]  }
 0x713   : > { %4259 = vmatprep.subr.bf16.mxu0 %v5438_v58  ;;  %4300 = vmatprep.subr.bf16.mxu1 %v5441_v46  ;;  %v5453_v46 = vld [vmem:[#allocation16 + $0x364] ss:$8 sps:$4 sm:$0xff]  }
 0x716   : > { %4260 = vmatpush2.bf16.msra.mxu0 %v5436_v52  ;;  %4301 = vmatpush2.bf16.msra.mxu1 %v5439_v59  ;;  %v5448_v52 = vld [vmem:[#allocation16 + $0x260] ss:$8 sps:$4 sm:$0xff]  }
 0x717   : > { %4311 = vmatprep.subr.bf16.mxu0 %v5444_v60  ;;  %4352 = vmatprep.subr.bf16.mxu1 %v5447_v5  ;;  %v5451_v59 = vld [vmem:[#allocation16 + $0x360] ss:$8 sps:$4 sm:$0xff]   ;;  %v5456_v60 = vld [vmem:[#allocation16 + $0x254] ss:$8 sps:$4 sm:$0xff]  }
 0x718   : > { %v5459_v5 = vld [vmem:[#allocation16 + $0x354] ss:$8 sps:$4 sm:$0xff]  }
 0x759   : > { %v3239_v63 = vpop.f32.mrf.mxu0  ;;  %v3280_v2 = vpop.f32.mrf.mxu1 }
 0x75a   : > { %v3240_v3 = vadd.f32 %v3239_v63, %v2528_v43  ;;  %v3281_v4 = vadd.f32 %v3280_v2, %v2536_v49  ;;  %v5454_v43 = vld [vmem:[#allocation16 + $0x250] ss:$8 sps:$4 sm:$0xff]   ;;  %v5460_v63 = vld [vmem:[#allocation16 + $0x240] ss:$8 sps:$4 sm:$0xff]   ;;  %v2551_v2 = vsub.s32 6, %v6219_v18 }
 0x75b   : > { %v3241_v6 = vpop.f32.mrf.mxu0  ;;  %v3282_v7 = vpop.f32.mrf.mxu1  ;;  %v5457_v49 = vld [vmem:[#allocation16 + $0x350] ss:$8 sps:$4 sm:$0xff]  }
 0x75c   : > { %v3369_v11 = vpack.c.bf16 %v3240_v3, %v3240_v3  ;;  %v3371_v39 = vpack.c.bf16 %v3281_v4, %v3281_v4  ;;  %v3242_v12 = vadd.f32 %v3241_v6, %v2532_v62  ;;  %v3283_v13 = vadd.f32 %v3282_v7, %v2540_v38  ;;  %v5462_v62 = vld [vmem:[#allocation16 + $0x244] ss:$8 sps:$4 sm:$0xff]   ;;  %v5463_v3 = vld [vmem:[#allocation16 + $0x340] ss:$8 sps:$4 sm:$0xff]   ;;  %v5468_v4 = vld [vmem:[#allocation16 + $0x234] ss:$8 sps:$4 sm:$0xff]  }
 0x75d   : > { %v3243_v14 = vpop.f32.mrf.mxu0  ;;  %v3284_v17 = vpop.f32.mrf.mxu1  ;;  %v5465_v38 = vld [vmem:[#allocation16 + $0x344] ss:$8 sps:$4 sm:$0xff]   ;;  %v5471_v6 = vld [vmem:[#allocation16 + $0x334] ss:$8 sps:$4 sm:$0xff]   ;;  %v2555_v7 = vsub.s32 7, %v6219_v18 }
 0x75e   : > { %v4841_v8 = vmul.bf16 3218784218, %v3369_v11  ;;  %v4843_v21 = vmul.bf16 3218784218, %v3371_v39  ;;  %v3370_v22 = vpack.c.bf16 %v3242_v12, %v3242_v12  ;;  %v3372_v23 = vpack.c.bf16 %v3283_v13, %v3283_v13  ;;  %v5466_v12 = vld [vmem:[#allocation16 + $0x230] ss:$8 sps:$4 sm:$0xff]  }
 0x75f   : > { %v3244_v25 = vpop.f32.mrf.mxu0  ;;  %v3285_v26 = vpop.f32.mrf.mxu1  ;;  %v5469_v13 = vld [vmem:[#allocation16 + $0x330] ss:$8 sps:$4 sm:$0xff]   ;;  %v5474_v14 = vld [vmem:[#allocation16 + $0x224] ss:$8 sps:$4 sm:$0xff]   ;;  %v2548_v17 = vrot.slane %v6396_v61, %v742_v16 }
 0x760   : > { %v3394_v27 = vmul.bf16 1069105081, %v4841_v8  ;;  %v3400_v10 = vmul.bf16 1069105081, %v4843_v21  ;;  %v4842_v28 = vmul.bf16 3218784218, %v3370_v22  ;;  %v2556_v8 = vrot.slane %v6396_v61, %v2555_v7 }
 0x761   : > { %v4844_v29 = vmul.bf16 3218784218, %v3372_v23  ;;  %v5477_v21 = vld [vmem:[#allocation16 + $0x324] ss:$8 sps:$4 sm:$0xff]  }
 0x762   : > { %5550 = vpow.bf16 %v3394_v27  ;;  %v3397_v30 = vmul.bf16 1069105081, %v4842_v28  ;;  %v5475_v28 = vld [vmem:[#allocation16 + $0x320] ss:$8 sps:$4 sm:$0xff]  }
 0x763   : > { %5552 = vpow.bf16 %v3400_v10  ;;  %v3403_v31 = vmul.bf16 1069105081, %v4844_v29  ;;  %v5480_v29 = vld [vmem:[#allocation16 + $0x214] ss:$8 sps:$4 sm:$0xff]  }
 0x764   : > { %5554 = vpow.bf16 %v3397_v30 }
 0x765   : > { %5556 = vpow.bf16 %v3403_v31 }
 0x770   : > { %v5551_v32 = vpop.eup %5550 }
 0x771   : > { %v5553_v34 = vpop.eup %5552  ;;  %v3417_v35 = vadd.bf16 1065369472, %v5551_v32 }
 0x772   : > { %v5555_v36 = vpop.eup %5554  ;;  %v3419_v9 = vadd.bf16 1065369472, %v5553_v34 }
 0x773   : > { %v5557_v24 = vpop.eup %5556  ;;  %5558 = vrcp.bf16 %v3417_v35  ;;  %v3418_v37 = vadd.bf16 1065369472, %v5555_v36 }
 0x774   : > { %5560 = vrcp.bf16 %v3419_v9  ;;  %v3420_v0 = vadd.bf16 1065369472, %v5557_v24 }
 0x775   : > { %5562 = vrcp.bf16 %v3418_v37  ;;  %v5478_v37 = vld [vmem:[#allocation16 + $0x210] ss:$8 sps:$4 sm:$0xff]  }
 0x776   : > { %5564 = vrcp.bf16 %v3420_v0 }
 0x781   : > { %v5559_v1 = vpop.eup %5558 }
 0x782   : > { %v5561_v33 = vpop.eup %5560  ;;  %v3426_v42 = vmul.bf16 1065369472, %v5559_v1 }
 0x783   : > { %v5563_v41 = vpop.eup %5562  ;;  %v3430_v47 = vmul.bf16 1065369472, %v5561_v33  ;;  %v5481_v33 = vld [vmem:[#allocation16 + $0x310] ss:$8 sps:$4 sm:$0xff]  }
 0x784   : > { %v5565_v44 = vpop.eup %5564  ;;  %v3428_v48 = vmul.bf16 1065369472, %v5563_v41  ;;  %v3441_v56 = vmul.bf16 %v3426_v42, %v3369_v11  ;;  %v2544_v11 = vrot.slane %v6396_v61, %v738_v15  ;;  %v5472_v15 = vld [vmem:[#allocation16 + $0x220] ss:$8 sps:$4 sm:$0xff]   ;;  %v5486_v41 = vld [vmem:[#allocation16 + $0x204] ss:$8 sps:$4 sm:$0xff]  }
 0x785   : > { %v3432_v50 = vmul.bf16 1065369472, %v5565_v44  ;;  %v3443_v58 = vmul.bf16 %v3430_v47, %v3371_v39  ;;  %v2552_v39 = vrot.slane %v6396_v61, %v2551_v2  ;;  %v5483_v61 = vld [vmem:[#allocation16 + $0x314] ss:$8 sps:$4 sm:$0xff]   ;;  %v5489_v42 = vld [vmem:[#allocation16 + $0x304] ss:$8 sps:$4 sm:$0xff]  }
 0x786   : > { %v3442_v54 = vmul.bf16 %v3428_v48, %v3370_v22 }
 0x787   : > { %v3444_v57 = vmul.bf16 %v3432_v50, %v3372_v23 }
 0x788   : > { %4261 = vmatprep.mubr.bf16.mxu0 %v3442_v54 }
 0x789   : > { %4302 = vmatprep.mubr.bf16.mxu1 %v3444_v57  ;;  %4262 = vmatmul.mubr.bf16.vlgmr.msra.gmra.mxu0 %v3441_v56  ;;  %v5487_v57 = vld [vmem:[#allocation16 + $0x300] ss:$8 sps:$4 sm:$0xff]  }
 0x78a   : > { %4303 = vmatmul.mubr.bf16.vlgmr.msra.gmra.mxu1 %v3443_v58  ;;  %4312 = vmatpush1.bf16.msra.mxu0 %v5442_v55  ;;  %v5484_v55 = vld [vmem:[#allocation16 + $0x200] ss:$8 sps:$4 sm:$0xff]   ;;  %v5490_v58 = vld [vmem:[#allocation16 + $0x2f0] ss:$8 sps:$4 sm:$0xff]  }
 0x78b   : > { %4353 = vmatpush1.bf16.msra.mxu1 %v5445_v51  ;;  %4313 = vmatprep.subr.bf16.mxu0 %v5450_v53  ;;  %v5492_v51 = vld [vmem:[#allocation16 + $0x2f4] ss:$8 sps:$4 sm:$0xff]  }
 0x78c   : > { %4354 = vmatprep.subr.bf16.mxu1 %v5453_v46  ;;  %v5495_v53 = vld [vmem:[#allocation16 + $0x3f4] ss:$8 sps:$4 sm:$0xff]   ;;  %v5493_v46 = vld [vmem:[#allocation16 + $0x3f0] ss:$8 sps:$4 sm:$0xff]  }
 0x78e   : > { %4314 = vmatpush1.bf16.msra.mxu0 %v5448_v52  ;;  %v5498_v52 = vld [vmem:[#allocation16 + $0x2e4] ss:$8 sps:$4 sm:$0xff]  }
 0x78f   : > { %4355 = vmatpush1.bf16.msra.mxu1 %v5451_v59  ;;  %4315 = vmatprep.subr.bf16.mxu0 %v5456_v60  ;;  %v5501_v59 = vld [vmem:[#allocation16 + $0x3e4] ss:$8 sps:$4 sm:$0xff]   ;;  %v5496_v60 = vld [vmem:[#allocation16 + $0x2e0] ss:$8 sps:$4 sm:$0xff]  }
 0x790   : > { %4356 = vmatprep.subr.bf16.mxu1 %v5459_v5  ;;  %v5499_v5 = vld [vmem:[#allocation16 + $0x3e0] ss:$8 sps:$4 sm:$0xff]  }
 0x792   : > { %4316 = vmatpush1.bf16.msra.mxu0 %v5454_v43  ;;  %v5504_v43 = vld [vmem:[#allocation16 + $0x2d4] ss:$8 sps:$4 sm:$0xff]  }
 0x793   : > { %4357 = vmatpush1.bf16.msra.mxu1 %v5457_v49  ;;  %4317 = vmatprep.subr.bf16.mxu0 %v5462_v62  ;;  %v5507_v49 = vld [vmem:[#allocation16 + $0x3d4] ss:$8 sps:$4 sm:$0xff]   ;;  %v5502_v62 = vld [vmem:[#allocation16 + $0x2d0] ss:$8 sps:$4 sm:$0xff]  }
 0x794   : > { %4358 = vmatprep.subr.bf16.mxu1 %v5465_v38  ;;  %v5505_v38 = vld [vmem:[#allocation16 + $0x3d0] ss:$8 sps:$4 sm:$0xff]  }
 0x796   : > { %4318 = vmatpush1.bf16.msra.mxu0 %v5460_v63  ;;  %v5510_v63 = vld [vmem:[#allocation16 + $0x2c4] ss:$8 sps:$4 sm:$0xff]  }
 0x797   : > { %4359 = vmatpush1.bf16.msra.mxu1 %v5463_v3  ;;  %4319 = vmatprep.subr.bf16.mxu0 %v5468_v4  ;;  %v5513_v3 = vld [vmem:[#allocation16 + $0x3c4] ss:$8 sps:$4 sm:$0xff]  }
 0x798   : > { %4360 = vmatprep.subr.bf16.mxu1 %v5471_v6 }
 0x799   : > { %v3321_v22 = vpop.f32.mrf.mxu0  ;;  %v3362_v23 = vpop.f32.mrf.mxu1 }
 0x79a   : > { %v3322_v25 = vadd.f32 %v3321_v22, %v2544_v11  ;;  %v3363_v26 = vadd.f32 %v3362_v23, %v2552_v39  ;;  %4320 = vmatpush1.bf16.msra.mxu0 %v5466_v12  ;;  %v5508_v39 = vld [vmem:[#allocation16 + $0x2c0] ss:$8 sps:$4 sm:$0xff]   ;;  %v5514_v22 = vld [vmem:[#allocation16 + $0x2b0] ss:$8 sps:$4 sm:$0xff]  }
 0x79b   : > { %4361 = vmatpush1.bf16.msra.mxu1 %v5469_v13  ;;  %v3323_v27 = vpop.f32.mrf.mxu0  ;;  %v3364_v10 = vpop.f32.mrf.mxu1  ;;  %4321 = vmatprep.subr.bf16.mxu0 %v5474_v14  ;;  %v5511_v14 = vld [vmem:[#allocation16 + $0x3c0] ss:$8 sps:$4 sm:$0xff]   ;;  %v5517_v23 = vld [vmem:[#allocation16 + $0x3b0] ss:$8 sps:$4 sm:$0xff]  }
 0x79c   : > { %v6418_v30 = vpack.c.bf16 %v3322_v25, %v3322_v25  ;;  %v6420_v18 = vpack.c.bf16 %v3363_v26, %v3363_v26  ;;  %v3324_v16 = vadd.f32 %v3323_v27, %v2548_v17  ;;  %v3365_v31 = vadd.f32 %v3364_v10, %v2556_v8  ;;  %4362 = vmatprep.subr.bf16.mxu1 %v5477_v21  ;;  %v5516_v17 = vld [vmem:[#allocation16 + $0x2b4] ss:$8 sps:$4 sm:$0xff]   ;;  %v5522_v25 = vld [vmem:[#allocation16 + $0x2a4] ss:$8 sps:$4 sm:$0xff]   ;;  %v5523_v27 = vld [vmem:[#allocation16 + $0x3a0] ss:$8 sps:$4 sm:$0xff]  }
 0x79d   : > { %v3325_v32 = vpop.f32.mrf.mxu0  ;;  %v3366_v34 = vpop.f32.mrf.mxu1  ;;  %v5519_v21 = vld [vmem:[#allocation16 + $0x3b4] ss:$8 sps:$4 sm:$0xff]   ;;  %v5525_v26 = vld [vmem:[#allocation16 + $0x3a4] ss:$8 sps:$4 sm:$0xff]  }
 0x79e   : > { %v4845_v35 = vmul.bf16 3218784218, %v6418_v30  ;;  %v4847_v36 = vmul.bf16 3218784218, %v6420_v18  ;;  %v6424_v9 = vpack.c.bf16 %v3324_v16, %v3324_v16  ;;  %v6426_v24 = vpack.c.bf16 %v3365_v31, %v3365_v31  ;;  %4322 = vmatpush1.bf16.msra.mxu0 %v5472_v15  ;;  %v5520_v15 = vld [vmem:[#allocation16 + $0x2a0] ss:$8 sps:$4 sm:$0xff]  }
 0x79f   : > { %4363 = vmatpush1.bf16.msra.mxu1 %v5475_v28  ;;  %v3326_v0 = vpop.f32.mrf.mxu0  ;;  %v3367_v1 = vpop.f32.mrf.mxu1  ;;  %4323 = vmatprep.subr.bf16.mxu0 %v5480_v29  ;;  %v5528_v10 = vld [vmem:[#allocation16 + $0x294] ss:$8 sps:$4 sm:$0xff]   ;;  %v5526_v29 = vld [vmem:[#allocation16 + $0x290] ss:$8 sps:$4 sm:$0xff]   ;;  %v5534_v31 = vld [vmem:[#allocation16 + $0x284] ss:$8 sps:$4 sm:$0xff]  }
 0x7a0   : > { %v3406_v44 = vmul.bf16 1069105081, %v4845_v35  ;;  %v3412_v47 = vmul.bf16 1069105081, %v4847_v36  ;;  %v4846_v48 = vmul.bf16 3218784218, %v6424_v9  ;;  %4364 = vmatprep.subr.bf16.mxu1 %v5483_v61 }
 0x7a1   : > { %v4848_v50 = vmul.bf16 3218784218, %v6426_v24  ;;  %v5531_v28 = vld [vmem:[#allocation16 + $0x394] ss:$8 sps:$4 sm:$0xff]   ;;  %v5529_v16 = vld [vmem:[#allocation16 + $0x390] ss:$8 sps:$4 sm:$0xff]  }
 0x7a2   : > { %5566 = vpow.bf16 %v3406_v44  ;;  %v3409_v54 = vmul.bf16 1069105081, %v4846_v48  ;;  %4324 = vmatpush1.bf16.msra.mxu0 %v5478_v37  ;;  %v5537_v61 = vld [vmem:[#allocation16 + $0x384] ss:$8 sps:$4 sm:$0xff]   ;;  %v5532_v35 = vld [vmem:[#allocation16 + $0x280] ss:$8 sps:$4 sm:$0xff]  }
 0x7a3   : > { %5568 = vpow.bf16 %v3412_v47  ;;  %v3415_v56 = vmul.bf16 1069105081, %v4848_v50  ;;  %4365 = vmatpush1.bf16.msra.mxu1 %v5481_v33  ;;  %4325 = vmatprep.subr.bf16.mxu0 %v5486_v41  ;;  %v5535_v0 = vld [vmem:[#allocation16 + $0x380] ss:$8 sps:$4 sm:$0xff]  }
 0x7a4   : > { %5570 = vpow.bf16 %v3409_v54  ;;  %4366 = vmatprep.subr.bf16.mxu1 %v5489_v42 }
 0x7a5   : > { %5572 = vpow.bf16 %v3415_v56 }
 0x7a6   : > { %4326 = vmatpush1.bf16.msra.mxu0 %v5484_v55 }
 0x7a7   : > { %4367 = vmatpush1.bf16.msra.mxu1 %v5487_v57  ;;  %4327 = vmatprep.subr.bf16.mxu0 %v5492_v51 }
 0x7a8   : > { %4368 = vmatprep.subr.bf16.mxu1 %v5495_v53 }
 0x7aa   : > { %4328 = vmatpush2.bf16.msra.mxu0 %v5490_v58 }
 0x7ab   : > { %4369 = vmatpush2.bf16.msra.mxu1 %v5493_v46  ;;  %4329 = vmatprep.subr.bf16.mxu0 %v5498_v52 }
 0x7ac   : > { %4370 = vmatprep.subr.bf16.mxu1 %v5501_v59 }
 0x7ae   : > { %4330 = vmatpush2.bf16.msra.mxu0 %v5496_v60 }
 0x7af   : > { %4371 = vmatpush2.bf16.msra.mxu1 %v5499_v5  ;;  %4331 = vmatprep.subr.bf16.mxu0 %v5504_v43 }
 0x7b0   : > { %v5567_v2 = vpop.eup %5566  ;;  %4372 = vmatprep.subr.bf16.mxu1 %v5507_v49 }
 0x7b1   : > { %v5569_v4 = vpop.eup %5568  ;;  %v3421_v6 = vadd.bf16 1065369472, %v5567_v2 }
 0x7b2   : > { %v5571_v7 = vpop.eup %5570  ;;  %v3423_v11 = vadd.bf16 1065369472, %v5569_v4  ;;  %4332 = vmatpush2.bf16.msra.mxu0 %v5502_v62 }
 0x7b3   : > { %v5573_v12 = vpop.eup %5572  ;;  %5574 = vrcp.bf16 %v3421_v6  ;;  %v3422_v13 = vadd.bf16 1065369472, %v5571_v7  ;;  %4373 = vmatpush2.bf16.msra.mxu1 %v5505_v38  ;;  %4333 = vmatprep.subr.bf16.mxu0 %v5510_v63 }
 0x7b4   : > { %5576 = vrcp.bf16 %v3423_v11  ;;  %v3424_v8 = vadd.bf16 1065369472, %v5573_v12  ;;  %4374 = vmatprep.subr.bf16.mxu1 %v5513_v3 }
 0x7b5   : > { %5578 = vrcp.bf16 %v3422_v13 }
 0x7b6   : > { %5580 = vrcp.bf16 %v3424_v8  ;;  %4334 = vmatpush2.bf16.msra.mxu0 %v5508_v39 }
 0x7b7   : > { %4375 = vmatpush2.bf16.msra.mxu1 %v5511_v14  ;;  %4335 = vmatprep.subr.bf16.mxu0 %v5516_v17 }
 0x7b8   : > { %4376 = vmatprep.subr.bf16.mxu1 %v5519_v21 }
 0x7ba   : > { %4336 = vmatpush2.bf16.msra.mxu0 %v5514_v22 }
 0x7bb   : > { %4377 = vmatpush2.bf16.msra.mxu1 %v5517_v23  ;;  %4337 = vmatprep.subr.bf16.mxu0 %v5522_v25 }
 0x7bc   : > { %4378 = vmatprep.subr.bf16.mxu1 %v5525_v26 }
 0x7be   : > { %4338 = vmatpush2.bf16.msra.mxu0 %v5520_v15 }
 0x7bf   : > { %4379 = vmatpush2.bf16.msra.mxu1 %v5523_v27  ;;  %4339 = vmatprep.subr.bf16.mxu0 %v5528_v10 }
 0x7c0   : > { %4380 = vmatprep.subr.bf16.mxu1 %v5531_v28 }
 0x7c1   : > { %v5575_v32 = vpop.eup %5574 }
 0x7c2   : > { %v5577_v34 = vpop.eup %5576  ;;  %4340 = vmatpush2.bf16.msra.mxu0 %v5526_v29  ;;  %v3434_v37 = vmul.bf16 1065369472, %v5575_v32 }
 0x7c3   : > { %v5579_v36 = vpop.eup %5578  ;;  %4381 = vmatpush2.bf16.msra.mxu1 %v5529_v16  ;;  %4341 = vmatprep.subr.bf16.mxu0 %v5534_v31  ;;  %v3438_v33 = vmul.bf16 1065369472, %v5577_v34 }
 0x7c4   : > { %v5581_v1 = vpop.eup %5580  ;;  %v3436_v41 = vmul.bf16 1065369472, %v5579_v36  ;;  %4382 = vmatprep.subr.bf16.mxu1 %v5537_v61  ;;  %v3445_v47 = vmul.bf16 %v3434_v37, %v6418_v30  ;;  %v3577_v30 = vld [vmem:[%s6490_s12] sm:$0x3] }
 0x7c5   : > { %v3440_v42 = vmul.bf16 1065369472, %v5581_v1  ;;  %v3447_v50 = vmul.bf16 %v3438_v33, %v6420_v18  ;;  %v3582_v18 = vrot.slane %v3577_v30, %v6225_v20 }
 0x7c6   : > { %v3446_v44 = vmul.bf16 %v3436_v41, %v6424_v9  ;;  %4342 = vmatpush2.bf16.msra.mxu0 %v5532_v35 }
 0x7c7   : > { %v3448_v48 = vmul.bf16 %v3440_v42, %v6426_v24  ;;  %4383 = vmatpush2.bf16.msra.mxu1 %v5535_v0  ;;  %v3586_v24 = vrot.slane %v3577_v30, %v6222_v19 }
 0x7c8   : > { %4343 = vmatprep.mubr.bf16.mxu0 %v3446_v44 }
 0x7c9   : > { %4384 = vmatprep.mubr.bf16.mxu1 %v3448_v48  ;;  %4344 = vmatmul.mubr.bf16.vlgmr.msra.gmra.mxu0 %v3445_v47 }
 0x7ca   : > { %4385 = vmatmul.mubr.bf16.vlgmr.msra.gmra.mxu1 %v3447_v50 }
 0x849   : > { %v4263_v54 = vpop.f32.mrf.mxu0 }
 0x84a   : > { %v4304_v55 = vpop.f32.mrf.mxu1  ;;  %v4264_v46 = vadd.f32 %v4263_v54, %v3582_v18 }
 0x84b   : > { %v4265_v56 = vpop.f32.mrf.mxu0 }
 0x84c   : > { %v4306_v57 = vpop.f32.mrf.mxu1  ;;  %v4266_v52 = vadd.f32 %v4265_v56, %v3586_v24  ;;  %v4305_v59 = vadd.f32 %v4304_v55, %v4264_v46 }
 0x84d   : > { %v4267_v51 = vpop.f32.mrf.mxu0 }
 0x84e   : > { %v4308_v53 = vpop.f32.mrf.mxu1  ;;  %v4307_v5 = vadd.f32 %v4306_v57, %v4266_v52 }
 0x84f   : > { %v4268_v58 = vpop.f32.mrf.mxu0 }
 0x850   : > { %v4309_v9 = vpop.f32.mrf.mxu1 }
 0x889   : > { %v4345_v60 = vpop.f32.mrf.mxu0 }
 0x88a   : > { %v4346_v43 = vadd.f32 %v4345_v60, %v4305_v59  ;;  %v4386_v49 = vpop.f32.mrf.mxu1 }
 0x88b   : > { %v4347_v62 = vpop.f32.mrf.mxu0 }
 0x88c   : > { %v4387_v38 = vadd.f32 %v4386_v49, %v4346_v43  ;;  %v4348_v63 = vadd.f32 %v4347_v62, %v4307_v5  ;;  %v4388_v2 = vpop.f32.mrf.mxu1 }
 0x88d   : > { %v4349_v3 = vpop.f32.mrf.mxu0 }
 0x88e   : > { %v4393_v19 = vadd.f32 %v4387_v38, %v6370_v40  ;;  %v4389_v20 = vadd.f32 %v4388_v2, %v4348_v63  ;;  %v4390_v4 = vpop.f32.mrf.mxu1 }
 0x88f   : > { %v4350_v6 = vpop.f32.mrf.mxu0 }
 0x890   : > { %4395 = vst [vmem:[%s564_s18] sm:$0xff] %v4393_v19  ;;  %v4394_v7 = vadd.f32 %v4389_v20, %v6373_v45  ;;  %v4391_v11 = vpop.f32.mrf.mxu1 }
 0x892   : > { %4396 = vst [vmem:[%s564_s18 + $0x8] sm:$0xff] %v4394_v7 }
 0x893   : > { %5833 = shalt.err (!%p5830_p11)
}
 0x894   : > { %s5834_s15 = scalar_lea.hbm %s4410_s11, 256  ;;  %s5838_s17 = scalar_lea.hbm %s6491_s13, 512 }
 0x895   : > { %p5835_p1 = scmp.ne.s32.totalorder %s4410_s11, %s5834_s15  ;;  %p5839_p13 = scmp.lt.s32.totalorder %s4410_s11, %s6491_s13 }
 0x896   : > { %p5840_p0 = scmp.lt.s32.totalorder %s5838_s17, %s5834_s15 }
 0x897   : > { %p5836_p7 = pnand %p5835_p1, %p6531_p8 }
 0x898   : > { %p5841_p5 = por %p5840_p0, %p5839_p13 }
 0x899   : > { %p5837_p12 = pneg %p5836_p7 }
 0x89b   : > { %p5842_p2 = pnand %p5841_p5, %p5837_p12 }
 0x89d   : > { %5845 = shalt.err (!%p5842_p2)
}
 0x89e   : > { %5050 = dma.vmem_to_hbm [thread:$0]  (%p6531_p8), %s4413_s30, 256, %s4410_s11, %s4398_s14  }
 0x89f PF: > { %s4424_s23 = sand.u32 1, %s5888_s25   ;;  %p6532_p3 = scmp.ne.s32.totalorder %s6519_s1, 0 }
 0x8a0   : > { %p6533_p4 = scmp.ge.s32.totalorder %s5900_s28, 2  ;;  %s4425_s18 = scalar_lea.sflag [#allocation4], %s4424_s23 }
 0x8a2   : > { %p5082_p10 = pnand %p6533_p4, %p6532_p3 }
 0x8a4   : > { %p5083_p6 = pneg %p5082_p10 }
 0x8a6   : > { %5883 = dma.done.wait (%p5083_p6), %s4425_s18, 256  }
 0x8a7   : > { %5885 = vsyncadd (%p5083_p6), %s4425_s18, 4294967040  ;;  %p30_p9 = scmp.ge.s32.totalorder %s6116_s21, 4   ;;  %s6534_s25 = smov %s5892_s26 }
 0x8a8   : > { %s6535_s26 = smov %s5896_s27  ;;  %s6536_s27 = smov %s6127_s16 }
 0x8a9   : > { %s6537_s28 = smov %s6116_s21  ;;  %32 = sbr.rel (!%p30_p9) target bundleno = 18 (0x12), region = 149 }
 0x8ae   :  { %4430 = vsyncpa [#allocation3], 1 }
 0x8af   :  { %4432 = vsyncpa [#allocation3 + $0x1], 1 }
 0x8b0   :  { %4433 = vsyncpa [#allocation6], 1 }
 0x8b1   :  { %4434 = vsyncpa [#allocation9], 1 }
 0x8b2   :  { %4435 = vsyncpa [#allocation12], 1 }
 0x8b3   :  { %4436 = vsyncpa [#allocation15], 1 }
 0x8b4   :  { %4437 = vsyncpa [#allocation4], 1 }
 0x8b5   :  { %4439 = vsyncpa [#allocation4 + $0x1], 1 }

</bundles_post_ra>
